<compile_context>
chip_gen: v5e
topology: v5e:2x2
jax: 0.10.0
libtpu: 0.0.40
codegen_flags: <defaults>
</compile_context>

<pallas_src>
from functools import partial

import jax
import jax.numpy as jnp
from jax.experimental import pallas as pl
from jax.experimental.pallas import tpu as pltpu

_LH = 8  # left-halo width: keeps the interior sublane-aligned inside the padded slabs


def _round_up(x, m):
    return (x + m - 1) // m * m


def _zero_halo(ref, W):
    """Zero only the halo bands of a padded (Hp, Wa, C) slab (interior untouched)."""
    Hp, Wa, C = ref.shape
    dt = ref.dtype
    ref[0:1, :, :] = jnp.zeros((1, Wa, C), dt)                         # top row
    ref[Hp - 1:Hp, :, :] = jnp.zeros((1, Wa, C), dt)                   # bottom row
    ref[:, 0:_LH, :] = jnp.zeros((Hp, _LH, C), dt)                     # left halo
    ref[:, _LH + W:Wa, :] = jnp.zeros((Hp, Wa - _LH - W, C), dt)       # right halo + pad


def _basic_block_kernel(x_ref, w1_ref, s1_ref, b1_ref, w2_ref, s2_ref, b2_ref,
                        out_ref, xs_ref, ys_ref, *, fold_kx):
    """Fused conv1->BN1->ReLU->conv2->BN2->(+x)->ReLU for one batch block.

    x_ref  : (Nb, H, W, C)  unpadded input activations (input dtype, e.g. f32)
    w*_ref : (3, 3*C, C)    row-folded 3x3 weights, row index = kx*C + ci (compute dtype)
    s*/b*  : (1, C)         inference-mode BatchNorm folded scale / bias (f32)
    out_ref: (Nb, H, W, C)
    xs_ref : (Hp, Wa, C)    VMEM scratch: zero-haloed input slab (compute dtype)
    ys_ref : (Hp, Wa, C)    VMEM scratch: zero-haloed conv1 output slab
    """
    Nb, H, W, C = x_ref.shape
    cdt = xs_ref.dtype
    f32 = jnp.float32

    # Zero only the halo ring/bands; interior is overwritten per image.  Done every
    # grid step so megacore (parallel) grid partitioning on v7x stays correct.
    _zero_halo(xs_ref, W)
    _zero_halo(ys_ref, W)

    def conv3x3(src_ref, w_ref):
        """3x3 conv of the zero-haloed slab in src_ref -> f32 (H*W, C)."""
        # Build the three kx-shifted slabs once per conv (not once per tap).  Only the
        # kx != 1 slices pay a sublane-shift copy; the ky slices below are on the
        # outer dim and are free.
        xk = [src_ref[:, _LH - 1 + kx:_LH - 1 + kx + W, :] for kx in range(3)]
        acc = jnp.zeros((H * W, C), f32)
        if fold_kx:
            # Fold kx into the contraction: K = 3*C, 3 dots per conv (fills the
            # 256-deep MXU on v6e/v7x).  Lane-aligned concat because C % 128 == 0.
            xc = jnp.concatenate(xk, axis=-1)                       # (Hp, W, 3C)
            for ky in range(3):
                acc = acc + jnp.dot(xc[ky:ky + H].reshape(H * W, 3 * C), w_ref[ky],
                                    preferred_element_type=f32)
        else:
            for ky in range(3):
                wk = w_ref[ky]                                      # (3C, C)
                for kx in range(3):
                    acc = acc + jnp.dot(xk[kx][ky:ky + H].reshape(H * W, C),
                                        wk[kx * C:(kx + 1) * C, :],
                                        preferred_element_type=f32)
        return acc

    s1 = s1_ref[...]
    b1 = b1_ref[...]
    s2 = s2_ref[...]
    b2 = b2_ref[...]

    for b in range(Nb):                       # static unroll over images in this step
        x_img = x_ref[b]                      # (H, W, C), original dtype (f32 residual)

        # ---- pad fused in-kernel: aligned interior copy into the haloed slab ----
        xs_ref[1:1 + H, _LH:_LH + W, :] = x_img.astype(cdt)

        # ---- conv1 + BN1 + ReLU -> haloed VMEM slab (never touches HBM) ----
        a1 = conv3x3(xs_ref, w1_ref)
        y1 = jnp.maximum(a1 * s1 + b1, 0.0)
        ys_ref[1:1 + H, _LH:_LH + W, :] = y1.reshape(H, W, C).astype(cdt)

        # ---- conv2 + BN2 + f32 identity add + ReLU -> output ----
        a2 = conv3x3(ys_ref, w2_ref)
        res = x_img.astype(f32).reshape(H * W, C)
        z = jnp.maximum(a2 * s2 + b2 + res, 0.0)
        out_ref[b:b + 1] = z.reshape(1, H, W, C).astype(out_ref.dtype)


@partial(jax.jit, static_argnames=("compute_dtype", "out_dtype", "images_per_step"))
def basic_block_pallas_nhwc(x, params, *, compute_dtype=jnp.bfloat16,
                            out_dtype=jnp.float32, images_per_step=1):
    """BasicBlock forward, NHWC activations.  stride=1, downsample=None.

    x: (N, H, W, C) -> (N, H, W, C) in out_dtype.  In a full network, keep NHWC
    activations between blocks (and out_dtype=bf16) to avoid transposes/casts.
    """
    N, H, W, C = x.shape
    kh, kw, cin, cout = params["w1"].shape
    assert (kh, kw) == (3, 3) and cin == C and cout == C, (
        "stride=1 / downsample=None BasicBlock requires inplanes == planes")
    Nb = images_per_step
    assert N % Nb == 0, "batch must be divisible by images_per_step"

    Hp = H + 2
    Wa = _round_up(_LH + W + 1, 8)        # 8-wide left halo + interior + >=1 right halo
    fold_kx = (C % 128 == 0)              # lane-aligned kx folding (K = 3*C)

    # Row-folded weights: (3, 3, Cin, Cout) -> (ky, kx*Cin + ci, Cout).
    w1r = params["w1"].reshape(3, 3 * C, C).astype(compute_dtype)
    w2r = params["w2"].reshape(3, 3 * C, C).astype(compute_dtype)
    s1 = params["scale1"].astype(jnp.float32).reshape(1, C)
    b1 = params["bias1"].astype(jnp.float32).reshape(1, C)
    s2 = params["scale2"].astype(jnp.float32).reshape(1, C)
    b2 = params["bias2"].astype(jnp.float32).reshape(1, C)

    img_spec = lambda shp: pl.BlockSpec(shp, lambda n: (n, 0, 0, 0))
    cst3 = lambda n: (0, 0, 0)
    cst2 = lambda n: (0, 0)

    # Advisory cost estimate (two 3x3 convs) for XLA's scheduler.
    flops = 2 * (2 * N * H * W * 9 * C * C)
    bytes_accessed = int(x.size * x.dtype.itemsize
                         + (w1r.size + w2r.size) * jnp.dtype(compute_dtype).itemsize
                         + 4 * C * 4
                         + N * H * W * C * jnp.dtype(out_dtype).itemsize)
    cost = pl.CostEstimate(flops=flops, transcendentals=0, bytes_accessed=bytes_accessed)

    # VMEM budget: double-buffered per-step IO blocks + (double-buffered) resident
    # weights + the two haloed scratch slabs; >= the 32 MiB scoped default, capped.
    csz = jnp.dtype(compute_dtype).itemsize
    need = (2 * Nb * H * W * C * (x.dtype.itemsize + jnp.dtype(out_dtype).itemsize)
            + 2 * (w1r.size + w2r.size) * csz
            + 2 * Hp * Wa * C * csz
            + (1 << 20))
    vmem_limit = int(min(max(32 * 1024 * 1024, 2 * need), 100 * 1024 * 1024))

    out = pl.pallas_call(
        partial(_basic_block_kernel, fold_kx=fold_kx),
        out_shape=jax.ShapeDtypeStruct((N, H, W, C), out_dtype),
        grid_spec=pltpu.PrefetchScalarGridSpec(
            num_scalar_prefetch=0,
            grid=(N // Nb,),
            in_specs=[
                img_spec((Nb, H, W, C)),             # x (per-step batch block)
                pl.BlockSpec((3, 3 * C, C), cst3),   # w1 (resident)
                pl.BlockSpec((1, C), cst2),          # scale1
                pl.BlockSpec((1, C), cst2),          # bias1
                pl.BlockSpec((3, 3 * C, C), cst3),   # w2
                pl.BlockSpec((1, C), cst2),          # scale2
                pl.BlockSpec((1, C), cst2),          # bias2
            ],
            out_specs=img_spec((Nb, H, W, C)),
            scratch_shapes=[pltpu.VMEM((Hp, Wa, C), compute_dtype),
                            pltpu.VMEM((Hp, Wa, C), compute_dtype)],
        ),
        compiler_params=pltpu.CompilerParams(
            dimension_semantics=("parallel",),        # v7x: shard batch over 2 TCs
            vmem_limit_bytes=vmem_limit,
        ),
        cost_estimate=cost,
    )(x, w1r, s1, b1, w2r, s2, b2)
    return out


def basic_block_pallas(x_nchw, params, *, compute_dtype=jnp.bfloat16,
                       out_dtype=jnp.float32, images_per_step=1):
    """PyTorch-interface BasicBlock forward (NCHW in / NCHW out).

    TODO(synk): in a full network keep activations NHWC end-to-end (use
    basic_block_pallas_nhwc directly) to drop these two transposes; each one is a
    full HBM round trip around a memory-bound kernel.
    """
    x = jnp.transpose(x_nchw, (0, 2, 3, 1))
    y = basic_block_pallas_nhwc(x, params, compute_dtype=compute_dtype,
                                out_dtype=out_dtype, images_per_step=images_per_step)
    return jnp.transpose(y, (0, 3, 1, 2))


def basic_block_reference(x_nchw, params):
    """Pure-JAX f32 reference (lax.conv, HIGHEST precision) for correctness checks."""
    x = jnp.transpose(x_nchw, (0, 2, 3, 1)).astype(jnp.float32)
    dn = ("NHWC", "HWIO", "NHWC")
    hp = jax.lax.Precision.HIGHEST
    y = jax.lax.conv_general_dilated(x, params["w1"].astype(jnp.float32), (1, 1),
                                     "SAME", dimension_numbers=dn, precision=hp)
    y = jnp.maximum(y * params["scale1"] + params["bias1"], 0.0)
    z = jax.lax.conv_general_dilated(y, params["w2"].astype(jnp.float32), (1, 1),
                                     "SAME", dimension_numbers=dn, precision=hp)
    z = jnp.maximum(z * params["scale2"] + params["bias2"] + x, 0.0)
    return jnp.transpose(z, (0, 3, 1, 2))


def make_params(key, planes, eps=1e-5):
    """Random BasicBlock params (HWIO conv weights); inference-mode BatchNorm folded
    into per-channel scale/bias: scale = gamma/sqrt(var+eps), bias = beta - mean*scale."""
    ks = jax.random.split(key, 10)
    w1 = 0.1 * jax.random.normal(ks[0], (3, 3, planes, planes), jnp.float32)
    w2 = 0.1 * jax.random.normal(ks[1], (3, 3, planes, planes), jnp.float32)

    def bn_fold(kg, kb, km, kv):
        gamma = 1.0 + 0.1 * jax.random.normal(kg, (planes,), jnp.float32)
        beta = 0.1 * jax.random.normal(kb, (planes,), jnp.float32)
        mean = 0.1 * jax.random.normal(km, (planes,), jnp.float32)
        var = 0.5 + jnp.abs(jax.random.normal(kv, (planes,), jnp.float32))
        scale = gamma / jnp.sqrt(var + eps)
        return scale, beta - mean * scale

    scale1, bias1 = bn_fold(ks[2], ks[3], ks[4], ks[5])
    scale2, bias2 = bn_fold(ks[6], ks[7], ks[8], ks[9])
    return {"w1": w1, "w2": w2, "scale1": scale1, "bias1": bias1,
            "scale2": scale2, "bias2": bias2}


def _rel_l2(a, b):
    a = a.astype(jnp.float32)
    b = b.astype(jnp.float32)
    return float(jnp.linalg.norm((a - b).ravel()) / (jnp.linalg.norm(b.ravel()) + 1e-12))


if __name__ == "__main__":
    key = jax.random.PRNGKey(0)
    kx1, kp1, kx2, kp2 = jax.random.split(key, 4)

    # ---- Case 1 & 2: small block (per-tap dot path, C not a multiple of 128) ----
    N, C, H, W = 2, 16, 16, 16
    x = jax.random.normal(kx1, (N, C, H, W), jnp.float32)
    params = make_params(kp1, planes=C)
    ref = jax.block_until_ready(basic_block_reference(x, params))

    out_f32 = jax.block_until_ready(
        basic_block_pallas(x, params, compute_dtype=jnp.float32))
    assert out_f32.shape == (N, C, H, W) and out_f32.dtype == jnp.float32
    e_f32 = _rel_l2(out_f32, ref)
    assert e_f32 < 5e-4, f"f32 path mismatch vs reference: rel_l2={e_f32}"

    out_bf16 = jax.block_until_ready(
        basic_block_pallas(x, params, compute_dtype=jnp.bfloat16))
    e_bf16 = _rel_l2(out_bf16, ref)
    assert e_bf16 < 3e-2, f"bf16 path mismatch vs reference: rel_l2={e_bf16}"

    # ---- Case 3: C=128 -> folded K=3C dot path, 2 images per grid step ----
    N2, C2, H2, W2 = 4, 128, 8, 8
    x2 = jax.random.normal(kx2, (N2, C2, H2, W2), jnp.float32)
    params2 = make_params(kp2, planes=C2)
    ref2 = jax.block_until_ready(basic_block_reference(x2, params2))
    out2 = jax.block_until_ready(
        basic_block_pallas(x2, params2, compute_dtype=jnp.bfloat16, images_per_step=2))
    e_fold = _rel_l2(out2, ref2)
    assert e_fold < 3e-2, f"folded bf16 path mismatch vs reference: rel_l2={e_fold}"

    print("KERNEL_OK")
</pallas_src>

<mosaic_0001>
module attributes {stable_mosaic.version = 11 : i64} {
  func.func @_basic_block_kernel(%arg0: i32, %arg1: memref<1x16x16x16xf32, #tpu.memory_space<vmem>>, %arg2: memref<3x48x16xf32, #tpu.memory_space<vmem>>, %arg3: memref<1x16xf32, #tpu.memory_space<vmem>>, %arg4: memref<1x16xf32, #tpu.memory_space<vmem>>, %arg5: memref<3x48x16xf32, #tpu.memory_space<vmem>>, %arg6: memref<1x16xf32, #tpu.memory_space<vmem>>, %arg7: memref<1x16xf32, #tpu.memory_space<vmem>>, %arg8: memref<1x16x16x16xf32, #tpu.memory_space<vmem>>, %arg9: memref<18x32x16xf32, #tpu.memory_space<vmem>>, %arg10: memref<18x32x16xf32, #tpu.memory_space<vmem>>) attributes {dimension_semantics = [#tpu.dimension_semantics<parallel>], iteration_bounds = array<i64: 2>, scalar_prefetch = 0 : i64, scratch_operands = 2 : i64, tpu.core_type = #tpu.core_type<tc>, window_params = [{transform_indices = @transform_0, window_bounds = array<i64: 1, 16, 16, 16>}, {pipeline_mode = #tpu.pipeline_mode<synchronous>, transform_indices = @transform_1, window_bounds = array<i64: 3, 48, 16>}, {pipeline_mode = #tpu.pipeline_mode<synchronous>, transform_indices = @transform_2, window_bounds = array<i64: 1, 16>}, {pipeline_mode = #tpu.pipeline_mode<synchronous>, transform_indices = @transform_3, window_bounds = array<i64: 1, 16>}, {pipeline_mode = #tpu.pipeline_mode<synchronous>, transform_indices = @transform_4, window_bounds = array<i64: 3, 48, 16>}, {pipeline_mode = #tpu.pipeline_mode<synchronous>, transform_indices = @transform_5, window_bounds = array<i64: 1, 16>}, {pipeline_mode = #tpu.pipeline_mode<synchronous>, transform_indices = @transform_6, window_bounds = array<i64: 1, 16>}, {transform_indices = @transform_7, window_bounds = array<i64: 1, 16, 16, 16>}]} {
    %cst = arith.constant 0.000000e+00 : f32
    %0 = vector.broadcast %cst : f32 to vector<1x32x16xf32>
    %c0 = arith.constant 0 : index
    %c0_0 = arith.constant 0 : index
    %c0_1 = arith.constant 0 : index
    %1 = vector.load %arg9[%c0, %c0_0, %c0_1] : memref<18x32x16xf32, #tpu.memory_space<vmem>>, vector<1x32x16xf32>
    tpu.vector_store %arg9[%c0, %c0_0, %c0_1], %0 {strides = array<i32>} : memref<18x32x16xf32, #tpu.memory_space<vmem>>, vector<1x32x16xf32>,
    %cst_2 = arith.constant 0.000000e+00 : f32
    %2 = vector.broadcast %cst_2 : f32 to vector<1x32x16xf32>
    %c17 = arith.constant 17 : index
    %c0_3 = arith.constant 0 : index
    %c0_4 = arith.constant 0 : index
    %3 = vector.load %arg9[%c17, %c0_3, %c0_4] : memref<18x32x16xf32, #tpu.memory_space<vmem>>, vector<1x32x16xf32>
    tpu.vector_store %arg9[%c17, %c0_3, %c0_4], %2 {strides = array<i32>} : memref<18x32x16xf32, #tpu.memory_space<vmem>>, vector<1x32x16xf32>,
    %cst_5 = arith.constant 0.000000e+00 : f32
    %4 = vector.broadcast %cst_5 : f32 to vector<18x8x16xf32>
    %c0_6 = arith.constant 0 : index
    %c0_7 = arith.constant 0 : index
    %c0_8 = arith.constant 0 : index
    %5 = vector.load %arg9[%c0_6, %c0_7, %c0_8] : memref<18x32x16xf32, #tpu.memory_space<vmem>>, vector<18x8x16xf32>
    tpu.vector_store %arg9[%c0_6, %c0_7, %c0_8], %4 {strides = array<i32>} : memref<18x32x16xf32, #tpu.memory_space<vmem>>, vector<18x8x16xf32>,
    %cst_9 = arith.constant 0.000000e+00 : f32
    %6 = vector.broadcast %cst_9 : f32 to vector<18x8x16xf32>
    %c0_10 = arith.constant 0 : index
    %c24 = arith.constant 24 : index
    %c0_11 = arith.constant 0 : index
    %7 = vector.load %arg9[%c0_10, %c24, %c0_11] : memref<18x32x16xf32, #tpu.memory_space<vmem>>, vector<18x8x16xf32>
    tpu.vector_store %arg9[%c0_10, %c24, %c0_11], %6 {strides = array<i32>} : memref<18x32x16xf32, #tpu.memory_space<vmem>>, vector<18x8x16xf32>,
    %cst_12 = arith.constant 0.000000e+00 : f32
    %8 = vector.broadcast %cst_12 : f32 to vector<1x32x16xf32>
    %c0_13 = arith.constant 0 : index
    %c0_14 = arith.constant 0 : index
    %c0_15 = arith.constant 0 : index
    %9 = vector.load %arg10[%c0_13, %c0_14, %c0_15] : memref<18x32x16xf32, #tpu.memory_space<vmem>>, vector<1x32x16xf32>
    tpu.vector_store %arg10[%c0_13, %c0_14, %c0_15], %8 {strides = array<i32>} : memref<18x32x16xf32, #tpu.memory_space<vmem>>, vector<1x32x16xf32>,
    %cst_16 = arith.constant 0.000000e+00 : f32
    %10 = vector.broadcast %cst_16 : f32 to vector<1x32x16xf32>
    %c17_17 = arith.constant 17 : index
    %c0_18 = arith.constant 0 : index
    %c0_19 = arith.constant 0 : index
    %11 = vector.load %arg10[%c17_17, %c0_18, %c0_19] : memref<18x32x16xf32, #tpu.memory_space<vmem>>, vector<1x32x16xf32>
    tpu.vector_store %arg10[%c17_17, %c0_18, %c0_19], %10 {strides = array<i32>} : memref<18x32x16xf32, #tpu.memory_space<vmem>>, vector<1x32x16xf32>,
    %cst_20 = arith.constant 0.000000e+00 : f32
    %12 = vector.broadcast %cst_20 : f32 to vector<18x8x16xf32>
    %c0_21 = arith.constant 0 : index
    %c0_22 = arith.constant 0 : index
    %c0_23 = arith.constant 0 : index
    %13 = vector.load %arg10[%c0_21, %c0_22, %c0_23] : memref<18x32x16xf32, #tpu.memory_space<vmem>>, vector<18x8x16xf32>
    tpu.vector_store %arg10[%c0_21, %c0_22, %c0_23], %12 {strides = array<i32>} : memref<18x32x16xf32, #tpu.memory_space<vmem>>, vector<18x8x16xf32>,
    %cst_24 = arith.constant 0.000000e+00 : f32
    %14 = vector.broadcast %cst_24 : f32 to vector<18x8x16xf32>
    %c0_25 = arith.constant 0 : index
    %c24_26 = arith.constant 24 : index
    %c0_27 = arith.constant 0 : index
    %15 = vector.load %arg10[%c0_25, %c24_26, %c0_27] : memref<18x32x16xf32, #tpu.memory_space<vmem>>, vector<18x8x16xf32>
    tpu.vector_store %arg10[%c0_25, %c24_26, %c0_27], %14 {strides = array<i32>} : memref<18x32x16xf32, #tpu.memory_space<vmem>>, vector<18x8x16xf32>,
    %c0_28 = arith.constant 0 : index
    %c0_29 = arith.constant 0 : index
    %16 = vector.load %arg3[%c0_28, %c0_29] : memref<1x16xf32, #tpu.memory_space<vmem>>, vector<1x16xf32>
    %c0_30 = arith.constant 0 : index
    %c0_31 = arith.constant 0 : index
    %17 = vector.load %arg4[%c0_30, %c0_31] : memref<1x16xf32, #tpu.memory_space<vmem>>, vector<1x16xf32>
    %c0_32 = arith.constant 0 : index
    %c0_33 = arith.constant 0 : index
    %18 = vector.load %arg6[%c0_32, %c0_33] : memref<1x16xf32, #tpu.memory_space<vmem>>, vector<1x16xf32>
    %c0_34 = arith.constant 0 : index
    %c0_35 = arith.constant 0 : index
    %19 = vector.load %arg7[%c0_34, %c0_35] : memref<1x16xf32, #tpu.memory_space<vmem>>, vector<1x16xf32>
    %c0_36 = arith.constant 0 : index
    %c0_37 = arith.constant 0 : index
    %c0_38 = arith.constant 0 : index
    %c0_39 = arith.constant 0 : index
    %20 = vector.load %arg1[%c0_36, %c0_37, %c0_38, %c0_39] : memref<1x16x16x16xf32, #tpu.memory_space<vmem>>, vector<1x16x16x16xf32>
    %21 = vector.shape_cast %20 : vector<1x16x16x16xf32> to vector<16x16x16xf32>
    %c1 = arith.constant 1 : index
    %c8 = arith.constant 8 : index
    %c0_40 = arith.constant 0 : index
    %22 = vector.load %arg9[%c1, %c8, %c0_40] : memref<18x32x16xf32, #tpu.memory_space<vmem>>, vector<16x16x16xf32>
    tpu.vector_store %arg9[%c1, %c8, %c0_40], %21 {strides = array<i32>} : memref<18x32x16xf32, #tpu.memory_space<vmem>>, vector<16x16x16xf32>,
    %c0_41 = arith.constant 0 : index
    %c7 = arith.constant 7 : index
    %c0_42 = arith.constant 0 : index
    %23 = vector.load %arg9[%c0_41, %c7, %c0_42] : memref<18x32x16xf32, #tpu.memory_space<vmem>>, vector<18x16x16xf32>
    %c0_43 = arith.constant 0 : index
    %c8_44 = arith.constant 8 : index
    %c0_45 = arith.constant 0 : index
    %24 = vector.load %arg9[%c0_43, %c8_44, %c0_45] : memref<18x32x16xf32, #tpu.memory_space<vmem>>, vector<18x16x16xf32>
    %c0_46 = arith.constant 0 : index
    %c9 = arith.constant 9 : index
    %c0_47 = arith.constant 0 : index
    %25 = vector.load %arg9[%c0_46, %c9, %c0_47] : memref<18x32x16xf32, #tpu.memory_space<vmem>>, vector<18x16x16xf32>
    %cst_48 = arith.constant 0.000000e+00 : f32
    %26 = vector.broadcast %cst_48 : f32 to vector<256x16xf32>
    %c0_49 = arith.constant 0 : index
    %c0_50 = arith.constant 0 : index
    %c0_51 = arith.constant 0 : index
    %27 = vector.load %arg2[%c0_49, %c0_50, %c0_51] : memref<3x48x16xf32, #tpu.memory_space<vmem>>, vector<1x48x16xf32>
    %28 = vector.shape_cast %27 : vector<1x48x16xf32> to vector<48x16xf32>
    %29 = vector.extract_strided_slice %23 {offsets = [0, 0, 0], sizes = [16, 16, 16], strides = [1, 1, 1]} : vector<18x16x16xf32> to vector<16x16x16xf32>
    %30 = vector.shape_cast %29 : vector<16x16x16xf32> to vector<256x16xf32>
    %31 = vector.extract_strided_slice %28 {offsets = [0, 0], sizes = [16, 16], strides = [1, 1]} : vector<48x16xf32> to vector<16x16xf32>
    %cst_52 = arith.constant dense<0.000000e+00> : vector<256x16xf32>
    %32 = tpu.matmul %30, %31, %cst_52 {dimension_numbers = #tpu.dot_dimension_numbers<[1], [0], [0], [1], [0, 0, 1, 1], [], []>} : vector<256x16xf32>, vector<16x16xf32>, vector<256x16xf32> -> vector<256x16xf32>
    %33 = arith.addf %26, %32 : vector<256x16xf32>
    %34 = vector.extract_strided_slice %24 {offsets = [0, 0, 0], sizes = [16, 16, 16], strides = [1, 1, 1]} : vector<18x16x16xf32> to vector<16x16x16xf32>
    %35 = vector.shape_cast %34 : vector<16x16x16xf32> to vector<256x16xf32>
    %36 = vector.extract_strided_slice %28 {offsets = [16, 0], sizes = [16, 16], strides = [1, 1]} : vector<48x16xf32> to vector<16x16xf32>
    %cst_53 = arith.constant dense<0.000000e+00> : vector<256x16xf32>
    %37 = tpu.matmul %35, %36, %cst_53 {dimension_numbers = #tpu.dot_dimension_numbers<[1], [0], [0], [1], [0, 0, 1, 1], [], []>} : vector<256x16xf32>, vector<16x16xf32>, vector<256x16xf32> -> vector<256x16xf32>
    %38 = arith.addf %33, %37 : vector<256x16xf32>
    %39 = vector.extract_strided_slice %25 {offsets = [0, 0, 0], sizes = [16, 16, 16], strides = [1, 1, 1]} : vector<18x16x16xf32> to vector<16x16x16xf32>
    %40 = vector.shape_cast %39 : vector<16x16x16xf32> to vector<256x16xf32>
    %41 = vector.extract_strided_slice %28 {offsets = [32, 0], sizes = [16, 16], strides = [1, 1]} : vector<48x16xf32> to vector<16x16xf32>
    %cst_54 = arith.constant dense<0.000000e+00> : vector<256x16xf32>
    %42 = tpu.matmul %40, %41, %cst_54 {dimension_numbers = #tpu.dot_dimension_numbers<[1], [0], [0], [1], [0, 0, 1, 1], [], []>} : vector<256x16xf32>, vector<16x16xf32>, vector<256x16xf32> -> vector<256x16xf32>
    %43 = arith.addf %38, %42 : vector<256x16xf32>
    %c1_55 = arith.constant 1 : index
    %c0_56 = arith.constant 0 : index
    %c0_57 = arith.constant 0 : index
    %44 = vector.load %arg2[%c1_55, %c0_56, %c0_57] : memref<3x48x16xf32, #tpu.memory_space<vmem>>, vector<1x48x16xf32>
    %45 = vector.shape_cast %44 : vector<1x48x16xf32> to vector<48x16xf32>
    %46 = vector.extract_strided_slice %23 {offsets = [1, 0, 0], sizes = [16, 16, 16], strides = [1, 1, 1]} : vector<18x16x16xf32> to vector<16x16x16xf32>
    %47 = vector.shape_cast %46 : vector<16x16x16xf32> to vector<256x16xf32>
    %48 = vector.extract_strided_slice %45 {offsets = [0, 0], sizes = [16, 16], strides = [1, 1]} : vector<48x16xf32> to vector<16x16xf32>
    %cst_58 = arith.constant dense<0.000000e+00> : vector<256x16xf32>
    %49 = tpu.matmul %47, %48, %cst_58 {dimension_numbers = #tpu.dot_dimension_numbers<[1], [0], [0], [1], [0, 0, 1, 1], [], []>} : vector<256x16xf32>, vector<16x16xf32>, vector<256x16xf32> -> vector<256x16xf32>
    %50 = arith.addf %43, %49 : vector<256x16xf32>
    %51 = vector.extract_strided_slice %24 {offsets = [1, 0, 0], sizes = [16, 16, 16], strides = [1, 1, 1]} : vector<18x16x16xf32> to vector<16x16x16xf32>
    %52 = vector.shape_cast %51 : vector<16x16x16xf32> to vector<256x16xf32>
    %53 = vector.extract_strided_slice %45 {offsets = [16, 0], sizes = [16, 16], strides = [1, 1]} : vector<48x16xf32> to vector<16x16xf32>
    %cst_59 = arith.constant dense<0.000000e+00> : vector<256x16xf32>
    %54 = tpu.matmul %52, %53, %cst_59 {dimension_numbers = #tpu.dot_dimension_numbers<[1], [0], [0], [1], [0, 0, 1, 1], [], []>} : vector<256x16xf32>, vector<16x16xf32>, vector<256x16xf32> -> vector<256x16xf32>
    %55 = arith.addf %50, %54 : vector<256x16xf32>
    %56 = vector.extract_strided_slice %25 {offsets = [1, 0, 0], sizes = [16, 16, 16], strides = [1, 1, 1]} : vector<18x16x16xf32> to vector<16x16x16xf32>
    %57 = vector.shape_cast %56 : vector<16x16x16xf32> to vector<256x16xf32>
    %58 = vector.extract_strided_slice %45 {offsets = [32, 0], sizes = [16, 16], strides = [1, 1]} : vector<48x16xf32> to vector<16x16xf32>
    %cst_60 = arith.constant dense<0.000000e+00> : vector<256x16xf32>
    %59 = tpu.matmul %57, %58, %cst_60 {dimension_numbers = #tpu.dot_dimension_numbers<[1], [0], [0], [1], [0, 0, 1, 1], [], []>} : vector<256x16xf32>, vector<16x16xf32>, vector<256x16xf32> -> vector<256x16xf32>
    %60 = arith.addf %55, %59 : vector<256x16xf32>
    %c2 = arith.constant 2 : index
    %c0_61 = arith.constant 0 : index
    %c0_62 = arith.constant 0 : index
    %61 = vector.load %arg2[%c2, %c0_61, %c0_62] : memref<3x48x16xf32, #tpu.memory_space<vmem>>, vector<1x48x16xf32>
    %62 = vector.shape_cast %61 : vector<1x48x16xf32> to vector<48x16xf32>
    %63 = vector.extract_strided_slice %23 {offsets = [2, 0, 0], sizes = [16, 16, 16], strides = [1, 1, 1]} : vector<18x16x16xf32> to vector<16x16x16xf32>
    %64 = vector.shape_cast %63 : vector<16x16x16xf32> to vector<256x16xf32>
    %65 = vector.extract_strided_slice %62 {offsets = [0, 0], sizes = [16, 16], strides = [1, 1]} : vector<48x16xf32> to vector<16x16xf32>
    %cst_63 = arith.constant dense<0.000000e+00> : vector<256x16xf32>
    %66 = tpu.matmul %64, %65, %cst_63 {dimension_numbers = #tpu.dot_dimension_numbers<[1], [0], [0], [1], [0, 0, 1, 1], [], []>} : vector<256x16xf32>, vector<16x16xf32>, vector<256x16xf32> -> vector<256x16xf32>
    %67 = arith.addf %60, %66 : vector<256x16xf32>
    %68 = vector.extract_strided_slice %24 {offsets = [2, 0, 0], sizes = [16, 16, 16], strides = [1, 1, 1]} : vector<18x16x16xf32> to vector<16x16x16xf32>
    %69 = vector.shape_cast %68 : vector<16x16x16xf32> to vector<256x16xf32>
    %70 = vector.extract_strided_slice %62 {offsets = [16, 0], sizes = [16, 16], strides = [1, 1]} : vector<48x16xf32> to vector<16x16xf32>
    %cst_64 = arith.constant dense<0.000000e+00> : vector<256x16xf32>
    %71 = tpu.matmul %69, %70, %cst_64 {dimension_numbers = #tpu.dot_dimension_numbers<[1], [0], [0], [1], [0, 0, 1, 1], [], []>} : vector<256x16xf32>, vector<16x16xf32>, vector<256x16xf32> -> vector<256x16xf32>
    %72 = arith.addf %67, %71 : vector<256x16xf32>
    %73 = vector.extract_strided_slice %25 {offsets = [2, 0, 0], sizes = [16, 16, 16], strides = [1, 1, 1]} : vector<18x16x16xf32> to vector<16x16x16xf32>
    %74 = vector.shape_cast %73 : vector<16x16x16xf32> to vector<256x16xf32>
    %75 = vector.extract_strided_slice %62 {offsets = [32, 0], sizes = [16, 16], strides = [1, 1]} : vector<48x16xf32> to vector<16x16xf32>
    %cst_65 = arith.constant dense<0.000000e+00> : vector<256x16xf32>
    %76 = tpu.matmul %74, %75, %cst_65 {dimension_numbers = #tpu.dot_dimension_numbers<[1], [0], [0], [1], [0, 0, 1, 1], [], []>} : vector<256x16xf32>, vector<16x16xf32>, vector<256x16xf32> -> vector<256x16xf32>
    %77 = arith.addf %72, %76 : vector<256x16xf32>
    %78 = vector.broadcast %16 : vector<1x16xf32> to vector<256x16xf32>
    %79 = arith.mulf %77, %78 : vector<256x16xf32>
    %80 = vector.broadcast %17 : vector<1x16xf32> to vector<256x16xf32>
    %81 = arith.addf %79, %80 : vector<256x16xf32>
    %cst_66 = arith.constant 0.000000e+00 : f32
    %82 = vector.broadcast %cst_66 : f32 to vector<256x16xf32>
    %83 = arith.maximumf %81, %82 : vector<256x16xf32>
    %84 = vector.shape_cast %83 : vector<256x16xf32> to vector<16x16x16xf32>
    %c1_67 = arith.constant 1 : index
    %c8_68 = arith.constant 8 : index
    %c0_69 = arith.constant 0 : index
    %85 = vector.load %arg10[%c1_67, %c8_68, %c0_69] : memref<18x32x16xf32, #tpu.memory_space<vmem>>, vector<16x16x16xf32>
    tpu.vector_store %arg10[%c1_67, %c8_68, %c0_69], %84 {strides = array<i32>} : memref<18x32x16xf32, #tpu.memory_space<vmem>>, vector<16x16x16xf32>,
    %c0_70 = arith.constant 0 : index
    %c7_71 = arith.constant 7 : index
    %c0_72 = arith.constant 0 : index
    %86 = vector.load %arg10[%c0_70, %c7_71, %c0_72] : memref<18x32x16xf32, #tpu.memory_space<vmem>>, vector<18x16x16xf32>
    %c0_73 = arith.constant 0 : index
    %c8_74 = arith.constant 8 : index
    %c0_75 = arith.constant 0 : index
    %87 = vector.load %arg10[%c0_73, %c8_74, %c0_75] : memref<18x32x16xf32, #tpu.memory_space<vmem>>, vector<18x16x16xf32>
    %c0_76 = arith.constant 0 : index
    %c9_77 = arith.constant 9 : index
    %c0_78 = arith.constant 0 : index
    %88 = vector.load %arg10[%c0_76, %c9_77, %c0_78] : memref<18x32x16xf32, #tpu.memory_space<vmem>>, vector<18x16x16xf32>
    %cst_79 = arith.constant 0.000000e+00 : f32
    %89 = vector.broadcast %cst_79 : f32 to vector<256x16xf32>
    %c0_80 = arith.constant 0 : index
    %c0_81 = arith.constant 0 : index
    %c0_82 = arith.constant 0 : index
    %90 = vector.load %arg5[%c0_80, %c0_81, %c0_82] : memref<3x48x16xf32, #tpu.memory_space<vmem>>, vector<1x48x16xf32>
    %91 = vector.shape_cast %90 : vector<1x48x16xf32> to vector<48x16xf32>
    %92 = vector.extract_strided_slice %86 {offsets = [0, 0, 0], sizes = [16, 16, 16], strides = [1, 1, 1]} : vector<18x16x16xf32> to vector<16x16x16xf32>
    %93 = vector.shape_cast %92 : vector<16x16x16xf32> to vector<256x16xf32>
    %94 = vector.extract_strided_slice %91 {offsets = [0, 0], sizes = [16, 16], strides = [1, 1]} : vector<48x16xf32> to vector<16x16xf32>
    %cst_83 = arith.constant dense<0.000000e+00> : vector<256x16xf32>
    %95 = tpu.matmul %93, %94, %cst_83 {dimension_numbers = #tpu.dot_dimension_numbers<[1], [0], [0], [1], [0, 0, 1, 1], [], []>} : vector<256x16xf32>, vector<16x16xf32>, vector<256x16xf32> -> vector<256x16xf32>
    %96 = arith.addf %89, %95 : vector<256x16xf32>
    %97 = vector.extract_strided_slice %87 {offsets = [0, 0, 0], sizes = [16, 16, 16], strides = [1, 1, 1]} : vector<18x16x16xf32> to vector<16x16x16xf32>
    %98 = vector.shape_cast %97 : vector<16x16x16xf32> to vector<256x16xf32>
    %99 = vector.extract_strided_slice %91 {offsets = [16, 0], sizes = [16, 16], strides = [1, 1]} : vector<48x16xf32> to vector<16x16xf32>
    %cst_84 = arith.constant dense<0.000000e+00> : vector<256x16xf32>
    %100 = tpu.matmul %98, %99, %cst_84 {dimension_numbers = #tpu.dot_dimension_numbers<[1], [0], [0], [1], [0, 0, 1, 1], [], []>} : vector<256x16xf32>, vector<16x16xf32>, vector<256x16xf32> -> vector<256x16xf32>
    %101 = arith.addf %96, %100 : vector<256x16xf32>
    %102 = vector.extract_strided_slice %88 {offsets = [0, 0, 0], sizes = [16, 16, 16], strides = [1, 1, 1]} : vector<18x16x16xf32> to vector<16x16x16xf32>
    %103 = vector.shape_cast %102 : vector<16x16x16xf32> to vector<256x16xf32>
    %104 = vector.extract_strided_slice %91 {offsets = [32, 0], sizes = [16, 16], strides = [1, 1]} : vector<48x16xf32> to vector<16x16xf32>
    %cst_85 = arith.constant dense<0.000000e+00> : vector<256x16xf32>
    %105 = tpu.matmul %103, %104, %cst_85 {dimension_numbers = #tpu.dot_dimension_numbers<[1], [0], [0], [1], [0, 0, 1, 1], [], []>} : vector<256x16xf32>, vector<16x16xf32>, vector<256x16xf32> -> vector<256x16xf32>
    %106 = arith.addf %101, %105 : vector<256x16xf32>
    %c1_86 = arith.constant 1 : index
    %c0_87 = arith.constant 0 : index
    %c0_88 = arith.constant 0 : index
    %107 = vector.load %arg5[%c1_86, %c0_87, %c0_88] : memref<3x48x16xf32, #tpu.memory_space<vmem>>, vector<1x48x16xf32>
    %108 = vector.shape_cast %107 : vector<1x48x16xf32> to vector<48x16xf32>
    %109 = vector.extract_strided_slice %86 {offsets = [1, 0, 0], sizes = [16, 16, 16], strides = [1, 1, 1]} : vector<18x16x16xf32> to vector<16x16x16xf32>
    %110 = vector.shape_cast %109 : vector<16x16x16xf32> to vector<256x16xf32>
    %111 = vector.extract_strided_slice %108 {offsets = [0, 0], sizes = [16, 16], strides = [1, 1]} : vector<48x16xf32> to vector<16x16xf32>
    %cst_89 = arith.constant dense<0.000000e+00> : vector<256x16xf32>
    %112 = tpu.matmul %110, %111, %cst_89 {dimension_numbers = #tpu.dot_dimension_numbers<[1], [0], [0], [1], [0, 0, 1, 1], [], []>} : vector<256x16xf32>, vector<16x16xf32>, vector<256x16xf32> -> vector<256x16xf32>
    %113 = arith.addf %106, %112 : vector<256x16xf32>
    %114 = vector.extract_strided_slice %87 {offsets = [1, 0, 0], sizes = [16, 16, 16], strides = [1, 1, 1]} : vector<18x16x16xf32> to vector<16x16x16xf32>
    %115 = vector.shape_cast %114 : vector<16x16x16xf32> to vector<256x16xf32>
    %116 = vector.extract_strided_slice %108 {offsets = [16, 0], sizes = [16, 16], strides = [1, 1]} : vector<48x16xf32> to vector<16x16xf32>
    %cst_90 = arith.constant dense<0.000000e+00> : vector<256x16xf32>
    %117 = tpu.matmul %115, %116, %cst_90 {dimension_numbers = #tpu.dot_dimension_numbers<[1], [0], [0], [1], [0, 0, 1, 1], [], []>} : vector<256x16xf32>, vector<16x16xf32>, vector<256x16xf32> -> vector<256x16xf32>
    %118 = arith.addf %113, %117 : vector<256x16xf32>
    %119 = vector.extract_strided_slice %88 {offsets = [1, 0, 0], sizes = [16, 16, 16], strides = [1, 1, 1]} : vector<18x16x16xf32> to vector<16x16x16xf32>
    %120 = vector.shape_cast %119 : vector<16x16x16xf32> to vector<256x16xf32>
    %121 = vector.extract_strided_slice %108 {offsets = [32, 0], sizes = [16, 16], strides = [1, 1]} : vector<48x16xf32> to vector<16x16xf32>
    %cst_91 = arith.constant dense<0.000000e+00> : vector<256x16xf32>
    %122 = tpu.matmul %120, %121, %cst_91 {dimension_numbers = #tpu.dot_dimension_numbers<[1], [0], [0], [1], [0, 0, 1, 1], [], []>} : vector<256x16xf32>, vector<16x16xf32>, vector<256x16xf32> -> vector<256x16xf32>
    %123 = arith.addf %118, %122 : vector<256x16xf32>
    %c2_92 = arith.constant 2 : index
    %c0_93 = arith.constant 0 : index
    %c0_94 = arith.constant 0 : index
    %124 = vector.load %arg5[%c2_92, %c0_93, %c0_94] : memref<3x48x16xf32, #tpu.memory_space<vmem>>, vector<1x48x16xf32>
    %125 = vector.shape_cast %124 : vector<1x48x16xf32> to vector<48x16xf32>
    %126 = vector.extract_strided_slice %86 {offsets = [2, 0, 0], sizes = [16, 16, 16], strides = [1, 1, 1]} : vector<18x16x16xf32> to vector<16x16x16xf32>
    %127 = vector.shape_cast %126 : vector<16x16x16xf32> to vector<256x16xf32>
    %128 = vector.extract_strided_slice %125 {offsets = [0, 0], sizes = [16, 16], strides = [1, 1]} : vector<48x16xf32> to vector<16x16xf32>
    %cst_95 = arith.constant dense<0.000000e+00> : vector<256x16xf32>
    %129 = tpu.matmul %127, %128, %cst_95 {dimension_numbers = #tpu.dot_dimension_numbers<[1], [0], [0], [1], [0, 0, 1, 1], [], []>} : vector<256x16xf32>, vector<16x16xf32>, vector<256x16xf32> -> vector<256x16xf32>
    %130 = arith.addf %123, %129 : vector<256x16xf32>
    %131 = vector.extract_strided_slice %87 {offsets = [2, 0, 0], sizes = [16, 16, 16], strides = [1, 1, 1]} : vector<18x16x16xf32> to vector<16x16x16xf32>
    %132 = vector.shape_cast %131 : vector<16x16x16xf32> to vector<256x16xf32>
    %133 = vector.extract_strided_slice %125 {offsets = [16, 0], sizes = [16, 16], strides = [1, 1]} : vector<48x16xf32> to vector<16x16xf32>
    %cst_96 = arith.constant dense<0.000000e+00> : vector<256x16xf32>
    %134 = tpu.matmul %132, %133, %cst_96 {dimension_numbers = #tpu.dot_dimension_numbers<[1], [0], [0], [1], [0, 0, 1, 1], [], []>} : vector<256x16xf32>, vector<16x16xf32>, vector<256x16xf32> -> vector<256x16xf32>
    %135 = arith.addf %130, %134 : vector<256x16xf32>
    %136 = vector.extract_strided_slice %88 {offsets = [2, 0, 0], sizes = [16, 16, 16], strides = [1, 1, 1]} : vector<18x16x16xf32> to vector<16x16x16xf32>
    %137 = vector.shape_cast %136 : vector<16x16x16xf32> to vector<256x16xf32>
    %138 = vector.extract_strided_slice %125 {offsets = [32, 0], sizes = [16, 16], strides = [1, 1]} : vector<48x16xf32> to vector<16x16xf32>
    %cst_97 = arith.constant dense<0.000000e+00> : vector<256x16xf32>
    %139 = tpu.matmul %137, %138, %cst_97 {dimension_numbers = #tpu.dot_dimension_numbers<[1], [0], [0], [1], [0, 0, 1, 1], [], []>} : vector<256x16xf32>, vector<16x16xf32>, vector<256x16xf32> -> vector<256x16xf32>
    %140 = arith.addf %135, %139 : vector<256x16xf32>
    %141 = vector.shape_cast %21 : vector<16x16x16xf32> to vector<256x16xf32>
    %142 = vector.broadcast %18 : vector<1x16xf32> to vector<256x16xf32>
    %143 = arith.mulf %140, %142 : vector<256x16xf32>
    %144 = vector.broadcast %19 : vector<1x16xf32> to vector<256x16xf32>
    %145 = arith.addf %143, %144 : vector<256x16xf32>
    %146 = arith.addf %145, %141 : vector<256x16xf32>
    %cst_98 = arith.constant 0.000000e+00 : f32
    %147 = vector.broadcast %cst_98 : f32 to vector<256x16xf32>
    %148 = arith.maximumf %146, %147 : vector<256x16xf32>
    %149 = vector.shape_cast %148 : vector<256x16xf32> to vector<1x16x16x16xf32>
    %c0_99 = arith.constant 0 : index
    %c0_100 = arith.constant 0 : index
    %c0_101 = arith.constant 0 : index
    %c0_102 = arith.constant 0 : index
    %150 = vector.load %arg8[%c0_99, %c0_100, %c0_101, %c0_102] : memref<1x16x16x16xf32, #tpu.memory_space<vmem>>, vector<1x16x16x16xf32>
    tpu.vector_store %arg8[%c0_99, %c0_100, %c0_101, %c0_102], %149 {strides = array<i32>} : memref<1x16x16x16xf32, #tpu.memory_space<vmem>>, vector<1x16x16x16xf32>,
    return
  }
  func.func @transform_0(%arg0: i32) -> (i32, i32, i32, i32) {
    %c0_i32 = arith.constant 0 : i32
    %c0_i32_0 = arith.constant 0 : i32
    %c0_i32_1 = arith.constant 0 : i32
    %c0_i32_2 = arith.constant 0 : i32
    return %arg0, %c0_i32, %c0_i32_0, %c0_i32_1 : i32, i32, i32, i32
  }
  func.func @transform_1(%arg0: i32) -> (i32, i32, i32) {
    %c0_i32 = arith.constant 0 : i32
    %c0_i32_0 = arith.constant 0 : i32
    %c0_i32_1 = arith.constant 0 : i32
    %c0_i32_2 = arith.constant 0 : i32
    return %c0_i32, %c0_i32_0, %c0_i32_1 : i32, i32, i32
  }
  func.func @transform_2(%arg0: i32) -> (i32, i32) {
    %c0_i32 = arith.constant 0 : i32
    %c0_i32_0 = arith.constant 0 : i32
    %c0_i32_1 = arith.constant 0 : i32
    return %c0_i32, %c0_i32_0 : i32, i32
  }
  func.func @transform_3(%arg0: i32) -> (i32, i32) {
    %c0_i32 = arith.constant 0 : i32
    %c0_i32_0 = arith.constant 0 : i32
    %c0_i32_1 = arith.constant 0 : i32
    return %c0_i32, %c0_i32_0 : i32, i32
  }
  func.func @transform_4(%arg0: i32) -> (i32, i32, i32) {
    %c0_i32 = arith.constant 0 : i32
    %c0_i32_0 = arith.constant 0 : i32
    %c0_i32_1 = arith.constant 0 : i32
    %c0_i32_2 = arith.constant 0 : i32
    return %c0_i32, %c0_i32_0, %c0_i32_1 : i32, i32, i32
  }
  func.func @transform_5(%arg0: i32) -> (i32, i32) {
    %c0_i32 = arith.constant 0 : i32
    %c0_i32_0 = arith.constant 0 : i32
    %c0_i32_1 = arith.constant 0 : i32
    return %c0_i32, %c0_i32_0 : i32, i32
  }
  func.func @transform_6(%arg0: i32) -> (i32, i32) {
    %c0_i32 = arith.constant 0 : i32
    %c0_i32_0 = arith.constant 0 : i32
    %c0_i32_1 = arith.constant 0 : i32
    return %c0_i32, %c0_i32_0 : i32, i32
  }
  func.func @transform_7(%arg0: i32) -> (i32, i32, i32, i32) {
    %c0_i32 = arith.constant 0 : i32
    %c0_i32_0 = arith.constant 0 : i32
    %c0_i32_1 = arith.constant 0 : i32
    %c0_i32_2 = arith.constant 0 : i32
    return %arg0, %c0_i32, %c0_i32_0, %c0_i32_1 : i32, i32, i32, i32
  }
}

</mosaic_0001>

<bundles_post_ra>
// kernel: basic_block_pallas_nhwc.1
= control target key start
LH: loop header
LB: loop body
LE: loop exit
PB: predicated region body
PF: predicated region fallthrough
CT: control target
= control target key end

     0   :  { %s8155_s0 = inlined_call_operand.hbm [shape: f32[2,16,16,16], index: 0, kind: input, shape index: {}]   ;;  %s8156_s1 = inlined_call_operand.hbm [shape: f32[3,48,16], index: 1, kind: input, shape index: {}]   ;;  %s8157_s2 = inlined_call_operand.vmem [shape: f32[1,16], index: 2, kind: input, shape index: {}]   ;;  %s8158_s3 = inlined_call_operand.vmem [shape: f32[1,16], index: 3, kind: input, shape index: {}]   ;;  %s8159_s4 = inlined_call_operand.hbm [shape: f32[3,48,16], index: 4, kind: input, shape index: {}]   ;;  %s8160_s5 = inlined_call_operand.vmem [shape: f32[1,16], index: 5, kind: input, shape index: {}]   ;;  %s8161_s6 = inlined_call_operand.vmem [shape: f32[1,16], index: 6, kind: input, shape index: {}]   ;;  %s8162_s7 = inlined_call_operand.hbm [shape: f32[2,16,16,16], index: 7, kind: output, shape index: {}]  }
   0x1   :  { %8285 = sst [smem:[#allocation110_spill]] %s8156_s1 }
   0x2   :  { %12 = vsyncpa [#allocation5], 0 }
   0x3   :  { %14 = vsyncpa [#allocation5 + $0x1], 0 }
   0x4   :  { %15 = vsyncpa [#allocation8], 0 }
   0x5   :  { %16 = vsyncpa [#allocation6], 0 }
   0x6   :  { %18 = vsyncpa [#allocation6 + $0x1], 0  ;;  %s5270_s24 = smov 0   ;;  %s5272_s25 = smov 0  }
   0x7   :  { %s5274_s26 = smov 0   ;;  %s5276_s27 = smov 0  }
   0x8 LB: > { %s5291_s28 = sadd.s32 4294967295, %s5221_s27   ;;  %s4287_s29 = sadd.s32 4294967294, %s5221_s27   ;;  %s5221_s27 = sphi %s5276_s27, %s8630_s27   ;;  %s5217_s26 = sphi %s5274_s26, %s8629_s26   ;;  %s5213_s25 = sphi %s5272_s25, %s8628_s25   ;;  %s5209_s24 = sphi %s5270_s24, %s8627_s24  }
   0x9   : > { %p44_p0 = scmp.ne.s32.totalorder %s5213_s25, %s5209_s24  ;;  %p45_p1 = scmp.eq.s32.totalorder %s5291_s28, 0 }
   0xa   : > { %p194_p2 = scmp.eq.s32.totalorder %s5291_s28, 1  ;;  %p200_p3 = scmp.eq.s32.totalorder %s4287_s29, 1 }
   0xb   : > { %p5300_p4 = por %p45_p1, %p44_p0  ;;  %p4288_p5 = scmp.ge.s32.totalorder %s5221_s27, 1 }
   0xc   : > { %p5305_p6 = por %p200_p3, %p44_p0  ;;  %p207_p7 = scmp.lt.s32.totalorder %s5221_s27, 3 }
   0xd   : > { %s8288_s1 = sld [smem:[#allocation110_spill]]  ;;  %s5223_s13 = smov [#allocation7]  }
   0xe   : > { %p5313_p8 = pnand %p4288_p5, %p207_p7  ;;  %s220_s14 = sshll.u32 %s5223_s13, 4  ;;  %s221_s14 = int_to_ptr.vmem [resolvable:$true] %s220_s14 }
   0xf   : > { %s238_s17 = sshll.u32 %s8159_s4, 4  ;;  %s8163_s18 = smov 128   ;;  %s239_s17 = int_to_ptr.hbm [resolvable:$true] %s238_s17 }
  0x10   : > { %p4899_p9 = pneg %p5313_p8  ;;  %s8164_s19 = smov 8  }
  0x11   : > { %s5226_s20 = smov [#allocation9]   ;;  %s5332_s22 = sadd.s32 1, %s5221_s27  }
  0x12   : > { %p4900_p10 = pnand %p4899_p9, %p45_p1  ;;  %s240_s21 = sshll.u32 %s5226_s20, 4  ;;  %s241_s21 = int_to_ptr.vmem [resolvable:$true] %s240_s21 }
  0x13   : > { %s218_s11 = sshll.u32 %s8288_s1, 4  ;;  %s31_s23 = sadd.s32 1, %s5217_s26  ;;  %s219_s11 = int_to_ptr.hbm [resolvable:$true] %s218_s11 }
  0x14   : > { %4902 = dma.hbm_to_vmem [thread:$0]  (!%p4900_p10), %s219_s11, 2304, %s221_s14, [#allocation8], %s8163_s18, %s8163_s18, %s8164_s19  }
  0x15   : > { %4905 = dma.hbm_to_vmem [thread:$0]  (!%p4900_p10), %s239_s17, 2304, %s241_s21, [#allocation8], %s8163_s18, %s8163_s18, %s8164_s19  }
  0x16   : > { %s28_s29 = ssub.s32 %s5221_s27, %s5332_s22  ;;  %p38_p12 = scmp.ne.s32.totalorder %s5217_s26, %s5213_s25 }
  0x17   : > { %p29_p13 = scmp.eq.s32.totalorder %s28_s29, 0  ;;  %p39_p0 = scmp.eq.s32.totalorder %s5221_s27, 0 }
  0x18   : > { %p5342_p3 = por %p194_p2, %p38_p12  ;;  %p4916_p5 = scmp.lt.s32.totalorder %s5221_s27, 2 }
  0x19   : > { %s5348_s10 = scalar_select %p29_p13, %s5217_s26, %s31_s23  }
  0x1a   : > { %p40_p7 = por %p39_p0, %p38_p12  ;;  %s260_s11 = sand.u32 1, %s5217_s26  }
  0x1b   : > { %s4292_s13 = sshll.u32 %s260_s11, 8  ;;  %s4881_s14 = sshll.u32 %s5221_s27, 8 }
  0x1c   : > { %s269_s17 = scalar_lea.hbm %s8155_s0, %s4881_s14  ;;  %s264_s20 = scalar_lea.vmem [#allocation4], %s4292_s13 }
  0x1d   : > { %s272_s21 = sshll.u32 %s264_s20, 4  ;;  %s270_s29 = sshll.u32 %s269_s17, 4  ;;  %s273_s21 = int_to_ptr.vmem [resolvable:$true] %s272_s21  ;;  %s271_s29 = int_to_ptr.hbm [resolvable:$true] %s270_s29 }
  0x1e   : > { %p5355_p2 = pnand %p4916_p5, %p40_p7  ;;  %s261_s23 = scalar_lea.sflag [#allocation5], %s260_s11 }
  0x1f   : > { %s5121_s19 = sshra.s32 %s271_s29, 4  ;;  %s5128_s15 = scalar_lea.hbm %s8155_s0, 512  ;;  %s5122_s19 = int_to_ptr.hbm [resolvable:$true] %s5121_s19 }
  0x20   : > { %s5123_s1 = scalar_lea.hbm %s5122_s19, 256  ;;  %p5125_p10 = pneg %p5355_p2 }
  0x21   : > { %p5124_p9 = scmp.ne.s32.totalorder %s5122_s19, %s5123_s1  ;;  %p5129_p0 = scmp.lt.s32.totalorder %s5122_s19, %s8155_s0 }
  0x22   : > { %p5130_p5 = scmp.lt.s32.totalorder %s5128_s15, %s5123_s1 }
  0x23   : > { %p5126_p12 = pnand %p5125_p10, %p5124_p9 }
  0x24   : > { %p5131_p7 = por %p5130_p5, %p5129_p0 }
  0x25   : > { %p5127_p13 = pneg %p5126_p12 }
  0x27   : > { %p5132_p11 = pnand %p5131_p7, %p5127_p13 }
  0x29   : > { %5135 = shalt.err (!%p5132_p11)
}
  0x2a   : > { %s8292_s11 = smov 8   ;;  %s8293_s20 = smov 128  }
  0x2b   : > { %4909 = dma.hbm_to_vmem [thread:$0]  (!%p5355_p2), %s271_s29, 4096, %s273_s21, %s261_s23, %s8293_s20, %s8293_s20, %s8292_s11  }
  0x2c   : > { %284 = sbr.rel (%p5313_p8) target bundleno = 1576 (0x628), region = 48 }
  0x31   : > { %s5375_s14 = sand.u32 1, %s5213_s25  }
  0x32   : > { %s4296_s1 = sshll.u32 %s5375_s14, 8  ;;  %s287_s19 = scalar_lea.sflag [#allocation5], %s5375_s14 }
  0x33   : > { %s5381_s13 = scalar_lea.vmem [#allocation4], %s4296_s1 }
  0x34   : > { %5196 = dma.done.wait (%p5300_p4), %s287_s19, 4096  }
  0x35   : > { %5198 = vsyncadd (%p5300_p4), %s287_s19, 4294963200 }
  0x36   : > { %5200 = dma.done.wait (%p45_p1), [#allocation8], 4608  }
  0x37   : > { %5202 = vsyncadd (%p45_p1), [#allocation8], 4294962688  ;;  %vm332_vm0 = vcmask 130048   ;;  %v5227_v0 = vmov 0.0   ;;  %v603_v1 = vld [vmem:[#allocation7 + $0x18] sm:$0xff]  ;;  %v602_v2 = vld [vmem:[#allocation7 + $0x10] sm:$0xff] }
  0x38   : > { %334 = vst.msk [vmem:[#allocation2 + $0x8] sm:$0xff] %vm332_vm0, %v5227_v0  ;;  %716 = vmatpush.msra.mxu0 %v603_v1  ;;  %4883 = vmatpush.msra.mxu2 %v603_v1  ;;  %v601_v4 = vld [vmem:[#allocation7 + $0x8] sm:$0xff]  ;;  %v600_v5 = vld [vmem:[#allocation7] sm:$0xff]  ;;  %v1267_v7 = vld [vmem:[#allocation7 + $0x38] sm:$0xff]  ;;  %s5171_s11 = scalar_lea.hbm %s8162_s7, 512 }
  0x39   : > { %333 = vst.msk [vmem:[#allocation2] sm:$0xff] %vm332_vm0, %v5227_v0  ;;  %4885 = vmatpush.msra.mxu3 %v601_v4  ;;  %925 = vmatpush.msra.mxu1 %v601_v4  ;;  %v605_v6 = vld [vmem:[#allocation7 + $0x28] sm:$0xff]  ;;  %v5566_v10 = vld [vmem:[%s5381_s13 + $0x70] sm:$0xff]  ;;  %v5571_v11 = vld [vmem:[%s5381_s13 + $0x78] sm:$0xff] }
  0x3a   : > { %335 = vst.msk [vmem:[#allocation2 + $0x10] sm:$0xff] %vm332_vm0, %v5227_v0  ;;  %717 = vmatpush.msra.mxu0 %v602_v2  ;;  %4884 = vmatpush.msra.mxu2 %v602_v2  ;;  %v1269_v9 = vld [vmem:[#allocation7 + $0x48] sm:$0xff]  ;;  %v5576_v13 = vld [vmem:[%s5381_s13] sm:$0xff]  ;;  %v5597_v17 = vld [vmem:[%s5381_s13 + $0x10] sm:$0xff] }
  0x3b   : > { %336 = vst.msk [vmem:[#allocation2 + $0x18] sm:$0xff] %vm332_vm0, %v5227_v0  ;;  %4886 = vmatpush.msra.mxu3 %v600_v5  ;;  %926 = vmatpush.msra.mxu1 %v600_v5  ;;  %v5582_v14 = vld [vmem:[%s5381_s13 + $0x80] sm:$0xff]  ;;  %v5587_v15 = vld [vmem:[%s5381_s13 + $0x8] sm:$0xff]  ;;  %v5602_v18 = vld [vmem:[%s5381_s13 + $0x90] sm:$0xff] }
  0x3c   : > { %338 = vst.msk [vmem:[#allocation2 + $0x220] sm:$0xff] %vm332_vm0, %v5227_v0  ;;  %1134 = vmatpush.msrb.mxu2 %v605_v6  ;;  %1443 = vmatpush.msrb.mxu0 %v1269_v9  ;;  %v5592_v16 = vld [vmem:[%s5381_s13 + $0x88] sm:$0xff]  ;;  %v5607_v19 = vld [vmem:[%s5381_s13 + $0x18] sm:$0xff]  ;;  %v5634_v25 = vld [vmem:[%s5381_s13 + $0x20] sm:$0xff] }
  0x3d   : > { %339 = vst.msk [vmem:[#allocation2 + $0x228] sm:$0xff] %vm332_vm0, %v5227_v0  ;;  %1292 = vmatpush.msrb.mxu3 %v1267_v7  ;;  %v5618_v23 = vld [vmem:[%s5381_s13 + $0x98] sm:$0xff]  ;;  %v5647_v30 = vld [vmem:[%s5381_s13 + $0xa0] sm:$0xff]  ;;  %v5660_v31 = vld [vmem:[%s5381_s13 + $0x28] sm:$0xff] }
  0x3e   : > { %340 = vst.msk [vmem:[#allocation2 + $0x230] sm:$0xff] %vm332_vm0, %v5227_v0  ;;  %v5673_v36 = vld [vmem:[%s5381_s13 + $0xa8] sm:$0xff]  ;;  %v5686_v37 = vld [vmem:[%s5381_s13 + $0x30] sm:$0xff]  ;;  %v5712_v43 = vld [vmem:[%s5381_s13 + $0x38] sm:$0xff] }
  0x3f   : > { %v528_v3 = vld [vmem:[#allocation2 + $0x8] sm:$0xff]  ;;  %341 = vst.msk [vmem:[#allocation2 + $0x238] sm:$0xff] %vm332_vm0, %v5227_v0  ;;  %v5699_v42 = vld [vmem:[%s5381_s13 + $0xb0] sm:$0xff]  ;;  %v5725_v48 = vld [vmem:[%s5381_s13 + $0xb8] sm:$0xff] }
  0x40   : > { %343 = vst.msk [vmem:[#allocation2 + $0x20] sm:$0xff] %vm332_vm0, %v5227_v0  ;;  %4300 = vmatmul.msk.f32.vlgmr.msra.gmra.mxu0 %vm332_vm0, %v528_v3  ;;  %v604_v49 = vld [vmem:[#allocation7 + $0x20] sm:$0xff]  ;;  %v1266_v50 = vld [vmem:[#allocation7 + $0x30] sm:$0xff]  ;;  %v5764_v58 = vld [vmem:[%s5381_s13 + $0x48] sm:$0xff] }
  0x41   : > { %344 = vst.msk [vmem:[#allocation2 + $0x40] sm:$0xff] %vm332_vm0, %v5227_v0  ;;  %v529_v8 = vld [vmem:[#allocation2 + $0x10] sm:$0xff]  ;;  %1135 = vmatpush.msrb.mxu2 %v604_v49  ;;  %1293 = vmatpush.msrb.mxu3 %v1266_v50  ;;  %v5738_v51 = vld [vmem:[%s5381_s13 + $0x40] sm:$0xff]  ;;  %v5777_v63 = vld [vmem:[%s5381_s13 + $0xc8] sm:$0xff] }
  0x42   : > { %345 = vst.msk [vmem:[#allocation2 + $0x60] sm:$0xff] %vm332_vm0, %v5227_v0  ;;  %v493_v20 = vld [vmem:[#allocation2 + $0xf] sm:$0xff]  ;;  %v5751_v56 = vld [vmem:[%s5381_s13 + $0xc0] sm:$0xff]  ;;  %v5816_v6 = vld [vmem:[%s5381_s13 + $0x58] sm:$0xff] }
  0x43   : > { %346 = vst.msk [vmem:[#allocation2 + $0x80] sm:$0xff] %vm332_vm0, %v5227_v0  ;;  %v1268_v57 = vld [vmem:[#allocation7 + $0x40] sm:$0xff]  ;;  %v5803_v5 = vld [vmem:[%s5381_s13 + $0xd0] sm:$0xff] }
  0x44   : > { %347 = vst.msk [vmem:[#allocation2 + $0xa0] sm:$0xff] %vm332_vm0, %v5227_v0  ;;  %1444 = vmatpush.msrb.mxu0 %v1268_v57  ;;  %v5842_v49 = vld [vmem:[%s5381_s13 + $0x60] sm:$0xff] }
  0x45   : > { %348 = vst.msk [vmem:[#allocation2 + $0xc0] sm:$0xff] %vm332_vm0, %v5227_v0 }
  0x46   : > { %349 = vst.msk [vmem:[#allocation2 + $0xe0] sm:$0xff] %vm332_vm0, %v5227_v0 }
  0x47   : > { %350 = vst.msk [vmem:[#allocation2 + $0x100] sm:$0xff] %vm332_vm0, %v5227_v0 }
  0x48   : > { %351 = vst.msk [vmem:[#allocation2 + $0x120] sm:$0xff] %vm332_vm0, %v5227_v0  ;;  %4301 = vmatmul.msk.f32.gmra.mxu0 %vm332_vm0, %v529_v8 }
  0x49   : > { %352 = vst.msk [vmem:[#allocation2 + $0x140] sm:$0xff] %vm332_vm0, %v5227_v0 }
  0x4a   : > { %353 = vst.msk [vmem:[#allocation2 + $0x160] sm:$0xff] %vm332_vm0, %v5227_v0 }
  0x4b   : > { %354 = vst.msk [vmem:[#allocation2 + $0x180] sm:$0xff] %vm332_vm0, %v5227_v0 }
  0x4c   : > { %355 = vst.msk [vmem:[#allocation2 + $0x1a0] sm:$0xff] %vm332_vm0, %v5227_v0 }
  0x4d   : > { %356 = vst.msk [vmem:[#allocation2 + $0x1c0] sm:$0xff] %vm332_vm0, %v5227_v0 }
  0x4e   : > { %357 = vst.msk [vmem:[#allocation2 + $0x1e0] sm:$0xff] %vm332_vm0, %v5227_v0 }
  0x4f   : > { %358 = vst.msk [vmem:[#allocation2 + $0x200] sm:$0xff] %vm332_vm0, %v5227_v0 }
  0x50   : > { %361 = vst.msk [vmem:[#allocation2 + $0x38] sm:$0xff] %vm332_vm0, %v5227_v0 }
  0x51   : > { %362 = vst.msk [vmem:[#allocation2 + $0x58] sm:$0xff] %vm332_vm0, %v5227_v0 }
  0x52   : > { %363 = vst.msk [vmem:[#allocation2 + $0x78] sm:$0xff] %vm332_vm0, %v5227_v0 }
  0x53   : > { %364 = vst.msk [vmem:[#allocation2 + $0x98] sm:$0xff] %vm332_vm0, %v5227_v0 }
  0x54   : > { %365 = vst.msk [vmem:[#allocation2 + $0xb8] sm:$0xff] %vm332_vm0, %v5227_v0 }
  0x55   : > { %366 = vst.msk [vmem:[#allocation2 + $0xd8] sm:$0xff] %vm332_vm0, %v5227_v0 }
  0x56   : > { %367 = vst.msk [vmem:[#allocation2 + $0xf8] sm:$0xff] %vm332_vm0, %v5227_v0 }
  0x57   : > { %368 = vst.msk [vmem:[#allocation2 + $0x118] sm:$0xff] %vm332_vm0, %v5227_v0 }
  0x58   : > { %369 = vst.msk [vmem:[#allocation2 + $0x138] sm:$0xff] %vm332_vm0, %v5227_v0 }
  0x59   : > { %370 = vst.msk [vmem:[#allocation2 + $0x158] sm:$0xff] %vm332_vm0, %v5227_v0 }
  0x5a   : > { %371 = vst.msk [vmem:[#allocation2 + $0x178] sm:$0xff] %vm332_vm0, %v5227_v0 }
  0x5b   : > { %372 = vst.msk [vmem:[#allocation2 + $0x198] sm:$0xff] %vm332_vm0, %v5227_v0 }
  0x5c   : > { %373 = vst.msk [vmem:[#allocation2 + $0x1b8] sm:$0xff] %vm332_vm0, %v5227_v0 }
  0x5d   : > { %374 = vst.msk [vmem:[#allocation2 + $0x1d8] sm:$0xff] %vm332_vm0, %v5227_v0 }
  0x5e   : > { %375 = vst.msk [vmem:[#allocation2 + $0x1f8] sm:$0xff] %vm332_vm0, %v5227_v0 }
  0x5f   : > { %376 = vst.msk [vmem:[#allocation2 + $0x218] sm:$0xff] %vm332_vm0, %v5227_v0 }
  0x60   : > { %378 = vst.msk [vmem:[#allocation3] sm:$0xff] %vm332_vm0, %v5227_v0 }
  0x61   : > { %379 = vst.msk [vmem:[#allocation3 + $0x8] sm:$0xff] %vm332_vm0, %v5227_v0 }
  0x62   : > { %380 = vst.msk [vmem:[#allocation3 + $0x10] sm:$0xff] %vm332_vm0, %v5227_v0 }
  0x63   : > { %381 = vst.msk [vmem:[#allocation3 + $0x18] sm:$0xff] %vm332_vm0, %v5227_v0 }
  0x64   : > { %383 = vst.msk [vmem:[#allocation3 + $0x220] sm:$0xff] %vm332_vm0, %v5227_v0 }
  0x65   : > { %384 = vst.msk [vmem:[#allocation3 + $0x228] sm:$0xff] %vm332_vm0, %v5227_v0 }
  0x66   : > { %385 = vst.msk [vmem:[#allocation3 + $0x230] sm:$0xff] %vm332_vm0, %v5227_v0 }
  0x67   : > { %386 = vst.msk [vmem:[#allocation3 + $0x238] sm:$0xff] %vm332_vm0, %v5227_v0 }
  0x68   : > { %388 = vst.msk [vmem:[#allocation3 + $0x20] sm:$0xff] %vm332_vm0, %v5227_v0 }
  0x69   : > { %389 = vst.msk [vmem:[#allocation3 + $0x40] sm:$0xff] %vm332_vm0, %v5227_v0 }
  0x6a   : > { %390 = vst.msk [vmem:[#allocation3 + $0x60] sm:$0xff] %vm332_vm0, %v5227_v0 }
  0x6b   : > { %391 = vst.msk [vmem:[#allocation3 + $0x80] sm:$0xff] %vm332_vm0, %v5227_v0 }
  0x6c   : > { %392 = vst.msk [vmem:[#allocation3 + $0xa0] sm:$0xff] %vm332_vm0, %v5227_v0 }
  0x6d   : > { %393 = vst.msk [vmem:[#allocation3 + $0xc0] sm:$0xff] %vm332_vm0, %v5227_v0 }
  0x6e   : > { %394 = vst.msk [vmem:[#allocation3 + $0xe0] sm:$0xff] %vm332_vm0, %v5227_v0 }
  0x6f   : > { %395 = vst.msk [vmem:[#allocation3 + $0x100] sm:$0xff] %vm332_vm0, %v5227_v0 }
  0x70   : > { %396 = vst.msk [vmem:[#allocation3 + $0x120] sm:$0xff] %vm332_vm0, %v5227_v0 }
  0x71   : > { %397 = vst.msk [vmem:[#allocation3 + $0x140] sm:$0xff] %vm332_vm0, %v5227_v0 }
  0x72   : > { %398 = vst.msk [vmem:[#allocation3 + $0x160] sm:$0xff] %vm332_vm0, %v5227_v0 }
  0x73   : > { %399 = vst.msk [vmem:[#allocation3 + $0x180] sm:$0xff] %vm332_vm0, %v5227_v0 }
  0x74   : > { %400 = vst.msk [vmem:[#allocation3 + $0x1a0] sm:$0xff] %vm332_vm0, %v5227_v0 }
  0x75   : > { %401 = vst.msk [vmem:[#allocation3 + $0x1c0] sm:$0xff] %vm332_vm0, %v5227_v0 }
  0x76   : > { %402 = vst.msk [vmem:[#allocation3 + $0x1e0] sm:$0xff] %vm332_vm0, %v5227_v0 }
  0x77   : > { %403 = vst.msk [vmem:[#allocation3 + $0x200] sm:$0xff] %vm332_vm0, %v5227_v0 }
  0x78   : > { %406 = vst.msk [vmem:[#allocation3 + $0x38] sm:$0xff] %vm332_vm0, %v5227_v0 }
  0x79   : > { %407 = vst.msk [vmem:[#allocation3 + $0x58] sm:$0xff] %vm332_vm0, %v5227_v0 }
  0x7a   : > { %408 = vst.msk [vmem:[#allocation3 + $0x78] sm:$0xff] %vm332_vm0, %v5227_v0 }
  0x7b   : > { %409 = vst.msk [vmem:[#allocation3 + $0x98] sm:$0xff] %vm332_vm0, %v5227_v0 }
  0x7c   : > { %410 = vst.msk [vmem:[#allocation3 + $0xb8] sm:$0xff] %vm332_vm0, %v5227_v0 }
  0x7d   : > { %411 = vst.msk [vmem:[#allocation3 + $0xd8] sm:$0xff] %vm332_vm0, %v5227_v0 }
  0x7e   : > { %412 = vst.msk [vmem:[#allocation3 + $0xf8] sm:$0xff] %vm332_vm0, %v5227_v0 }
  0x7f   : > { %413 = vst.msk [vmem:[#allocation3 + $0x118] sm:$0xff] %vm332_vm0, %v5227_v0 }
  0x80   : > { %414 = vst.msk [vmem:[#allocation3 + $0x138] sm:$0xff] %vm332_vm0, %v5227_v0 }
  0x81   : > { %415 = vst.msk [vmem:[#allocation3 + $0x158] sm:$0xff] %vm332_vm0, %v5227_v0 }
  0x82   : > { %416 = vst.msk [vmem:[#allocation3 + $0x178] sm:$0xff] %vm332_vm0, %v5227_v0 }
  0x83   : > { %417 = vst.msk [vmem:[#allocation3 + $0x198] sm:$0xff] %vm332_vm0, %v5227_v0 }
  0x84   : > { %418 = vst.msk [vmem:[#allocation3 + $0x1b8] sm:$0xff] %vm332_vm0, %v5227_v0 }
  0x85   : > { %419 = vst.msk [vmem:[#allocation3 + $0x1d8] sm:$0xff] %vm332_vm0, %v5227_v0 }
  0x86   : > { %420 = vst.msk [vmem:[#allocation3 + $0x1f8] sm:$0xff] %vm332_vm0, %v5227_v0 }
  0x87   : > { %421 = vst.msk [vmem:[#allocation3 + $0x218] sm:$0xff] %vm332_vm0, %v5227_v0 }
  0x88   : > { %342 = vst.msk [vmem:[#allocation2] sm:$0xff] %vm332_vm0, %v5227_v0 }
  0x89   : > { %359 = vst.msk [vmem:[#allocation2 + $0x220] sm:$0xff] %vm332_vm0, %v5227_v0 }
  0x8a   : > { %360 = vst.msk [vmem:[#allocation2 + $0x18] sm:$0xff] %vm332_vm0, %v5227_v0 }
  0x8b   : > { %377 = vst.msk [vmem:[#allocation2 + $0x238] sm:$0xff] %vm332_vm0, %v5227_v0 }
  0x8c   : > { %387 = vst.msk [vmem:[#allocation3] sm:$0xff] %vm332_vm0, %v5227_v0 }
  0x8d   : > { %404 = vst.msk [vmem:[#allocation3 + $0x220] sm:$0xff] %vm332_vm0, %v5227_v0 }
  0x8e   : > { %8294 = vst [vmem:[#allocation14_spill] sm:$0xff] %v5566_v10 }
  0x8f   : > { %405 = vst.msk [vmem:[#allocation3 + $0x18] sm:$0xff] %vm332_vm0, %v5227_v0  ;;  %v492_v12 = vld [vmem:[#allocation2 + $0x7] sm:$0xff] }
  0x90   : > { %8295 = vst [vmem:[#allocation15_spill] sm:$0xff] %v5571_v11  ;;  %4332 = vmatmul.msk.f32.vlgmr.msra.gmra.mxu1 %vm332_vm0, %v492_v12 }
  0x91   : > { %422 = vst.msk [vmem:[#allocation3 + $0x238] sm:$0xff] %vm332_vm0, %v5227_v0  ;;  %v5790_v0 = vld [vmem:[%s5381_s13 + $0x50] sm:$0xff] }
  0x92   : > { %8296 = vst [vmem:[#allocation16_spill] sm:$0xff] %v5576_v13 }
  0x93   : > { %474 = vst.msk [vmem:[#allocation2 + $0x108] sm:$0xff] %vm332_vm0, %v5566_v10 }
  0x94   : > { %8297 = vst [vmem:[#allocation17_spill] sm:$0xff] %v5582_v14 }
  0x95   : > { %475 = vst.msk [vmem:[#allocation2 + $0x110] sm:$0xff] %vm332_vm0, %v5571_v11 }
  0x96   : > { %8298 = vst [vmem:[#allocation18_spill] sm:$0xff] %v5587_v15 }
  0x97   : > { %460 = vst.msk [vmem:[#allocation2 + $0x28] sm:$0xff] %vm332_vm0, %v5576_v13 }
  0x98   : > { %8299 = vst [vmem:[#allocation19_spill] sm:$0xff] %v5592_v16  ;;  %4333 = vmatmul.msk.f32.gmra.mxu1 %vm332_vm0, %v493_v20  ;;  %v5829_v20 = vld [vmem:[%s5381_s13 + $0xd8] sm:$0xff] }
  0x99   : > { %476 = vst.msk [vmem:[#allocation2 + $0x128] sm:$0xff] %vm332_vm0, %v5582_v14 }
  0x9a   : > { %8300 = vst [vmem:[#allocation20_spill] sm:$0xff] %v5597_v17  ;;  %v5611_v21 = vld [vmem:[#allocation2 + $0x108] sm:$0xff] }
  0x9b   : > { %461 = vst.msk [vmem:[#allocation2 + $0x30] sm:$0xff] %vm332_vm0, %v5587_v15  ;;  %v5613_v22 = vld [vmem:[#allocation2 + $0x107] sm:$0xff]  ;;  %4316 = vmatmul.msk.f32.vlgmr.msra.gmra.mxu2 %vm332_vm0, %v5611_v21 }
  0x9c   : > { %8301 = vst [vmem:[#allocation21_spill] sm:$0xff] %v5602_v18  ;;  %4348 = vmatmul.msk.f32.vlgmr.msra.gmra.mxu3 %vm332_vm0, %v5613_v22  ;;  %v5638_v26 = vld [vmem:[#allocation2 + $0x110] sm:$0xff] }
  0x9d   : > { %477 = vst.msk [vmem:[#allocation2 + $0x130] sm:$0xff] %vm332_vm0, %v5592_v16  ;;  %v5640_v27 = vld [vmem:[#allocation2 + $0x10f] sm:$0xff] }
  0x9e   : > { %8302 = vst [vmem:[#allocation22_spill] sm:$0xff] %v5607_v19  ;;  %v5626_v24 = vld [vmem:[#allocation2 + $0x28] sm:$0xff] }
  0x9f   : > { %462 = vst.msk [vmem:[#allocation2 + $0x48] sm:$0xff] %vm332_vm0, %v5597_v17  ;;  %4302 = vmatmul.msk.f32.gmra.mxu0 %vm332_vm0, %v5626_v24  ;;  %v5642_v28 = vld [vmem:[#allocation2 + $0x27] sm:$0xff] }
  0xa0   : > { %478 = vst.msk [vmem:[#allocation2 + $0x148] sm:$0xff] %vm332_vm0, %v5602_v18  ;;  %4334 = vmatmul.msk.f32.gmra.mxu1 %vm332_vm0, %v5642_v28  ;;  %v5664_v32 = vld [vmem:[#allocation2 + $0x128] sm:$0xff] }
  0xa1   : > { %8303 = vst [vmem:[#allocation23_spill] sm:$0xff] %v5618_v23  ;;  %v5666_v33 = vld [vmem:[#allocation2 + $0x127] sm:$0xff] }
  0xa2   : > { %463 = vst.msk [vmem:[#allocation2 + $0x50] sm:$0xff] %vm332_vm0, %v5607_v19  ;;  %v5644_v29 = vld [vmem:[#allocation2 + $0x30] sm:$0xff] }
  0xa3   : > { %479 = vst.msk [vmem:[#allocation2 + $0x150] sm:$0xff] %vm332_vm0, %v5618_v23  ;;  %4317 = vmatmul.msk.f32.gmra.mxu2 %vm332_vm0, %v5638_v26  ;;  %v5668_v34 = vld [vmem:[#allocation2 + $0x2f] sm:$0xff] }
  0xa4   : > { %8304 = vst [vmem:[#allocation24_spill] sm:$0xff] %v5634_v25  ;;  %4349 = vmatmul.msk.f32.gmra.mxu3 %vm332_vm0, %v5640_v27  ;;  %v5690_v38 = vld [vmem:[#allocation2 + $0x130] sm:$0xff] }
  0xa5   : > { %464 = vst.msk [vmem:[#allocation2 + $0x68] sm:$0xff] %vm332_vm0, %v5634_v25  ;;  %v5692_v39 = vld [vmem:[#allocation2 + $0x12f] sm:$0xff] }
  0xa6   : > { %8305 = vst [vmem:[#allocation25_spill] sm:$0xff] %v5647_v30  ;;  %v5670_v35 = vld [vmem:[#allocation2 + $0x48] sm:$0xff] }
  0xa7   : > { %480 = vst.msk [vmem:[#allocation2 + $0x168] sm:$0xff] %vm332_vm0, %v5647_v30  ;;  %4303 = vmatmul.msk.f32.gmra.mxu0 %vm332_vm0, %v5644_v29  ;;  %v5694_v40 = vld [vmem:[#allocation2 + $0x47] sm:$0xff] }
  0xa8   : > { %8306 = vst [vmem:[#allocation26_spill] sm:$0xff] %v5660_v31  ;;  %4335 = vmatmul.msk.f32.gmra.mxu1 %vm332_vm0, %v5668_v34  ;;  %v5716_v44 = vld [vmem:[#allocation2 + $0x148] sm:$0xff] }
  0xa9   : > { %465 = vst.msk [vmem:[#allocation2 + $0x70] sm:$0xff] %vm332_vm0, %v5660_v31  ;;  %v5696_v41 = vld [vmem:[#allocation2 + $0x50] sm:$0xff]  ;;  %v5718_v45 = vld [vmem:[#allocation2 + $0x147] sm:$0xff] }
  0xaa   : > { %8307 = vst [vmem:[#allocation27_spill] sm:$0xff] %v5673_v36  ;;  %v5720_v46 = vld [vmem:[#allocation2 + $0x4f] sm:$0xff] }
  0xab   : > { %4318 = vmatmul.msk.f32.gmra.mxu2 %vm332_vm0, %v5664_v32  ;;  %481 = vst.msk [vmem:[#allocation2 + $0x170] sm:$0xff] %vm332_vm0, %v5673_v36  ;;  %v5742_v52 = vld [vmem:[#allocation2 + $0x150] sm:$0xff] }
  0xac   : > { %4350 = vmatmul.msk.f32.gmra.mxu3 %vm332_vm0, %v5666_v33  ;;  %8308 = vst [vmem:[#allocation28_spill] sm:$0xff] %v5686_v37  ;;  %v5722_v47 = vld [vmem:[#allocation2 + $0x68] sm:$0xff] }
  0xad   : > { %466 = vst.msk [vmem:[#allocation2 + $0x88] sm:$0xff] %vm332_vm0, %v5686_v37  ;;  %v5744_v53 = vld [vmem:[#allocation2 + $0x14f] sm:$0xff]  ;;  %v5746_v54 = vld [vmem:[#allocation2 + $0x67] sm:$0xff]  ;;  %v1271_v37 = vld [vmem:[#allocation7 + $0x58] sm:$0xff] }
  0xae   : > { %8309 = vst [vmem:[#allocation29_spill] sm:$0xff] %v5699_v42  ;;  %v5768_v59 = vld [vmem:[#allocation2 + $0x168] sm:$0xff]  ;;  %1594 = vmatpush.msrb.mxu1 %v1271_v37 }
  0xaf   : > { %4304 = vmatmul.msk.f32.gmra.mxu0 %vm332_vm0, %v5670_v35  ;;  %482 = vst.msk [vmem:[#allocation2 + $0x188] sm:$0xff] %vm332_vm0, %v5699_v42  ;;  %v5770_v60 = vld [vmem:[#allocation2 + $0x167] sm:$0xff] }
  0xb0   : > { %4336 = vmatmul.msk.f32.gmra.mxu1 %vm332_vm0, %v5694_v40  ;;  %8310 = vst [vmem:[#allocation30_spill] sm:$0xff] %v5712_v43  ;;  %v5748_v55 = vld [vmem:[#allocation2 + $0x70] sm:$0xff] }
  0xb1   : > { %467 = vst.msk [vmem:[#allocation2 + $0x90] sm:$0xff] %vm332_vm0, %v5712_v43  ;;  %v5772_v61 = vld [vmem:[#allocation2 + $0x6f] sm:$0xff] }
  0xb2   : > { %8311 = vst [vmem:[#allocation31_spill] sm:$0xff] %v5725_v48  ;;  %v5794_v1 = vld [vmem:[#allocation2 + $0x170] sm:$0xff] }
  0xb3   : > { %4319 = vmatmul.msk.f32.gmra.mxu2 %vm332_vm0, %v5690_v38  ;;  %483 = vst.msk [vmem:[#allocation2 + $0x190] sm:$0xff] %vm332_vm0, %v5725_v48  ;;  %v5796_v2 = vld [vmem:[#allocation2 + $0x16f] sm:$0xff] }
  0xb4   : > { %4351 = vmatmul.msk.f32.gmra.mxu3 %vm332_vm0, %v5692_v39  ;;  %8312 = vst [vmem:[#allocation32_spill] sm:$0xff] %v5738_v51  ;;  %v5774_v62 = vld [vmem:[#allocation2 + $0x88] sm:$0xff] }
  0xb5   : > { %468 = vst.msk [vmem:[#allocation2 + $0xa8] sm:$0xff] %vm332_vm0, %v5738_v51  ;;  %v5798_v3 = vld [vmem:[#allocation2 + $0x87] sm:$0xff] }
  0xb6   : > { %8313 = vst [vmem:[#allocation33_spill] sm:$0xff] %v5751_v56  ;;  %v5820_v7 = vld [vmem:[#allocation2 + $0x188] sm:$0xff] }
  0xb7   : > { %4305 = vmatmul.msk.f32.gmra.mxu0 %vm332_vm0, %v5696_v41  ;;  %484 = vst.msk [vmem:[#allocation2 + $0x1a8] sm:$0xff] %vm332_vm0, %v5751_v56  ;;  %v5822_v8 = vld [vmem:[#allocation2 + $0x187] sm:$0xff] }
  0xb8   : > { %4337 = vmatmul.msk.f32.gmra.mxu1 %vm332_vm0, %v5720_v46  ;;  %8314 = vst [vmem:[#allocation34_spill] sm:$0xff] %v5764_v58  ;;  %v5800_v4 = vld [vmem:[#allocation2 + $0x90] sm:$0xff]  ;;  %v5868_v56 = vld [vmem:[%s5381_s13 + $0x68] sm:$0xff] }
  0xb9   : > { %469 = vst.msk [vmem:[#allocation2 + $0xb0] sm:$0xff] %vm332_vm0, %v5764_v58  ;;  %v5824_v9 = vld [vmem:[#allocation2 + $0x8f] sm:$0xff] }
  0xba   : > { %8315 = vst [vmem:[#allocation35_spill] sm:$0xff] %v5777_v63  ;;  %v5846_v50 = vld [vmem:[#allocation2 + $0x190] sm:$0xff] }
  0xbb   : > { %4320 = vmatmul.msk.f32.gmra.mxu2 %vm332_vm0, %v5716_v44  ;;  %485 = vst.msk [vmem:[#allocation2 + $0x1b0] sm:$0xff] %vm332_vm0, %v5777_v63  ;;  %v5848_v57 = vld [vmem:[#allocation2 + $0x18f] sm:$0xff] }
  0xbc   : > { %4352 = vmatmul.msk.f32.gmra.mxu3 %vm332_vm0, %v5718_v45  ;;  %8316 = vst [vmem:[#allocation36_spill] sm:$0xff] %v5790_v0  ;;  %v5826_v12 = vld [vmem:[#allocation2 + $0xa8] sm:$0xff] }
  0xbd   : > { %470 = vst.msk [vmem:[#allocation2 + $0xc8] sm:$0xff] %vm332_vm0, %v5790_v0  ;;  %v5941_v31 = vpop.f32.mrf.mxu0  ;;  %v566_v13 = vld [vmem:[#allocation2 + $0x29] sm:$0xff] }
  0xbe   : > { %8317 = vst [vmem:[#allocation37_spill] sm:$0xff] %v5803_v5  ;;  %v5872_v48 = vld [vmem:[#allocation2 + $0x1a8] sm:$0xff] }
  0xbf   : > { %4306 = vmatmul.msk.f32.gmra.mxu0 %vm332_vm0, %v5722_v47  ;;  %486 = vst.msk [vmem:[#allocation2 + $0x1c8] sm:$0xff] %vm332_vm0, %v5803_v5  ;;  %v5850_v5 = vld [vmem:[#allocation2 + $0xa7] sm:$0xff] }
  0xc0   : > { %4338 = vmatmul.msk.f32.gmra.mxu1 %vm332_vm0, %v5746_v54  ;;  %8318 = vst [vmem:[#allocation38_spill] sm:$0xff] %v5816_v6  ;;  %v5852_v63 = vld [vmem:[#allocation2 + $0xb0] sm:$0xff]  ;;  %v5874_v42 = vld [vmem:[#allocation2 + $0x1a7] sm:$0xff] }
  0xc1   : > { %471 = vst.msk [vmem:[#allocation2 + $0xd0] sm:$0xff] %vm332_vm0, %v5816_v6  ;;  %v5876_v36 = vld [vmem:[#allocation2 + $0xaf] sm:$0xff]  ;;  %v1729_v6 = vld [vmem:[#allocation7 + $0x78] sm:$0xff] }
  0xc2   : > { %8319 = vst [vmem:[#allocation39_spill] sm:$0xff] %v5829_v20  ;;  %v5893_v23 = vld [vmem:[#allocation2 + $0x1b0] sm:$0xff]  ;;  %1903 = vmatpush.msra.mxu3 %v1729_v6 }
  0xc3   : > { %4321 = vmatmul.msk.f32.gmra.mxu2 %vm332_vm0, %v5742_v52  ;;  %487 = vst.msk [vmem:[#allocation2 + $0x1d0] sm:$0xff] %vm332_vm0, %v5829_v20  ;;  %v5855_v20 = vld [vmem:[%s5381_s13 + $0xe0] sm:$0xff]  ;;  %v5895_v18 = vld [vmem:[#allocation2 + $0x1af] sm:$0xff] }
  0xc4   : > { %4353 = vmatmul.msk.f32.gmra.mxu3 %vm332_vm0, %v5744_v53  ;;  %8320 = vst [vmem:[#allocation40_spill] sm:$0xff] %v5842_v49  ;;  %v5878_v30 = vld [vmem:[#allocation2 + $0xc8] sm:$0xff]  ;;  %v1270_v6 = vld [vmem:[#allocation7 + $0x50] sm:$0xff] }
  0xc5   : > { %472 = vst.msk [vmem:[#allocation2 + $0xe8] sm:$0xff] %vm332_vm0, %v5842_v49  ;;  %v5897_v16 = vld [vmem:[#allocation2 + $0xc7] sm:$0xff]  ;;  %1595 = vmatpush.msrb.mxu1 %v1270_v6  ;;  %v5961_v6 = vpop.f32.mrf.mxu0 }
  0xc6   : > { %8321 = vst [vmem:[#allocation41_spill] sm:$0xff] %v5855_v20  ;;  %v5911_v11 = vld [vmem:[#allocation2 + $0x1c7] sm:$0xff] }
  0xc7   : > { %4307 = vmatmul.msk.f32.gmra.mxu0 %vm332_vm0, %v5748_v55  ;;  %488 = vst.msk [vmem:[#allocation2 + $0x1e8] sm:$0xff] %vm332_vm0, %v5855_v20  ;;  %v5881_v20 = vld [vmem:[%s5381_s13 + $0xe8] sm:$0xff] }
  0xc8   : > { %4339 = vmatmul.msk.f32.gmra.mxu1 %vm332_vm0, %v5772_v61  ;;  %8322 = vst [vmem:[#allocation42_spill] sm:$0xff] %v5868_v56  ;;  %v5899_v14 = vld [vmem:[#allocation2 + $0xd0] sm:$0xff]  ;;  %v1727_v49 = vld [vmem:[#allocation7 + $0x68] sm:$0xff] }
  0xc9   : > { %473 = vst.msk [vmem:[#allocation2 + $0xf0] sm:$0xff] %vm332_vm0, %v5868_v56  ;;  %v5913_v10 = vld [vmem:[#allocation2 + $0xcf] sm:$0xff]  ;;  %1752 = vmatpush.msra.mxu2 %v1727_v49 }
  0xca   : > { %8323 = vst [vmem:[#allocation43_spill] sm:$0xff] %v5876_v36  ;;  %v5925_v0 = vld [vmem:[#allocation2 + $0x1d0] sm:$0xff]  ;;  %v1731_v49 = vld [vmem:[#allocation7 + $0x88] sm:$0xff] }
  0xcb   : > { %4322 = vmatmul.msk.f32.gmra.mxu2 %vm332_vm0, %v5768_v59  ;;  %8324 = vst [vmem:[#allocation44_spill] sm:$0xff] %v5881_v20  ;;  %v5927_v58 = vld [vmem:[#allocation2 + $0x1cf] sm:$0xff]  ;;  %2054 = vmatpush.msra.mxu0 %v1731_v49 }
  0xcc   : > { %4354 = vmatmul.msk.f32.gmra.mxu3 %vm332_vm0, %v5770_v60  ;;  %489 = vst.msk [vmem:[#allocation2 + $0x1f0] sm:$0xff] %vm332_vm0, %v5881_v20  ;;  %v5909_v20 = vld [vmem:[#allocation2 + $0x1c8] sm:$0xff] }
  0xcd   : > { %8325 = vst [vmem:[#allocation45_spill] sm:$0xff] %v5895_v18  ;;  %v5915_v56 = vld [vmem:[#allocation2 + $0xe8] sm:$0xff] }
  0xce   : > { %8326 = vst [vmem:[#allocation46_spill] sm:$0xff] %v5897_v16  ;;  %v5929_v51 = vld [vmem:[#allocation2 + $0xe7] sm:$0xff] }
  0xcf   : > { %4308 = vmatmul.msk.f32.gmra.mxu0 %vm332_vm0, %v5774_v62  ;;  %8327 = vst [vmem:[#allocation47_spill] sm:$0xff] %v5909_v20  ;;  %v5943_v25 = vld [vmem:[#allocation2 + $0x1e8] sm:$0xff] }
  0xd0   : > { %4340 = vmatmul.msk.f32.gmra.mxu1 %vm332_vm0, %v5798_v3  ;;  %8328 = vst [vmem:[#allocation48_spill] sm:$0xff] %v5911_v11  ;;  %v5931_v43 = vld [vmem:[#allocation2 + $0xf0] sm:$0xff]  ;;  %v5945_v19 = vld [vmem:[#allocation2 + $0x1e7] sm:$0xff] }
  0xd1   : > { %8329 = vst [vmem:[#allocation49_spill] sm:$0xff] %v5925_v0  ;;  %v5947_v17 = vld [vmem:[#allocation2 + $0xef] sm:$0xff] }
  0xd2   : > { %8330 = vst [vmem:[#allocation50_spill] sm:$0xff] %v5927_v58 }
  0xd3   : > { %4323 = vmatmul.msk.f32.gmra.mxu2 %vm332_vm0, %v5794_v1  ;;  %8331 = vst [vmem:[#allocation51_spill] sm:$0xff] %v5929_v51  ;;  %v5957_v37 = vld [vmem:[#allocation2 + $0x1f0] sm:$0xff] }
  0xd4   : > { %4355 = vmatmul.msk.f32.gmra.mxu3 %vm332_vm0, %v5796_v2  ;;  %8332 = vst [vmem:[#allocation52_spill] sm:$0xff] %v5943_v25  ;;  %v5959_v49 = vld [vmem:[#allocation2 + $0x1ef] sm:$0xff] }
  0xd5   : > { %8333 = vst [vmem:[#allocation53_spill] sm:$0xff] %v5945_v19 }
  0xd6   : > { %8334 = vst [vmem:[#allocation54_spill] sm:$0xff] %v5947_v17 }
  0xd7   : > { %4309 = vmatmul.msk.f32.gmra.mxu0 %vm332_vm0, %v5800_v4  ;;  %8335 = vst [vmem:[#allocation55_spill] sm:$0xff] %v5957_v37 }
  0xd8   : > { %4341 = vmatmul.msk.f32.gmra.mxu1 %vm332_vm0, %v5824_v9  ;;  %8336 = vst [vmem:[#allocation56_spill] sm:$0xff] %v5959_v49 }
  0xdb   : > { %4324 = vmatmul.msk.f32.gmra.mxu2 %vm332_vm0, %v5820_v7 }
  0xdc   : > { %4356 = vmatmul.msk.f32.gmra.mxu3 %vm332_vm0, %v5822_v8 }
  0xdf   : > { %4310 = vmatmul.msk.f32.gmra.mxu0 %vm332_vm0, %v5826_v12 }
  0xe0   : > { %4342 = vmatmul.msk.f32.gmra.mxu1 %vm332_vm0, %v5850_v5 }
  0xe3   : > { %4325 = vmatmul.msk.f32.gmra.mxu2 %vm332_vm0, %v5846_v50 }
  0xe4   : > { %4357 = vmatmul.msk.f32.gmra.mxu3 %vm332_vm0, %v5848_v57 }
  0xe7   : > { %4311 = vmatmul.msk.f32.gmra.mxu0 %vm332_vm0, %v5852_v63 }
  0xe8   : > { %4343 = vmatmul.msk.f32.gmra.mxu1 %vm332_vm0, %v5876_v36 }
  0xeb   : > { %4326 = vmatmul.msk.f32.gmra.mxu2 %vm332_vm0, %v5872_v48 }
  0xec   : > { %4358 = vmatmul.msk.f32.gmra.mxu3 %vm332_vm0, %v5874_v42 }
  0xef   : > { %4312 = vmatmul.msk.f32.gmra.mxu0 %vm332_vm0, %v5878_v30 }
  0xf0   : > { %4344 = vmatmul.msk.f32.gmra.mxu1 %vm332_vm0, %v5897_v16 }
  0xf3   : > { %4327 = vmatmul.msk.f32.gmra.mxu2 %vm332_vm0, %v5893_v23 }
  0xf4   : > { %4359 = vmatmul.msk.f32.gmra.mxu3 %vm332_vm0, %v5895_v18  ;;  %v5986_v18 = vld [vmem:[#allocation2 + $0x49] sm:$0xff] }
  0xf5   : > { %8338 = vst [vmem:[#allocation58_spill] sm:$0xff] %v5986_v18 }
  0xf7   : > { %4313 = vmatmul.msk.f32.gmra.mxu0 %vm332_vm0, %v5899_v14 }
  0xf8   : > { %4345 = vmatmul.msk.f32.gmra.mxu1 %vm332_vm0, %v5913_v10 }
  0xfb   : > { %4328 = vmatmul.msk.f32.gmra.mxu2 %vm332_vm0, %v5909_v20 }
  0xfc   : > { %4360 = vmatmul.msk.f32.gmra.mxu3 %vm332_vm0, %v5911_v11 }
  0xff   : > { %4314 = vmatmul.msk.f32.gmra.mxu0 %vm332_vm0, %v5915_v56 }
 0x100   : > { %4346 = vmatmul.msk.f32.gmra.mxu1 %vm332_vm0, %v5929_v51 }
 0x103   : > { %4329 = vmatmul.msk.f32.gmra.mxu2 %vm332_vm0, %v5925_v0 }
 0x104   : > { %4361 = vmatmul.msk.f32.gmra.mxu3 %vm332_vm0, %v5927_v58  ;;  %v567_v58 = vld [vmem:[#allocation2 + $0x31] sm:$0xff] }
 0x107   : > { %4315 = vmatmul.msk.f32.gmra.mxu0 %vm332_vm0, %v5931_v43 }
 0x108   : > { %4347 = vmatmul.msk.f32.gmra.mxu1 %vm332_vm0, %v5947_v17 }
 0x10b   : > { %4330 = vmatmul.msk.f32.gmra.mxu2 %vm332_vm0, %v5943_v25 }
 0x10c   : > { %4362 = vmatmul.msk.f32.gmra.mxu3 %vm332_vm0, %v5945_v19 }
 0x10d   : > { %v5963_v15 = vpop.f32.mrf.mxu1 }
 0x10f   : > { %4428 = vmatmul.msk.f32.vlgmr.msrb.gmra.mxu0 %vm332_vm0, %v5626_v24  ;;  %v564_v24 = vld [vmem:[#allocation2 + $0x9] sm:$0xff] }
 0x110   : > { %4460 = vmatmul.msk.f32.vlgmr.msrb.gmra.mxu1 %vm332_vm0, %v566_v13 }
 0x113   : > { %4331 = vmatmul.msk.f32.gmra.mxu2 %vm332_vm0, %v5957_v37 }
 0x114   : > { %4363 = vmatmul.msk.f32.gmra.mxu3 %vm332_vm0, %v5959_v49 }
 0x115   : > { %v5972_v19 = vpop.f32.mrf.mxu1 }
 0x117   : > { %4429 = vmatmul.msk.f32.gmra.mxu0 %vm332_vm0, %v5644_v29  ;;  %v565_v29 = vld [vmem:[#allocation2 + $0x11] sm:$0xff] }
 0x118   : > { %4461 = vmatmul.msk.f32.gmra.mxu1 %vm332_vm0, %v567_v58 }
 0x11b   : > { %4364 = vmatmul.msk.f32.vlgmr.msrb.gmra.mxu2 %vm332_vm0, %v564_v24  ;;  %v6001_v24 = vld [vmem:[#allocation2 + $0x51] sm:$0xff] }
 0x11c   : > { %v5974_v25 = vpop.f32.mrf.mxu0  ;;  %4396 = vmatmul.msk.f32.vlgmr.msrb.gmra.mxu3 %vm332_vm0, %v5642_v28  ;;  %8340 = vst [vmem:[#allocation60_spill] sm:$0xff] %v6001_v24 }
 0x11d   : > { %v5984_v0 = vpop.f32.mrf.mxu1 }
 0x11e   : > { %v767_v49 = vpop.f32.mrf.mxu2 }
 0x11f   : > { %4430 = vmatmul.msk.f32.gmra.mxu0 %vm332_vm0, %v5670_v35  ;;  %v976_v37 = vpop.f32.mrf.mxu3 }
 0x120   : > { %v5982_v11 = vadd.f32 %v976_v37, %v767_v49  ;;  %4462 = vmatmul.msk.f32.gmra.mxu1 %vm332_vm0, %v5986_v18 }
 0x122   : > { %8337 = vst [vmem:[#allocation57_spill] sm:$0xff] %v5982_v11 }
 0x123   : > { %4365 = vmatmul.msk.f32.gmra.mxu2 %vm332_vm0, %v565_v29 }
 0x124   : > { %v5988_v20 = vpop.f32.mrf.mxu0  ;;  %4397 = vmatmul.msk.f32.gmra.mxu3 %vm332_vm0, %v5668_v34 }
 0x125   : > { %v5999_v49 = vpop.f32.mrf.mxu1 }
 0x126   : > { %v770_v28 = vpop.f32.mrf.mxu2 }
 0x127   : > { %4431 = vmatmul.msk.f32.gmra.mxu0 %vm332_vm0, %v5696_v41  ;;  %v979_v35 = vpop.f32.mrf.mxu3 }
 0x128   : > { %v5997_v37 = vadd.f32 %v979_v35, %v770_v28  ;;  %4463 = vmatmul.msk.f32.gmra.mxu1 %vm332_vm0, %v6001_v24  ;;  %v6016_v35 = vld [vmem:[#allocation2 + $0x69] sm:$0xff] }
 0x129   : > { %8342 = vst [vmem:[#allocation62_spill] sm:$0xff] %v6016_v35 }
 0x12a   : > { %8339 = vst [vmem:[#allocation59_spill] sm:$0xff] %v5997_v37 }
 0x12b   : > { %4366 = vmatmul.msk.f32.gmra.mxu2 %vm332_vm0, %v566_v13 }
 0x12c   : > { %v6003_v11 = vpop.f32.mrf.mxu0  ;;  %4398 = vmatmul.msk.f32.gmra.mxu3 %vm332_vm0, %v5694_v40 }
 0x12d   : > { %v6014_v28 = vpop.f32.mrf.mxu1 }
 0x12e   : > { %v773_v34 = vpop.f32.mrf.mxu2 }
 0x12f   : > { %4432 = vmatmul.msk.f32.gmra.mxu0 %vm332_vm0, %v5722_v47  ;;  %v982_v41 = vpop.f32.mrf.mxu3 }
 0x130   : > { %v6012_v29 = vadd.f32 %v982_v41, %v773_v34  ;;  %4464 = vmatmul.msk.f32.gmra.mxu1 %vm332_vm0, %v6016_v35  ;;  %v6031_v41 = vld [vmem:[#allocation2 + $0x71] sm:$0xff] }
 0x131   : > { %8344 = vst [vmem:[#allocation64_spill] sm:$0xff] %v6031_v41 }
 0x132   : > { %8341 = vst [vmem:[#allocation61_spill] sm:$0xff] %v6012_v29 }
 0x133   : > { %4367 = vmatmul.msk.f32.gmra.mxu2 %vm332_vm0, %v567_v58 }
 0x134   : > { %v6018_v37 = vpop.f32.mrf.mxu0  ;;  %4399 = vmatmul.msk.f32.gmra.mxu3 %vm332_vm0, %v5720_v46 }
 0x135   : > { %v6029_v34 = vpop.f32.mrf.mxu1 }
 0x136   : > { %v776_v13 = vpop.f32.mrf.mxu2 }
 0x137   : > { %4433 = vmatmul.msk.f32.gmra.mxu0 %vm332_vm0, %v5748_v55  ;;  %v985_v40 = vpop.f32.mrf.mxu3 }
 0x138   : > { %v6027_v47 = vadd.f32 %v985_v40, %v776_v13  ;;  %4465 = vmatmul.msk.f32.gmra.mxu1 %vm332_vm0, %v6031_v41  ;;  %v6047_v40 = vld [vmem:[#allocation2 + $0x89] sm:$0xff] }
 0x139   : > { %8346 = vst [vmem:[#allocation66_spill] sm:$0xff] %v6047_v40 }
 0x13a   : > { %8343 = vst [vmem:[#allocation63_spill] sm:$0xff] %v6027_v47 }
 0x13b   : > { %4368 = vmatmul.msk.f32.gmra.mxu2 %vm332_vm0, %v5986_v18 }
 0x13c   : > { %v6033_v29 = vpop.f32.mrf.mxu0  ;;  %4400 = vmatmul.msk.f32.gmra.mxu3 %vm332_vm0, %v5746_v54 }
 0x13d   : > { %v6045_v13 = vpop.f32.mrf.mxu1 }
 0x13e   : > { %v779_v46 = vpop.f32.mrf.mxu2 }
 0x13f   : > { %4434 = vmatmul.msk.f32.gmra.mxu0 %vm332_vm0, %v5774_v62  ;;  %v988_v55 = vpop.f32.mrf.mxu3 }
 0x140   : > { %v6043_v58 = vadd.f32 %v988_v55, %v779_v46  ;;  %4466 = vmatmul.msk.f32.gmra.mxu1 %vm332_vm0, %v6047_v40 }
 0x142   : > { %8345 = vst [vmem:[#allocation65_spill] sm:$0xff] %v6043_v58  ;;  %v6063_v58 = vld [vmem:[#allocation2 + $0x91] sm:$0xff] }
 0x143   : > { %4369 = vmatmul.msk.f32.gmra.mxu2 %vm332_vm0, %v6001_v24  ;;  %8348 = vst [vmem:[#allocation68_spill] sm:$0xff] %v6063_v58 }
 0x144   : > { %v6049_v47 = vpop.f32.mrf.mxu0  ;;  %4401 = vmatmul.msk.f32.gmra.mxu3 %vm332_vm0, %v5772_v61 }
 0x145   : > { %v6061_v55 = vpop.f32.mrf.mxu1 }
 0x146   : > { %v782_v54 = vpop.f32.mrf.mxu2 }
 0x147   : > { %4435 = vmatmul.msk.f32.gmra.mxu0 %vm332_vm0, %v5800_v4  ;;  %v991_v62 = vpop.f32.mrf.mxu3 }
 0x148   : > { %v6059_v46 = vadd.f32 %v991_v62, %v782_v54  ;;  %4467 = vmatmul.msk.f32.gmra.mxu1 %vm332_vm0, %v6063_v58 }
 0x14a   : > { %8347 = vst [vmem:[#allocation67_spill] sm:$0xff] %v6059_v46  ;;  %v6079_v46 = vld [vmem:[#allocation2 + $0xa9] sm:$0xff] }
 0x14b   : > { %4370 = vmatmul.msk.f32.gmra.mxu2 %vm332_vm0, %v6016_v35  ;;  %8350 = vst [vmem:[#allocation70_spill] sm:$0xff] %v6079_v46 }
 0x14c   : > { %v6065_v18 = vpop.f32.mrf.mxu0  ;;  %4402 = vmatmul.msk.f32.gmra.mxu3 %vm332_vm0, %v5798_v3 }
 0x14d   : > { %v6077_v62 = vpop.f32.mrf.mxu1 }
 0x14e   : > { %v785_v61 = vpop.f32.mrf.mxu2 }
 0x14f   : > { %4436 = vmatmul.msk.f32.gmra.mxu0 %vm332_vm0, %v5826_v12  ;;  %v994_v4 = vpop.f32.mrf.mxu3 }
 0x150   : > { %v6075_v54 = vadd.f32 %v994_v4, %v785_v61  ;;  %4468 = vmatmul.msk.f32.gmra.mxu1 %vm332_vm0, %v6079_v46 }
 0x152   : > { %8349 = vst [vmem:[#allocation69_spill] sm:$0xff] %v6075_v54  ;;  %v6095_v54 = vld [vmem:[#allocation2 + $0xb1] sm:$0xff] }
 0x153   : > { %4371 = vmatmul.msk.f32.gmra.mxu2 %vm332_vm0, %v6031_v41  ;;  %8352 = vst [vmem:[#allocation72_spill] sm:$0xff] %v6095_v54 }
 0x154   : > { %v6081_v24 = vpop.f32.mrf.mxu0  ;;  %4403 = vmatmul.msk.f32.gmra.mxu3 %vm332_vm0, %v5824_v9 }
 0x155   : > { %v6093_v4 = vpop.f32.mrf.mxu1 }
 0x156   : > { %v788_v3 = vpop.f32.mrf.mxu2 }
 0x157   : > { %4437 = vmatmul.msk.f32.gmra.mxu0 %vm332_vm0, %v5852_v63  ;;  %v997_v12 = vpop.f32.mrf.mxu3 }
 0x158   : > { %v6091_v61 = vadd.f32 %v997_v12, %v788_v3  ;;  %4469 = vmatmul.msk.f32.gmra.mxu1 %vm332_vm0, %v6095_v54 }
 0x15a   : > { %8351 = vst [vmem:[#allocation71_spill] sm:$0xff] %v6091_v61  ;;  %v6111_v61 = vld [vmem:[#allocation2 + $0xc9] sm:$0xff] }
 0x15b   : > { %4372 = vmatmul.msk.f32.gmra.mxu2 %vm332_vm0, %v6047_v40  ;;  %8354 = vst [vmem:[#allocation74_spill] sm:$0xff] %v6111_v61 }
 0x15c   : > { %v6097_v35 = vpop.f32.mrf.mxu0  ;;  %4404 = vmatmul.msk.f32.gmra.mxu3 %vm332_vm0, %v5850_v5 }
 0x15d   : > { %v6109_v12 = vpop.f32.mrf.mxu1 }
 0x15e   : > { %v791_v63 = vpop.f32.mrf.mxu2 }
 0x15f   : > { %4438 = vmatmul.msk.f32.gmra.mxu0 %vm332_vm0, %v5878_v30  ;;  %v1000_v9 = vpop.f32.mrf.mxu3 }
 0x160   : > { %v6107_v3 = vadd.f32 %v1000_v9, %v791_v63  ;;  %4470 = vmatmul.msk.f32.gmra.mxu1 %vm332_vm0, %v6111_v61 }
 0x162   : > { %8353 = vst [vmem:[#allocation73_spill] sm:$0xff] %v6107_v3  ;;  %v6127_v3 = vld [vmem:[#allocation2 + $0xd1] sm:$0xff] }
 0x163   : > { %4373 = vmatmul.msk.f32.gmra.mxu2 %vm332_vm0, %v6063_v58 }
 0x164   : > { %v6113_v41 = vpop.f32.mrf.mxu0  ;;  %4405 = vmatmul.msk.f32.gmra.mxu3 %vm332_vm0, %v5876_v36  ;;  %v6143_v36 = vld [vmem:[#allocation2 + $0xe9] sm:$0xff] }
 0x165   : > { %v6125_v9 = vpop.f32.mrf.mxu1  ;;  %8357 = vst [vmem:[#allocation77_spill] sm:$0xff] %v6143_v36 }
 0x166   : > { %v794_v30 = vpop.f32.mrf.mxu2 }
 0x167   : > { %4439 = vmatmul.msk.f32.gmra.mxu0 %vm332_vm0, %v5899_v14  ;;  %v1003_v5 = vpop.f32.mrf.mxu3 }
 0x168   : > { %v6123_v63 = vadd.f32 %v1003_v5, %v794_v30  ;;  %4471 = vmatmul.msk.f32.gmra.mxu1 %vm332_vm0, %v6127_v3 }
 0x16a   : > { %8355 = vst [vmem:[#allocation75_spill] sm:$0xff] %v6123_v63 }
 0x16b   : > { %4374 = vmatmul.msk.f32.gmra.mxu2 %vm332_vm0, %v6079_v46 }
 0x16c   : > { %v6129_v40 = vpop.f32.mrf.mxu0  ;;  %4406 = vmatmul.msk.f32.gmra.mxu3 %vm332_vm0, %v5897_v16  ;;  %v6159_v16 = vld [vmem:[#allocation2 + $0xf1] sm:$0xff] }
 0x16d   : > { %v6141_v63 = vpop.f32.mrf.mxu1  ;;  %8359 = vst [vmem:[#allocation79_spill] sm:$0xff] %v6159_v16 }
 0x16e   : > { %v797_v14 = vpop.f32.mrf.mxu2 }
 0x16f   : > { %4440 = vmatmul.msk.f32.gmra.mxu0 %vm332_vm0, %v5915_v56  ;;  %v1006_v30 = vpop.f32.mrf.mxu3 }
 0x170   : > { %v6139_v5 = vadd.f32 %v1006_v30, %v797_v14  ;;  %4472 = vmatmul.msk.f32.gmra.mxu1 %vm332_vm0, %v6143_v36 }
 0x172   : > { %8356 = vst [vmem:[#allocation76_spill] sm:$0xff] %v6139_v5 }
 0x173   : > { %4375 = vmatmul.msk.f32.gmra.mxu2 %vm332_vm0, %v6095_v54  ;;  %v1728_v54 = vld [vmem:[#allocation7 + $0x70] sm:$0xff] }
 0x174   : > { %v6145_v58 = vpop.f32.mrf.mxu0  ;;  %4407 = vmatmul.msk.f32.gmra.mxu3 %vm332_vm0, %v5913_v10  ;;  %v1726_v10 = vld [vmem:[#allocation7 + $0x60] sm:$0xff] }
 0x175   : > { %v6157_v5 = vpop.f32.mrf.mxu1  ;;  %1753 = vmatpush.msra.mxu2 %v1726_v10  ;;  %1904 = vmatpush.msra.mxu3 %v1728_v54  ;;  %v2431_v10 = vld [vmem:[#allocation9 + $0x18] sm:$0xff] }
 0x176   : > { %v800_v56 = vpop.f32.mrf.mxu2  ;;  %2544 = vmatpush.msra.mxu1 %v2431_v10 }
 0x177   : > { %4441 = vmatmul.msk.f32.gmra.mxu0 %vm332_vm0, %v5931_v43  ;;  %v1009_v14 = vpop.f32.mrf.mxu3 }
 0x178   : > { %v6155_v30 = vadd.f32 %v1009_v14, %v800_v56  ;;  %4473 = vmatmul.msk.f32.gmra.mxu1 %vm332_vm0, %v6159_v16 }
 0x17a   : > { %8358 = vst [vmem:[#allocation78_spill] sm:$0xff] %v6155_v30 }
 0x17b   : > { %4376 = vmatmul.msk.f32.gmra.mxu2 %vm332_vm0, %v6111_v61  ;;  %v6175_v61 = vld [vmem:[#allocation2 + $0x109] sm:$0xff] }
 0x17c   : > { %v6161_v46 = vpop.f32.mrf.mxu0  ;;  %4408 = vmatmul.msk.f32.gmra.mxu3 %vm332_vm0, %v5929_v51  ;;  %8362 = vst [vmem:[#allocation82_spill] sm:$0xff] %v6175_v61 }
 0x17d   : > { %8360 = vst [vmem:[#allocation80_spill] sm:$0xff] %v6161_v46  ;;  %v6173_v30 = vpop.f32.mrf.mxu1 }
 0x17e   : > { %v803_v43 = vpop.f32.mrf.mxu2 }
 0x17f   : > { %4442 = vmatmul.msk.f32.gmra.mxu0 %vm332_vm0, %v5611_v21  ;;  %v1012_v56 = vpop.f32.mrf.mxu3  ;;  %v1730_v21 = vld [vmem:[#allocation7 + $0x80] sm:$0xff] }
 0x180   : > { %v6171_v14 = vadd.f32 %v1012_v56, %v803_v43  ;;  %4474 = vmatmul.msk.f32.gmra.mxu1 %vm332_vm0, %v6175_v61  ;;  %2055 = vmatpush.msra.mxu0 %v1730_v21 }
 0x182   : > { %8361 = vst [vmem:[#allocation81_spill] sm:$0xff] %v6171_v14  ;;  %v6189_v14 = vld [vmem:[#allocation2 + $0x111] sm:$0xff] }
 0x183   : > { %4377 = vmatmul.msk.f32.gmra.mxu2 %vm332_vm0, %v6127_v3  ;;  %8364 = vst [vmem:[#allocation84_spill] sm:$0xff] %v6189_v14 }
 0x184   : > { %v6177_v46 = vpop.f32.mrf.mxu0  ;;  %4409 = vmatmul.msk.f32.gmra.mxu3 %vm332_vm0, %v5947_v17 }
 0x185   : > { %v6195_v17 = vpop.f32.mrf.mxu1 }
 0x186   : > { %v806_v54 = vpop.f32.mrf.mxu2 }
 0x187   : > { %4443 = vmatmul.msk.f32.gmra.mxu0 %vm332_vm0, %v5638_v26  ;;  %v1015_v43 = vpop.f32.mrf.mxu3 }
 0x188   : > { %v6187_v56 = vadd.f32 %v1015_v43, %v806_v54  ;;  %4475 = vmatmul.msk.f32.gmra.mxu1 %vm332_vm0, %v6189_v14  ;;  %v6203_v54 = vld [vmem:[#allocation2 + $0x129] sm:$0xff] }
 0x18a   : > { %8363 = vst [vmem:[#allocation83_spill] sm:$0xff] %v6187_v56 }
 0x18b   : > { %4378 = vmatmul.msk.f32.gmra.mxu2 %vm332_vm0, %v6143_v36  ;;  %v6227_v36 = vld [vmem:[#allocation2 + $0x149] sm:$0xff] }
 0x18c   : > { %v1446_v51 = vpop.f32.mrf.mxu0  ;;  %4410 = vmatmul.msk.f32.gmra.mxu3 %vm332_vm0, %v5613_v22 }
 0x18d   : > { %v1597_v22 = vpop.f32.mrf.mxu1 }
 0x18e   : > { %v809_v26 = vpop.f32.mrf.mxu2 }
 0x18f   : > { %4444 = vmatmul.msk.f32.gmra.mxu0 %vm332_vm0, %v5664_v32  ;;  %v1018_v10 = vpop.f32.mrf.mxu3 }
 0x190   : > { %v6201_v21 = vadd.f32 %v1018_v10, %v809_v26  ;;  %4476 = vmatmul.msk.f32.gmra.mxu1 %vm332_vm0, %v6203_v54  ;;  %v6215_v10 = vld [vmem:[#allocation2 + $0x131] sm:$0xff] }
 0x192   : > { %8365 = vst [vmem:[#allocation85_spill] sm:$0xff] %v6201_v21 }
 0x193   : > { %4379 = vmatmul.msk.f32.gmra.mxu2 %vm332_vm0, %v6159_v16 }
 0x194   : > { %v1449_v43 = vpop.f32.mrf.mxu0  ;;  %4411 = vmatmul.msk.f32.gmra.mxu3 %vm332_vm0, %v5640_v27  ;;  %v929_v27 = vadd.f32 %v5963_v15, %v5941_v31  ;;  %v932_v15 = vadd.f32 %v5972_v19, %v5961_v6  ;;  %v935_v19 = vadd.f32 %v5984_v0, %v5974_v25 }
 0x196   : > { %v812_v32 = vpop.f32.mrf.mxu2 }
 0x197   : > { %4445 = vmatmul.msk.f32.gmra.mxu0 %vm332_vm0, %v5690_v38  ;;  %v1021_v56 = vpop.f32.mrf.mxu3  ;;  %v1600_v38 = vpop.f32.mrf.mxu1 }
 0x198   : > { %v6213_v26 = vadd.f32 %v1021_v56, %v812_v32  ;;  %4477 = vmatmul.msk.f32.gmra.mxu1 %vm332_vm0, %v6215_v10 }
 0x19a   : > { %8366 = vst [vmem:[#allocation86_spill] sm:$0xff] %v6213_v26 }
 0x19b   : > { %4380 = vmatmul.msk.f32.gmra.mxu2 %vm332_vm0, %v6175_v61 }
 0x19c   : > { %v1452_v21 = vpop.f32.mrf.mxu0  ;;  %4412 = vmatmul.msk.f32.gmra.mxu3 %vm332_vm0, %v5666_v33 }
 0x19e   : > { %v1137_v56 = vpop.f32.mrf.mxu2 }
 0x19f   : > { %4446 = vmatmul.msk.f32.gmra.mxu0 %vm332_vm0, %v5716_v44  ;;  %v1295_v32 = vpop.f32.mrf.mxu3  ;;  %v1233_v26 = vadd.f32 %v1137_v56, %v929_v27  ;;  %v1603_v56 = vpop.f32.mrf.mxu1 }
 0x1a0   : > { %4478 = vmatmul.msk.f32.gmra.mxu1 %vm332_vm0, %v6227_v36 }
 0x1a1   : > { %v1391_v16 = vadd.f32 %v1295_v32, %v1233_v26 }
 0x1a3   : > { %4381 = vmatmul.msk.f32.gmra.mxu2 %vm332_vm0, %v6189_v14  ;;  %v1542_v33 = vadd.f32 %v1446_v51, %v1391_v16  ;;  %v6241_v14 = vld [vmem:[#allocation2 + $0x151] sm:$0xff] }
 0x1a4   : > { %v1455_v61 = vpop.f32.mrf.mxu0  ;;  %4413 = vmatmul.msk.f32.gmra.mxu3 %vm332_vm0, %v5692_v39 }
 0x1a5   : > { %v6237_v31 = vadd.f32 %v1597_v22, %v1542_v33 }
 0x1a6   : > { %v1140_v44 = vpop.f32.mrf.mxu2 }
 0x1a7   : > { %4447 = vmatmul.msk.f32.gmra.mxu0 %vm332_vm0, %v5742_v52  ;;  %v1298_v26 = vpop.f32.mrf.mxu3  ;;  %v1234_v27 = vadd.f32 %v1140_v44, %v932_v15  ;;  %v1606_v15 = vpop.f32.mrf.mxu1  ;;  %v6255_v44 = vld [vmem:[#allocation2 + $0x169] sm:$0xff] }
 0x1a8   : > { %4479 = vmatmul.msk.f32.gmra.mxu1 %vm332_vm0, %v6241_v14 }
 0x1a9   : > { %v1392_v32 = vadd.f32 %v1298_v26, %v1234_v27 }
 0x1ab   : > { %4382 = vmatmul.msk.f32.gmra.mxu2 %vm332_vm0, %v6203_v54  ;;  %v1543_v16 = vadd.f32 %v1449_v43, %v1392_v32  ;;  %v6269_v32 = vld [vmem:[#allocation2 + $0x171] sm:$0xff] }
 0x1ac   : > { %v1458_v39 = vpop.f32.mrf.mxu0  ;;  %4414 = vmatmul.msk.f32.gmra.mxu3 %vm332_vm0, %v5718_v45 }
 0x1ad   : > { %v6251_v51 = vadd.f32 %v1600_v38, %v1543_v16 }
 0x1ae   : > { %v1143_v52 = vpop.f32.mrf.mxu2 }
 0x1af   : > { %4448 = vmatmul.msk.f32.gmra.mxu0 %vm332_vm0, %v5768_v59  ;;  %v1301_v6 = vpop.f32.mrf.mxu3  ;;  %v1235_v22 = vadd.f32 %v1143_v52, %v935_v19  ;;  %v938_v59 = vadd.f32 %v5999_v49, %v5988_v20  ;;  %v1609_v20 = vpop.f32.mrf.mxu1 }
 0x1b0   : > { %4480 = vmatmul.msk.f32.gmra.mxu1 %vm332_vm0, %v6255_v44 }
 0x1b1   : > { %v1393_v33 = vadd.f32 %v1301_v6, %v1235_v22  ;;  %v6283_v6 = vld [vmem:[#allocation2 + $0x189] sm:$0xff] }
 0x1b3   : > { %4383 = vmatmul.msk.f32.gmra.mxu2 %vm332_vm0, %v6215_v10  ;;  %v1544_v25 = vadd.f32 %v1452_v21, %v1393_v33 }
 0x1b4   : > { %v1461_v45 = vpop.f32.mrf.mxu0  ;;  %4415 = vmatmul.msk.f32.gmra.mxu3 %vm332_vm0, %v5744_v53 }
 0x1b5   : > { %v6265_v0 = vadd.f32 %v1603_v56, %v1544_v25 }
 0x1b6   : > { %v1146_v43 = vpop.f32.mrf.mxu2 }
 0x1b7   : > { %4449 = vmatmul.msk.f32.gmra.mxu0 %vm332_vm0, %v5794_v1  ;;  %v1304_v38 = vpop.f32.mrf.mxu3  ;;  %v1236_v26 = vadd.f32 %v1146_v43, %v938_v59  ;;  %v941_v1 = vadd.f32 %v6014_v28, %v6003_v11  ;;  %v944_v11 = vadd.f32 %v6029_v34, %v6018_v37  ;;  %v1612_v28 = vpop.f32.mrf.mxu1  ;;  %v6297_v59 = vld [vmem:[#allocation2 + $0x191] sm:$0xff] }
 0x1b8   : > { %4481 = vmatmul.msk.f32.gmra.mxu1 %vm332_vm0, %v6269_v32 }
 0x1b9   : > { %v1394_v27 = vadd.f32 %v1304_v38, %v1236_v26 }
 0x1bb   : > { %4384 = vmatmul.msk.f32.gmra.mxu2 %vm332_vm0, %v6227_v36  ;;  %v1545_v53 = vadd.f32 %v1455_v61, %v1394_v27 }
 0x1bc   : > { %v1464_v16 = vpop.f32.mrf.mxu0  ;;  %4416 = vmatmul.msk.f32.gmra.mxu3 %vm332_vm0, %v5770_v60 }
 0x1bd   : > { %v6279_v49 = vadd.f32 %v1606_v15, %v1545_v53  ;;  %v6311_v53 = vld [vmem:[#allocation2 + $0x1a9] sm:$0xff] }
 0x1be   : > { %v1149_v21 = vpop.f32.mrf.mxu2 }
 0x1bf   : > { %4450 = vmatmul.msk.f32.gmra.mxu0 %vm332_vm0, %v5820_v7  ;;  %v1307_v56 = vpop.f32.mrf.mxu3  ;;  %v1237_v19 = vadd.f32 %v1149_v21, %v941_v1  ;;  %v1615_v26 = vpop.f32.mrf.mxu1 }
 0x1c0   : > { %4482 = vmatmul.msk.f32.gmra.mxu1 %vm332_vm0, %v6283_v6 }
 0x1c1   : > { %v1395_v52 = vadd.f32 %v1307_v56, %v1237_v19  ;;  %v6325_v56 = vld [vmem:[#allocation2 + $0x1b1] sm:$0xff]  ;;  %v8367_v19 = vld [vmem:[#allocation47_spill] sm:$0xff] }
 0x1c3   : > { %4385 = vmatmul.msk.f32.gmra.mxu2 %vm332_vm0, %v6241_v14  ;;  %v1546_v61 = vadd.f32 %v1458_v39, %v1395_v52  ;;  %v6340_v52 = vld [vmem:[%s5381_s13 + $0xf0] sm:$0xff] }
 0x1c4   : > { %v1467_v60 = vpop.f32.mrf.mxu0  ;;  %4417 = vmatmul.msk.f32.gmra.mxu3 %vm332_vm0, %v5796_v2  ;;  %8368 = vst [vmem:[#allocation47_spill] sm:$0xff] %v6340_v52 }
 0x1c5   : > { %v6293_v7 = vadd.f32 %v1609_v20, %v1546_v61  ;;  %490 = vst.msk [vmem:[#allocation2 + $0x208] sm:$0xff] %vm332_vm0, %v6340_v52 }
 0x1c6   : > { %v1152_v22 = vpop.f32.mrf.mxu2 }
 0x1c7   : > { %4451 = vmatmul.msk.f32.gmra.mxu0 %vm332_vm0, %v5846_v50  ;;  %v1310_v33 = vpop.f32.mrf.mxu3  ;;  %v1238_v15 = vadd.f32 %v1152_v22, %v944_v11  ;;  %v947_v50 = vadd.f32 %v6045_v13, %v6033_v29 }
 0x1c8   : > { %4483 = vmatmul.msk.f32.gmra.mxu1 %vm332_vm0, %v6297_v59 }
 0x1c9   : > { %v1396_v25 = vadd.f32 %v1310_v33, %v1238_v15  ;;  %v956_v33 = vadd.f32 %v6093_v4, %v6081_v24  ;;  %v8370_v15 = vld [vmem:[#allocation49_spill] sm:$0xff]  ;;  %v959_v4 = vadd.f32 %v6109_v12, %v6097_v35  ;;  %v962_v35 = vadd.f32 %v6125_v9, %v6113_v41  ;;  %v8375_v12 = vld [vmem:[#allocation55_spill] sm:$0xff] }
 0x1ca   : > { %v965_v41 = vadd.f32 %v6141_v63, %v6129_v40  ;;  %v2430_v40 = vld [vmem:[#allocation9 + $0x10] sm:$0xff]  ;;  %v968_v63 = vadd.f32 %v6157_v5, %v6145_v58  ;;  %v8378_v5 = vld [vmem:[#allocation80_spill] sm:$0xff] }
 0x1cb   : > { %4386 = vmatmul.msk.f32.gmra.mxu2 %vm332_vm0, %v6255_v44  ;;  %v1547_v37 = vadd.f32 %v1461_v45, %v1396_v25  ;;  %v6359_v25 = vld [vmem:[%s5381_s13 + $0xf8] sm:$0xff]  ;;  %2545 = vmatpush.msra.mxu1 %v2430_v40  ;;  %v4963_v40 = vld [vmem:[#allocation2 + $0x47] sm:$0xff]  ;;  %s7819_s13 = scalar_lea.vmem [#allocation10], %s4296_s1  ;;  %s4882_s1 = sshll.u32 %s5291_s28, 8 }
 0x1cc   : > { %v1470_v2 = vpop.f32.mrf.mxu0  ;;  %4418 = vmatmul.msk.f32.gmra.mxu3 %vm332_vm0, %v5822_v8  ;;  %491 = vst.msk [vmem:[#allocation2 + $0x210] sm:$0xff] %vm332_vm0, %v6359_v25  ;;  %s4191_s18 = scalar_lea.hbm %s8162_s7, %s4882_s1  ;;  %s4192_s21 = sshll.u32 %s7819_s13, 4  ;;  %s4193_s21 = int_to_ptr.vmem [resolvable:$true] %s4192_s21 }
 0x1cd   : > { %v6307_v34 = vadd.f32 %v1612_v28, %v1547_v37  ;;  %v6344_v28 = vld [vmem:[#allocation2 + $0x1c9] sm:$0xff]  ;;  %s4194_s29 = sshll.u32 %s4191_s18, 4  ;;  %s4180_s28 = scalar_lea.sflag [#allocation6], %s5375_s14  ;;  %s4195_s29 = int_to_ptr.hbm [resolvable:$true] %s4194_s29 }
 0x1ce   : > { %v1155_v39 = vpop.f32.mrf.mxu2  ;;  %s5165_s23 = sshra.s32 %s4195_s29, 4  ;;  %s5166_s23 = int_to_ptr.hbm [resolvable:$true] %s5165_s23 }
 0x1cf   : > { %4452 = vmatmul.msk.f32.gmra.mxu0 %vm332_vm0, %v5872_v48  ;;  %v1313_v43 = vpop.f32.mrf.mxu3  ;;  %v1239_v38 = vadd.f32 %v1155_v39, %v947_v50  ;;  %v950_v48 = vadd.f32 %v6061_v55, %v6049_v47  ;;  %s5167_s15 = scalar_lea.hbm %s5166_s23, 256  ;;  %p5172_p11 = scmp.lt.s32.totalorder %s5166_s23, %s8162_s7 }
 0x1d0   : > { %4484 = vmatmul.msk.f32.gmra.mxu1 %vm332_vm0, %v6311_v53  ;;  %p5168_p1 = scmp.ne.s32.totalorder %s5166_s23, %s5167_s15  ;;  %p5173_p2 = scmp.lt.s32.totalorder %s5171_s11, %s5167_s15 }
 0x1d1   : > { %v1397_v27 = vadd.f32 %v1313_v43, %v1239_v38 }
 0x1d2   : > { %p5169_p4 = pnand %p5168_p1, %p5342_p3  ;;  %p5174_p9 = por %p5173_p2, %p5172_p11 }
 0x1d3   : > { %4387 = vmatmul.msk.f32.gmra.mxu2 %vm332_vm0, %v6269_v32  ;;  %v1548_v29 = vadd.f32 %v1464_v16, %v1397_v27  ;;  %v8373_v27 = vld [vmem:[#allocation52_spill] sm:$0xff] }
 0x1d4   : > { %v1473_v8 = vpop.f32.mrf.mxu0  ;;  %4419 = vmatmul.msk.f32.gmra.mxu3 %vm332_vm0, %v5848_v57  ;;  %v1618_v57 = vpop.f32.mrf.mxu1  ;;  %p5170_p8 = pneg %p5169_p4 }
 0x1d5   : > { %v6321_v13 = vadd.f32 %v1615_v26, %v1548_v29  ;;  %v8372_v26 = vld [vmem:[#allocation48_spill] sm:$0xff] }
 0x1d6   : > { %v1158_v45 = vpop.f32.mrf.mxu2  ;;  %p5175_p10 = pnand %p5174_p9, %p5170_p8 }
 0x1d7   : > { %4453 = vmatmul.msk.f32.gmra.mxu0 %vm332_vm0, %v5893_v23  ;;  %v1316_v20 = vpop.f32.mrf.mxu3  ;;  %v1240_v1 = vadd.f32 %v1158_v45, %v950_v48  ;;  %v953_v23 = vadd.f32 %v6077_v62, %v6065_v18  ;;  %v8369_v18 = vld [vmem:[#allocation45_spill] sm:$0xff] }
 0x1d8   : > { %4485 = vmatmul.msk.f32.gmra.mxu1 %vm332_vm0, %v6325_v56  ;;  %8371 = vst [vmem:[#allocation45_spill] sm:$0xff] %v6359_v25 }
 0x1d9   : > { %v1398_v21 = vadd.f32 %v1316_v20, %v1240_v1  ;;  %v6377_v1 = vld [vmem:[#allocation2 + $0x1e9] sm:$0xff] }
 0x1db   : > { %4388 = vmatmul.msk.f32.gmra.mxu2 %vm332_vm0, %v6283_v6  ;;  %v1549_v47 = vadd.f32 %v1467_v60, %v1398_v21 }
 0x1dc   : > { %v1476_v16 = vpop.f32.mrf.mxu0  ;;  %4420 = vmatmul.msk.f32.gmra.mxu3 %vm332_vm0, %v5874_v42 }
 0x1dd   : > { %v6335_v55 = vadd.f32 %v1618_v57, %v1549_v47 }
 0x1de   : > { %v1161_v61 = vpop.f32.mrf.mxu2 }
 0x1df   : > { %4454 = vmatmul.msk.f32.gmra.mxu0 %vm332_vm0, %v8367_v19  ;;  %v1319_v11 = vpop.f32.mrf.mxu3  ;;  %v1241_v42 = vadd.f32 %v1161_v61, %v953_v23 }
 0x1e0   : > { %4486 = vmatmul.msk.f32.gmra.mxu1 %vm332_vm0, %v6344_v28 }
 0x1e1   : > { %v1399_v60 = vadd.f32 %v1319_v11, %v1241_v42  ;;  %v6391_v11 = vld [vmem:[#allocation2 + $0x1f1] sm:$0xff] }
 0x1e3   : > { %4389 = vmatmul.msk.f32.gmra.mxu2 %vm332_vm0, %v6297_v59  ;;  %v6350_v62 = vadd.f32 %v1470_v2, %v1399_v60  ;;  %v6363_v2 = vld [vmem:[#allocation2 + $0x1d1] sm:$0xff]  ;;  %v6393_v60 = vld [vmem:[#allocation2 + $0x208] sm:$0xff] }
 0x1e4   : > { %v1479_v22 = vpop.f32.mrf.mxu0  ;;  %4421 = vmatmul.msk.f32.gmra.mxu3 %vm332_vm0, %v8369_v18 }
 0x1e6   : > { %v1164_v37 = vpop.f32.mrf.mxu2 }
 0x1e7   : > { %4455 = vmatmul.msk.f32.gmra.mxu0 %vm332_vm0, %v8370_v15  ;;  %v1322_v50 = vpop.f32.mrf.mxu3  ;;  %v1242_v39 = vadd.f32 %v1164_v37, %v956_v33 }
 0x1e8   : > { %4487 = vmatmul.msk.f32.gmra.mxu1 %vm332_vm0, %v6363_v2 }
 0x1e9   : > { %v1400_v43 = vadd.f32 %v1322_v50, %v1242_v39  ;;  %v6407_v50 = vld [vmem:[#allocation2 + $0x209] sm:$0xff] }
 0x1eb   : > { %4390 = vmatmul.msk.f32.gmra.mxu2 %vm332_vm0, %v6311_v53  ;;  %v6369_v24 = vadd.f32 %v1473_v8, %v1400_v43  ;;  %v8374_v8 = vld [vmem:[#allocation50_spill] sm:$0xff]  ;;  %v6409_v43 = vld [vmem:[#allocation2 + $0x210] sm:$0xff] }
 0x1ec   : > { %v1482_v38 = vpop.f32.mrf.mxu0  ;;  %4422 = vmatmul.msk.f32.gmra.mxu3 %vm332_vm0, %v8372_v26 }
 0x1ee   : > { %v1167_v29 = vpop.f32.mrf.mxu2 }
 0x1ef   : > { %4456 = vmatmul.msk.f32.gmra.mxu0 %vm332_vm0, %v8373_v27  ;;  %v1325_v48 = vpop.f32.mrf.mxu3  ;;  %v1243_v45 = vadd.f32 %v1167_v29, %v959_v4 }
 0x1f0   : > { %4488 = vmatmul.msk.f32.gmra.mxu1 %vm332_vm0, %v6377_v1 }
 0x1f1   : > { %v1401_v20 = vadd.f32 %v1325_v48, %v1243_v45  ;;  %v6423_v48 = vld [vmem:[#allocation2 + $0x207] sm:$0xff] }
 0x1f3   : > { %4391 = vmatmul.msk.f32.gmra.mxu2 %vm332_vm0, %v6325_v56  ;;  %v6383_v57 = vadd.f32 %v1476_v16, %v1401_v20  ;;  %v8376_v16 = vld [vmem:[#allocation53_spill] sm:$0xff] }
 0x1f4   : > { %v1485_v21 = vpop.f32.mrf.mxu0  ;;  %4423 = vmatmul.msk.f32.gmra.mxu3 %vm332_vm0, %v8374_v8  ;;  %v6425_v20 = vld [vmem:[#allocation2 + $0x211] sm:$0xff]  ;;  %v971_v8 = vadd.f32 %v6173_v30, %v8378_v5  ;;  %v974_v30 = vadd.f32 %v6195_v17, %v6177_v46 }
 0x1f6   : > { %v1170_v47 = vpop.f32.mrf.mxu2 }
 0x1f7   : > { %4457 = vmatmul.msk.f32.gmra.mxu0 %vm332_vm0, %v8375_v12  ;;  %v1328_v23 = vpop.f32.mrf.mxu3  ;;  %v1244_v19 = vadd.f32 %v1170_v47, %v962_v35  ;;  %v8379_v35 = vld [vmem:[#allocation58_spill] sm:$0xff] }
 0x1f8   : > { %4489 = vmatmul.msk.f32.gmra.mxu1 %vm332_vm0, %v6391_v11 }
 0x1f9   : > { %v1402_v61 = vadd.f32 %v1328_v23, %v1244_v19  ;;  %v6439_v19 = vld [vmem:[#allocation2 + $0x20f] sm:$0xff] }
 0x1fb   : > { %4392 = vmatmul.msk.f32.gmra.mxu2 %vm332_vm0, %v6344_v28  ;;  %v6399_v18 = vadd.f32 %v1479_v22, %v1402_v61  ;;  %v8377_v22 = vld [vmem:[#allocation56_spill] sm:$0xff] }
 0x1fc   : > { %v1488_v42 = vpop.f32.mrf.mxu0  ;;  %4424 = vmatmul.msk.f32.gmra.mxu3 %vm332_vm0, %v8376_v16 }
 0x1fe   : > { %v1173_v9 = vpop.f32.mrf.mxu2 }
 0x1ff   : > { %4458 = vmatmul.msk.f32.gmra.mxu0 %vm332_vm0, %v6393_v60  ;;  %v1331_v33 = vpop.f32.mrf.mxu3  ;;  %v1245_v15 = vadd.f32 %v1173_v9, %v965_v41  ;;  %v8380_v41 = vld [vmem:[#allocation60_spill] sm:$0xff] }
 0x200   : > { %4490 = vmatmul.msk.f32.gmra.mxu1 %vm332_vm0, %v6407_v50 }
 0x201   : > { %v1403_v37 = vadd.f32 %v1331_v33, %v1245_v15 }
 0x203   : > { %4393 = vmatmul.msk.f32.gmra.mxu2 %vm332_vm0, %v6363_v2  ;;  %v6415_v26 = vadd.f32 %v1482_v38, %v1403_v37 }
 0x204   : > { %v1491_v39 = vpop.f32.mrf.mxu0  ;;  %4425 = vmatmul.msk.f32.gmra.mxu3 %vm332_vm0, %v8377_v22 }
 0x206   : > { %v1176_v4 = vpop.f32.mrf.mxu2 }
 0x207   : > { %4459 = vmatmul.msk.f32.gmra.mxu0 %vm332_vm0, %v6409_v43  ;;  %v1334_v27 = vpop.f32.mrf.mxu3  ;;  %v1246_v29 = vadd.f32 %v1176_v4, %v968_v63  ;;  %v4964_v63 = vld [vmem:[#allocation2 + $0x48] sm:$0xff] }
 0x208   : > { %4491 = vmatmul.msk.f32.gmra.mxu1 %vm332_vm0, %v6425_v20 }
 0x209   : > { %v1404_v45 = vadd.f32 %v1334_v27, %v1246_v29  ;;  %v8382_v27 = vld [vmem:[#allocation57_spill] sm:$0xff] }
 0x20b   : > { %4394 = vmatmul.msk.f32.gmra.mxu2 %vm332_vm0, %v6377_v1  ;;  %v6431_v58 = vadd.f32 %v1485_v21, %v1404_v45 }
 0x20c   : > { %v1494_v38 = vpop.f32.mrf.mxu0  ;;  %4426 = vmatmul.msk.f32.gmra.mxu3 %vm332_vm0, %v6423_v48 }
 0x20e   : > { %v1179_v12 = vpop.f32.mrf.mxu2 }
 0x20f   : > { %4556 = vmatmul.msk.f32.vlgmr.msra.gmra.mxu0 %vm332_vm0, %v8379_v35  ;;  %v1337_v47 = vpop.f32.mrf.mxu3  ;;  %v1247_v23 = vadd.f32 %v1179_v12, %v971_v8  ;;  %v4965_v8 = vld [vmem:[#allocation2 + $0x4f] sm:$0xff] }
 0x210   : > { %v4966_v35 = vld [vmem:[#allocation2 + $0x50] sm:$0xff] }
 0x211   : > { %v1405_v61 = vadd.f32 %v1337_v47, %v1247_v23  ;;  %v8383_v47 = vld [vmem:[#allocation64_spill] sm:$0xff] }
 0x213   : > { %4395 = vmatmul.msk.f32.gmra.mxu2 %vm332_vm0, %v6391_v11  ;;  %v6445_v21 = vadd.f32 %v1488_v42, %v1405_v61  ;;  %v8381_v42 = vld [vmem:[#allocation62_spill] sm:$0xff]  ;;  %v8384_v61 = vld [vmem:[#allocation59_spill] sm:$0xff] }
 0x214   : > { %v1497_v16 = vpop.f32.mrf.mxu0  ;;  %4427 = vmatmul.msk.f32.gmra.mxu3 %vm332_vm0, %v6439_v19 }
 0x216   : > { %v1182_v9 = vpop.f32.mrf.mxu2 }
 0x217   : > { %4557 = vmatmul.msk.f32.gmra.mxu0 %vm332_vm0, %v8380_v41  ;;  %v1340_v33 = vpop.f32.mrf.mxu3  ;;  %v1248_v15 = vadd.f32 %v1182_v9, %v974_v30 }
 0x219   : > { %v1406_v37 = vadd.f32 %v1340_v33, %v1248_v15  ;;  %v4967_v33 = vld [vmem:[#allocation2 + $0x67] sm:$0xff] }
 0x21a   : > { %v4968_v15 = vld [vmem:[#allocation2 + $0x68] sm:$0xff] }
 0x21b   : > { %4492 = vmatmul.msk.f32.vlgmr.msra.gmra.mxu2 %vm332_vm0, %v4963_v40  ;;  %v6453_v4 = vadd.f32 %v1491_v39, %v1406_v37  ;;  %v8385_v40 = vld [vmem:[#allocation66_spill] sm:$0xff] }
 0x21c   : > { %v1500_v22 = vpop.f32.mrf.mxu0  ;;  %4524 = vmatmul.msk.f32.vlgmr.msra.gmra.mxu3 %vm332_vm0, %v4964_v63 }
 0x21e   : > { %v1185_v17 = vpop.f32.mrf.mxu2 }
 0x21f   : > { %4558 = vmatmul.msk.f32.gmra.mxu0 %vm332_vm0, %v8381_v42  ;;  %v1343_v46 = vpop.f32.mrf.mxu3  ;;  %v1249_v29 = vadd.f32 %v1185_v17, %v8382_v27  ;;  %v6471_v42 = vpop.f32.mrf.mxu1  ;;  %v8386_v17 = vld [vmem:[#allocation61_spill] sm:$0xff] }
 0x221   : > { %v1407_v45 = vadd.f32 %v1343_v46, %v1249_v29 }
 0x223   : > { %4493 = vmatmul.msk.f32.gmra.mxu2 %vm332_vm0, %v4965_v8  ;;  %v6460_v12 = vadd.f32 %v1494_v38, %v1407_v45  ;;  %v4969_v45 = vld [vmem:[#allocation2 + $0x6f] sm:$0xff] }
 0x224   : > { %v1503_v5 = vpop.f32.mrf.mxu0  ;;  %4525 = vmatmul.msk.f32.gmra.mxu3 %vm332_vm0, %v4966_v35  ;;  %v4970_v8 = vld [vmem:[#allocation2 + $0x70] sm:$0xff] }
 0x226   : > { %v1188_v39 = vpop.f32.mrf.mxu2 }
 0x227   : > { %4559 = vmatmul.msk.f32.gmra.mxu0 %vm332_vm0, %v8383_v47  ;;  %v1346_v23 = vpop.f32.mrf.mxu3  ;;  %v1250_v30 = vadd.f32 %v1188_v39, %v8384_v61 }
 0x229   : > { %v1408_v41 = vadd.f32 %v1346_v23, %v1250_v30  ;;  %v8388_v23 = vld [vmem:[#allocation63_spill] sm:$0xff]  ;;  %v6481_v30 = vpop.f32.mrf.mxu1 }
 0x22b   : > { %4494 = vmatmul.msk.f32.gmra.mxu2 %vm332_vm0, %v4967_v33  ;;  %v6467_v37 = vadd.f32 %v1497_v16, %v1408_v41  ;;  %v8387_v16 = vld [vmem:[#allocation68_spill] sm:$0xff] }
 0x22c   : > { %v1506_v9 = vpop.f32.mrf.mxu0  ;;  %4526 = vmatmul.msk.f32.gmra.mxu3 %vm332_vm0, %v4968_v15  ;;  %v4971_v15 = vld [vmem:[#allocation2 + $0x87] sm:$0xff] }
 0x22e   : > { %v1191_v38 = vpop.f32.mrf.mxu2 }
 0x22f   : > { %4560 = vmatmul.msk.f32.gmra.mxu0 %vm332_vm0, %v8385_v40  ;;  %v1349_v63 = vpop.f32.mrf.mxu3  ;;  %v1251_v46 = vadd.f32 %v1191_v38, %v8386_v17  ;;  %v4972_v40 = vld [vmem:[#allocation2 + $0x88] sm:$0xff] }
 0x231   : > { %v1409_v27 = vadd.f32 %v1349_v63, %v1251_v46  ;;  %v8391_v46 = vld [vmem:[#allocation65_spill] sm:$0xff] }
 0x233   : > { %4495 = vmatmul.msk.f32.gmra.mxu2 %vm332_vm0, %v4969_v45  ;;  %v6476_v35 = vadd.f32 %v1500_v22, %v1409_v27  ;;  %v8390_v22 = vld [vmem:[#allocation70_spill] sm:$0xff] }
 0x234   : > { %v1509_v29 = vpop.f32.mrf.mxu0  ;;  %4527 = vmatmul.msk.f32.gmra.mxu3 %vm332_vm0, %v4970_v8 }
 0x236   : > { %v1194_v47 = vpop.f32.mrf.mxu2 }
 0x237   : > { %4561 = vmatmul.msk.f32.gmra.mxu0 %vm332_vm0, %v8387_v16  ;;  %v1352_v39 = vpop.f32.mrf.mxu3  ;;  %v1252_v61 = vadd.f32 %v1194_v47, %v8388_v23  ;;  %v6490_v16 = vpop.f32.mrf.mxu1  ;;  %v4973_v47 = vld [vmem:[#allocation2 + $0x8f] sm:$0xff] }
 0x239   : > { %v1410_v41 = vadd.f32 %v1352_v39, %v1252_v61  ;;  %v4974_v39 = vld [vmem:[#allocation2 + $0x90] sm:$0xff] }
 0x23b   : > { %4496 = vmatmul.msk.f32.gmra.mxu2 %vm332_vm0, %v4971_v15  ;;  %v6485_v38 = vadd.f32 %v1503_v5, %v1410_v41  ;;  %v8393_v5 = vld [vmem:[#allocation72_spill] sm:$0xff]  ;;  %v8394_v15 = vld [vmem:[#allocation67_spill] sm:$0xff] }
 0x23c   : > { %v1512_v33 = vpop.f32.mrf.mxu0  ;;  %4528 = vmatmul.msk.f32.gmra.mxu3 %vm332_vm0, %v4972_v40 }
 0x23d   : > { %8389 = vst [vmem:[#allocation49_spill] sm:$0xff] %v6485_v38 }
 0x23e   : > { %v1197_v63 = vpop.f32.mrf.mxu2 }
 0x23f   : > { %4562 = vmatmul.msk.f32.gmra.mxu0 %vm332_vm0, %v8390_v22  ;;  %v1355_v17 = vpop.f32.mrf.mxu3  ;;  %v1253_v27 = vadd.f32 %v1197_v63, %v8391_v46  ;;  %v4976_v46 = vld [vmem:[#allocation2 + $0xa8] sm:$0xff] }
 0x241   : > { %v1411_v45 = vadd.f32 %v1355_v17, %v1253_v27  ;;  %v4975_v17 = vld [vmem:[#allocation2 + $0xa7] sm:$0xff] }
 0x243   : > { %4497 = vmatmul.msk.f32.gmra.mxu2 %vm332_vm0, %v4973_v47  ;;  %v6494_v23 = vadd.f32 %v1506_v9, %v1411_v45  ;;  %v6503_v47 = vpop.f32.mrf.mxu1  ;;  %v8396_v9 = vld [vmem:[#allocation74_spill] sm:$0xff] }
 0x244   : > { %v1515_v8 = vpop.f32.mrf.mxu0  ;;  %4529 = vmatmul.msk.f32.gmra.mxu3 %vm332_vm0, %v4974_v39 }
 0x245   : > { %8392 = vst [vmem:[#allocation48_spill] sm:$0xff] %v6494_v23 }
 0x246   : > { %v1200_v61 = vpop.f32.mrf.mxu2 }
 0x247   : > { %4563 = vmatmul.msk.f32.gmra.mxu0 %vm332_vm0, %v8393_v5  ;;  %v1358_v41 = vpop.f32.mrf.mxu3  ;;  %v1254_v40 = vadd.f32 %v1200_v61, %v8394_v15  ;;  %v8397_v5 = vld [vmem:[#allocation69_spill] sm:$0xff]  ;;  %v8398_v15 = vld [vmem:[#allocation43_spill] sm:$0xff] }
 0x249   : > { %v1412_v22 = vadd.f32 %v1358_v41, %v1254_v40  ;;  %v4977_v40 = vld [vmem:[#allocation2 + $0xb0] sm:$0xff] }
 0x24b   : > { %4498 = vmatmul.msk.f32.gmra.mxu2 %vm332_vm0, %v4975_v17  ;;  %v6501_v27 = vadd.f32 %v1509_v29, %v1412_v22 }
 0x24c   : > { %v1518_v63 = vpop.f32.mrf.mxu0  ;;  %4530 = vmatmul.msk.f32.gmra.mxu3 %vm332_vm0, %v4976_v46  ;;  %v6515_v46 = vpop.f32.mrf.mxu1 }
 0x24d   : > { %8395 = vst [vmem:[#allocation52_spill] sm:$0xff] %v6501_v27 }
 0x24e   : > { %v1203_v45 = vpop.f32.mrf.mxu2 }
 0x24f   : > { %4564 = vmatmul.msk.f32.gmra.mxu0 %vm332_vm0, %v8396_v9  ;;  %v1361_v39 = vpop.f32.mrf.mxu3  ;;  %v1255_v25 = vadd.f32 %v1203_v45, %v8397_v5  ;;  %v8400_v9 = vld [vmem:[#allocation71_spill] sm:$0xff] }
 0x250   : > { %v4978_v5 = vld [vmem:[#allocation2 + $0xc8] sm:$0xff] }
 0x251   : > { %v1413_v61 = vadd.f32 %v1361_v39, %v1255_v25  ;;  %v8401_v39 = vld [vmem:[#allocation46_spill] sm:$0xff] }
 0x253   : > { %4499 = vmatmul.msk.f32.gmra.mxu2 %vm332_vm0, %v8398_v15  ;;  %v6511_v17 = vadd.f32 %v1512_v33, %v1413_v61  ;;  %v8403_v33 = vld [vmem:[#allocation77_spill] sm:$0xff] }
 0x254   : > { %v1521_v41 = vpop.f32.mrf.mxu0  ;;  %4531 = vmatmul.msk.f32.gmra.mxu3 %vm332_vm0, %v4977_v40  ;;  %v8404_v40 = vld [vmem:[#allocation73_spill] sm:$0xff]  ;;  %v6526_v27 = vpop.f32.mrf.mxu1 }
 0x255   : > { %8399 = vst [vmem:[#allocation50_spill] sm:$0xff] %v6511_v17 }
 0x256   : > { %v1206_v29 = vpop.f32.mrf.mxu2 }
 0x257   : > { %4565 = vmatmul.msk.f32.gmra.mxu0 %vm332_vm0, %v6127_v3  ;;  %v1364_v22 = vpop.f32.mrf.mxu3  ;;  %v1256_v52 = vadd.f32 %v1206_v29, %v8400_v9  ;;  %v4980_v9 = vld [vmem:[#allocation2 + $0xd0] sm:$0xff] }
 0x259   : > { %v1414_v45 = vadd.f32 %v1364_v22, %v1256_v52  ;;  %v4979_v22 = vld [vmem:[#allocation2 + $0xcf] sm:$0xff] }
 0x25b   : > { %4500 = vmatmul.msk.f32.gmra.mxu2 %vm332_vm0, %v8401_v39  ;;  %v6521_v15 = vadd.f32 %v1515_v8, %v1414_v45  ;;  %v8406_v8 = vld [vmem:[#allocation79_spill] sm:$0xff] }
 0x25c   : > { %v1524_v25 = vpop.f32.mrf.mxu0  ;;  %4532 = vmatmul.msk.f32.gmra.mxu3 %vm332_vm0, %v4978_v5  ;;  %v6535_v23 = vpop.f32.mrf.mxu1 }
 0x25d   : > { %8402 = vst [vmem:[#allocation55_spill] sm:$0xff] %v6521_v15 }
 0x25e   : > { %v1209_v3 = vpop.f32.mrf.mxu2 }
 0x25f   : > { %4566 = vmatmul.msk.f32.gmra.mxu0 %vm332_vm0, %v8403_v33  ;;  %v1367_v61 = vpop.f32.mrf.mxu3  ;;  %v1257_v17 = vadd.f32 %v1209_v3, %v8404_v40  ;;  %v8407_v33 = vld [vmem:[#allocation75_spill] sm:$0xff] }
 0x261   : > { %v1415_v29 = vadd.f32 %v1367_v61, %v1257_v17  ;;  %v8408_v17 = vld [vmem:[#allocation51_spill] sm:$0xff] }
 0x262   : > { %v4981_v61 = vld [vmem:[#allocation2 + $0xe8] sm:$0xff] }
 0x263   : > { %4501 = vmatmul.msk.f32.gmra.mxu2 %vm332_vm0, %v4979_v22  ;;  %v6530_v39 = vadd.f32 %v1518_v63, %v1415_v29  ;;  %v8410_v63 = vld [vmem:[#allocation82_spill] sm:$0xff] }
 0x264   : > { %v1527_v52 = vpop.f32.mrf.mxu0  ;;  %4533 = vmatmul.msk.f32.gmra.mxu3 %vm332_vm0, %v4980_v9 }
 0x265   : > { %8405 = vst [vmem:[#allocation53_spill] sm:$0xff] %v6530_v39 }
 0x266   : > { %v1212_v45 = vpop.f32.mrf.mxu2 }
 0x267   : > { %4567 = vmatmul.msk.f32.gmra.mxu0 %vm332_vm0, %v8406_v8  ;;  %v1370_v5 = vpop.f32.mrf.mxu3  ;;  %v1258_v15 = vadd.f32 %v1212_v45, %v8407_v33  ;;  %v8411_v8 = vld [vmem:[#allocation76_spill] sm:$0xff] }
 0x268   : > { %v4982_v33 = vld [vmem:[#allocation2 + $0xf0] sm:$0xff] }
 0x269   : > { %v1416_v3 = vadd.f32 %v1370_v5, %v1258_v15  ;;  %v8412_v5 = vld [vmem:[#allocation54_spill] sm:$0xff] }
 0x26b   : > { %4502 = vmatmul.msk.f32.gmra.mxu2 %vm332_vm0, %v8408_v17  ;;  %v6540_v22 = vadd.f32 %v1521_v41, %v1416_v3  ;;  %v8414_v41 = vld [vmem:[#allocation84_spill] sm:$0xff] }
 0x26c   : > { %v1530_v40 = vpop.f32.mrf.mxu0  ;;  %4534 = vmatmul.msk.f32.gmra.mxu3 %vm332_vm0, %v4981_v61  ;;  %v6550_v61 = vpop.f32.mrf.mxu1 }
 0x26d   : > { %8409 = vst [vmem:[#allocation56_spill] sm:$0xff] %v6540_v22  ;;  %v8415_v22 = vld [vmem:[#allocation78_spill] sm:$0xff] }
 0x26e   : > { %v1215_v29 = vpop.f32.mrf.mxu2 }
 0x26f   : > { %4568 = vmatmul.msk.f32.gmra.mxu0 %vm332_vm0, %v8410_v63  ;;  %v1373_v9 = vpop.f32.mrf.mxu3  ;;  %v1259_v39 = vadd.f32 %v1215_v29, %v8411_v8 }
 0x271   : > { %v1417_v45 = vadd.f32 %v1373_v9, %v1259_v39  ;;  %v2429_v39 = vld [vmem:[#allocation9 + $0x8] sm:$0xff] }
 0x272   : > { %v2433_v9 = vld [vmem:[#allocation9 + $0x28] sm:$0xff]  ;;  %2753 = vmatpush.msrb.mxu2 %v2429_v39 }
 0x273   : > { %4503 = vmatmul.msk.f32.gmra.mxu2 %vm332_vm0, %v8412_v5  ;;  %v6548_v17 = vadd.f32 %v1524_v25, %v1417_v45  ;;  %2962 = vmatpush.msrb.mxu3 %v2433_v9  ;;  %v4983_v5 = vld [vmem:[#allocation2 + $0x107] sm:$0xff] }
 0x274   : > { %v1533_v15 = vpop.f32.mrf.mxu0  ;;  %4535 = vmatmul.msk.f32.gmra.mxu3 %vm332_vm0, %v4982_v33  ;;  %v4984_v25 = vld [vmem:[#allocation2 + $0x108] sm:$0xff] }
 0x275   : > { %8413 = vst [vmem:[#allocation80_spill] sm:$0xff] %v6548_v17  ;;  %v2356_v9 = vld [vmem:[#allocation3 + $0x8] sm:$0xff] }
 0x276   : > { %v1218_v3 = vpop.f32.mrf.mxu2  ;;  %v4985_v17 = vld [vmem:[#allocation2 + $0x10f] sm:$0xff]  ;;  %4588 = vmatmul.msk.f32.vlgmr.msra.gmra.mxu1 %vm332_vm0, %v2356_v9  ;;  %v3097_v9 = vld [vmem:[#allocation9 + $0x48] sm:$0xff] }
 0x277   : > { %4569 = vmatmul.msk.f32.gmra.mxu0 %vm332_vm0, %v8414_v41  ;;  %v1376_v63 = vpop.f32.mrf.mxu3  ;;  %v1260_v38 = vadd.f32 %v1218_v3, %v8415_v22  ;;  %v6561_v22 = vpop.f32.mrf.mxu1  ;;  %3271 = vmatpush.msrb.mxu1 %v3097_v9 }
 0x279   : > { %v1418_v29 = vadd.f32 %v1376_v63, %v1260_v38  ;;  %v8417_v38 = vld [vmem:[#allocation81_spill] sm:$0xff] }
 0x27b   : > { %4504 = vmatmul.msk.f32.gmra.mxu2 %vm332_vm0, %v4983_v5  ;;  %v6557_v45 = vadd.f32 %v1527_v52, %v1418_v29  ;;  %v4986_v5 = vld [vmem:[#allocation2 + $0x110] sm:$0xff] }
 0x27c   : > { %v1536_v8 = vpop.f32.mrf.mxu0  ;;  %4536 = vmatmul.msk.f32.gmra.mxu3 %vm332_vm0, %v4984_v25  ;;  %v8419_v25 = vld [vmem:[#allocation83_spill] sm:$0xff] }
 0x27d   : > { %8416 = vst [vmem:[#allocation58_spill] sm:$0xff] %v6557_v45  ;;  %v2357_v45 = vld [vmem:[#allocation3 + $0x10] sm:$0xff] }
 0x27e   : > { %v1221_v33 = vpop.f32.mrf.mxu2  ;;  %4589 = vmatmul.msk.f32.gmra.mxu1 %vm332_vm0, %v2357_v45 }
 0x27f   : > { %4570 = vmatmul.msk.f32.gmra.mxu0 %vm332_vm0, %v6203_v54  ;;  %v1379_v41 = vpop.f32.mrf.mxu3  ;;  %v1261_v3 = vadd.f32 %v1221_v33, %v8417_v38 }
 0x281   : > { %v1419_v63 = vadd.f32 %v1379_v41, %v1261_v3  ;;  %v6572_v41 = vpop.f32.mrf.mxu1 }
 0x283   : > { %4505 = vmatmul.msk.f32.gmra.mxu2 %vm332_vm0, %v4985_v17  ;;  %v6566_v52 = vadd.f32 %v1530_v40, %v1419_v63  ;;  %v4987_v17 = vld [vmem:[#allocation2 + $0x127] sm:$0xff] }
 0x284   : > { %v1539_v39 = vpop.f32.mrf.mxu0  ;;  %4537 = vmatmul.msk.f32.gmra.mxu3 %vm332_vm0, %v4986_v5  ;;  %v4988_v5 = vld [vmem:[#allocation2 + $0x128] sm:$0xff] }
 0x285   : > { %8418 = vst [vmem:[#allocation60_spill] sm:$0xff] %v6566_v52  ;;  %v3095_v63 = vld [vmem:[#allocation9 + $0x38] sm:$0xff] }
 0x286   : > { %v1224_v54 = vpop.f32.mrf.mxu2  ;;  %3120 = vmatpush.msrb.mxu0 %v3095_v63  ;;  %v8422_v63 = vld [vmem:[#allocation86_spill] sm:$0xff] }
 0x287   : > { %4571 = vmatmul.msk.f32.gmra.mxu0 %vm332_vm0, %v6215_v10  ;;  %v1382_v29 = vpop.f32.mrf.mxu3  ;;  %v1262_v33 = vadd.f32 %v1224_v54, %v8419_v25 }
 0x289   : > { %v1420_v38 = vadd.f32 %v1382_v29, %v1262_v33  ;;  %v8420_v29 = vld [vmem:[#allocation85_spill] sm:$0xff]  ;;  %v6582_v52 = vpop.f32.mrf.mxu1 }
 0x28b   : > { %4506 = vmatmul.msk.f32.gmra.mxu2 %vm332_vm0, %v4987_v17  ;;  %v6576_v40 = vadd.f32 %v1533_v15, %v1420_v38  ;;  %v4990_v15 = vld [vmem:[#allocation2 + $0x130] sm:$0xff] }
 0x28c   : > { %v2057_v3 = vpop.f32.mrf.mxu0  ;;  %4538 = vmatmul.msk.f32.gmra.mxu3 %vm332_vm0, %v4988_v5  ;;  %v4989_v5 = vld [vmem:[#allocation2 + $0x12f] sm:$0xff] }
 0x28e   : > { %v1227_v10 = vpop.f32.mrf.mxu2 }
 0x28f   : > { %4572 = vmatmul.msk.f32.gmra.mxu0 %vm332_vm0, %v6227_v36  ;;  %v1385_v54 = vpop.f32.mrf.mxu3  ;;  %v1263_v25 = vadd.f32 %v1227_v10, %v8420_v29  ;;  %v4991_v29 = vld [vmem:[#allocation2 + $0x147] sm:$0xff] }
 0x291   : > { %v1421_v33 = vadd.f32 %v1385_v54, %v1263_v25  ;;  %v4992_v25 = vld [vmem:[#allocation2 + $0x148] sm:$0xff] }
 0x293   : > { %4507 = vmatmul.msk.f32.gmra.mxu2 %vm332_vm0, %v4989_v5  ;;  %v6586_v38 = vadd.f32 %v1536_v8, %v1421_v33 }
 0x294   : > { %v2060_v17 = vpop.f32.mrf.mxu0  ;;  %4539 = vmatmul.msk.f32.gmra.mxu3 %vm332_vm0, %v4990_v15  ;;  %v6595_v15 = vpop.f32.mrf.mxu1 }
 0x295   : > { %8421 = vst [vmem:[#allocation62_spill] sm:$0xff] %v6586_v38 }
 0x296   : > { %v1230_v36 = vpop.f32.mrf.mxu2 }
 0x297   : > { %4573 = vmatmul.msk.f32.gmra.mxu0 %vm332_vm0, %v6241_v14  ;;  %v1388_v45 = vpop.f32.mrf.mxu3  ;;  %v1264_v9 = vadd.f32 %v1230_v36, %v8422_v63 }
 0x299   : > { %v1422_v10 = vadd.f32 %v1388_v45, %v1264_v9  ;;  %v6603_v45 = vld [vmem:[%s8157_s2] ss:$0 sm:$0xff] }
 0x29b   : > { %4508 = vmatmul.msk.f32.gmra.mxu2 %vm332_vm0, %v4991_v29  ;;  %v6593_v5 = vadd.f32 %v1539_v39, %v1422_v10  ;;  %v6608_v39 = vld [vmem:[%s8158_s3] ss:$0 sm:$0xff]  ;;  %v4993_v10 = vld [vmem:[#allocation2 + $0x14f] sm:$0xff] }
 0x29c   : > { %v2063_v54 = vpop.f32.mrf.mxu0  ;;  %4540 = vmatmul.msk.f32.gmra.mxu3 %vm332_vm0, %v4992_v25 }
 0x29d   : > { %8423 = vst [vmem:[#allocation57_spill] sm:$0xff] %v6593_v5 }
 0x29e   : > { %v1755_v14 = vpop.f32.mrf.mxu2 }
 0x29f   : > { %4574 = vmatmul.msk.f32.gmra.mxu0 %vm332_vm0, %v6255_v44  ;;  %v1906_v8 = vpop.f32.mrf.mxu3  ;;  %v1851_v33 = vadd.f32 %v1755_v14, %v6237_v31  ;;  %v4994_v44 = vld [vmem:[#allocation2 + $0x150] sm:$0xff]  ;;  %v6615_v14 = vpop.f32.mrf.mxu1 }
 0x2a1   : > { %v2002_v36 = vadd.f32 %v1906_v8, %v1851_v33 }
 0x2a3   : > { %v2153_v9 = vadd.f32 %v2057_v3, %v2002_v36  ;;  %4509 = vmatmul.msk.f32.gmra.mxu2 %vm332_vm0, %v4993_v10 }
 0x2a4   : > { %v2066_v63 = vpop.f32.mrf.mxu0  ;;  %4541 = vmatmul.msk.f32.gmra.mxu3 %vm332_vm0, %v4994_v44  ;;  %v4995_v44 = vld [vmem:[#allocation2 + $0x167] sm:$0xff] }
 0x2a5   : > { %v2188_v31 = vmul.f32 %v6603_v45, %v2153_v9  ;;  %v4996_v9 = vld [vmem:[#allocation2 + $0x168] sm:$0xff] }
 0x2a6   : > { %v1758_v29 = vpop.f32.mrf.mxu2 }
 0x2a7   : > { %4575 = vmatmul.msk.f32.gmra.mxu0 %vm332_vm0, %v6269_v32  ;;  %v1909_v25 = vpop.f32.mrf.mxu3  ;;  %v2223_v3 = vadd.f32 %v6608_v39, %v2188_v31  ;;  %v1852_v8 = vadd.f32 %v1758_v29, %v6251_v51 }
 0x2a9   : > { %v2255_v33 = vmax.f32 %v2223_v3, 0.0  ;;  %v2003_v36 = vadd.f32 %v1909_v25, %v1852_v8  ;;  %v6627_v25 = vpop.f32.mrf.mxu1 }
 0x2ab   : > { %2288 = vst.msk [vmem:[#allocation3 + $0x28] sm:$0xff] %vm332_vm0, %v2255_v33  ;;  %v2154_v10 = vadd.f32 %v2060_v17, %v2003_v36  ;;  %4510 = vmatmul.msk.f32.gmra.mxu2 %vm332_vm0, %v4995_v44  ;;  %v4997_v44 = vld [vmem:[#allocation2 + $0x16f] sm:$0xff] }
 0x2ac   : > { %v2069_v5 = vpop.f32.mrf.mxu0  ;;  %4542 = vmatmul.msk.f32.gmra.mxu3 %vm332_vm0, %v4996_v9 }
 0x2ad   : > { %v2189_v32 = vmul.f32 %v6603_v45, %v2154_v10  ;;  %v4998_v10 = vld [vmem:[#allocation2 + $0x170] sm:$0xff] }
 0x2ae   : > { %v1761_v31 = vpop.f32.mrf.mxu2 }
 0x2af   : > { %4576 = vmatmul.msk.f32.gmra.mxu0 %vm332_vm0, %v6283_v6  ;;  %v1912_v38 = vpop.f32.mrf.mxu3  ;;  %v2224_v51 = vadd.f32 %v6608_v39, %v2189_v32  ;;  %v1853_v29 = vadd.f32 %v1761_v31, %v6265_v0 }
 0x2b1   : > { %v2256_v17 = vmax.f32 %v2224_v51, 0.0  ;;  %v2004_v3 = vadd.f32 %v1912_v38, %v1853_v29 }
 0x2b2   : > { %v2358_v8 = vld [vmem:[#allocation3 + $0x28] sm:$0xff] }
 0x2b3   : > { %2289 = vst.msk [vmem:[#allocation3 + $0x30] sm:$0xff] %vm332_vm0, %v2256_v17  ;;  %v2155_v36 = vadd.f32 %v2063_v54, %v2004_v3  ;;  %4511 = vmatmul.msk.f32.gmra.mxu2 %vm332_vm0, %v4997_v44  ;;  %4590 = vmatmul.msk.f32.gmra.mxu1 %vm332_vm0, %v2358_v8  ;;  %v6638_v17 = vpop.f32.mrf.mxu1  ;;  %v4999_v8 = vld [vmem:[#allocation2 + $0x187] sm:$0xff] }
 0x2b4   : > { %v2072_v33 = vpop.f32.mrf.mxu0  ;;  %4543 = vmatmul.msk.f32.gmra.mxu3 %vm332_vm0, %v4998_v10 }
 0x2b5   : > { %v2190_v6 = vmul.f32 %v6603_v45, %v2155_v36  ;;  %v5000_v36 = vld [vmem:[#allocation2 + $0x188] sm:$0xff] }
 0x2b6   : > { %v1764_v0 = vpop.f32.mrf.mxu2 }
 0x2b7   : > { %4577 = vmatmul.msk.f32.gmra.mxu0 %vm332_vm0, %v6297_v59  ;;  %v1915_v38 = vpop.f32.mrf.mxu3  ;;  %v2225_v9 = vadd.f32 %v6608_v39, %v2190_v6  ;;  %v1854_v32 = vadd.f32 %v1764_v0, %v6279_v49 }
 0x2b9   : > { %v2257_v54 = vmax.f32 %v2225_v9, 0.0  ;;  %v2005_v31 = vadd.f32 %v1915_v38, %v1854_v32 }
 0x2ba   : > { %v2359_v51 = vld [vmem:[#allocation3 + $0x30] sm:$0xff] }
 0x2bb   : > { %2290 = vst.msk [vmem:[#allocation3 + $0x48] sm:$0xff] %vm332_vm0, %v2257_v54  ;;  %v2156_v3 = vadd.f32 %v2066_v63, %v2005_v31  ;;  %4512 = vmatmul.msk.f32.gmra.mxu2 %vm332_vm0, %v4999_v8  ;;  %4591 = vmatmul.msk.f32.gmra.mxu1 %vm332_vm0, %v2359_v51  ;;  %v5001_v54 = vld [vmem:[#allocation2 + $0x18f] sm:$0xff] }
 0x2bc   : > { %v2075_v29 = vpop.f32.mrf.mxu0  ;;  %4544 = vmatmul.msk.f32.gmra.mxu3 %vm332_vm0, %v5000_v36  ;;  %v5002_v31 = vld [vmem:[#allocation2 + $0x190] sm:$0xff] }
 0x2bd   : > { %v2191_v59 = vmul.f32 %v6603_v45, %v2156_v3 }
 0x2be   : > { %v1767_v49 = vpop.f32.mrf.mxu2 }
 0x2bf   : > { %4578 = vmatmul.msk.f32.gmra.mxu0 %vm332_vm0, %v6311_v53  ;;  %v1918_v44 = vpop.f32.mrf.mxu3  ;;  %v2226_v10 = vadd.f32 %v6608_v39, %v2191_v59  ;;  %v1855_v6 = vadd.f32 %v1767_v49, %v6293_v7  ;;  %v6653_v53 = vpop.f32.mrf.mxu1 }
 0x2c1   : > { %v2258_v63 = vmax.f32 %v2226_v10, 0.0  ;;  %v2006_v0 = vadd.f32 %v1918_v44, %v1855_v6  ;;  %v5003_v6 = vld [vmem:[#allocation2 + $0x1a7] sm:$0xff] }
 0x2c2   : > { %v2360_v38 = vld [vmem:[#allocation3 + $0x48] sm:$0xff] }
 0x2c3   : > { %2291 = vst.msk [vmem:[#allocation3 + $0x50] sm:$0xff] %vm332_vm0, %v2258_v63  ;;  %v2157_v32 = vadd.f32 %v2069_v5, %v2006_v0  ;;  %4513 = vmatmul.msk.f32.gmra.mxu2 %vm332_vm0, %v5001_v54  ;;  %4592 = vmatmul.msk.f32.gmra.mxu1 %vm332_vm0, %v2360_v38  ;;  %v5004_v63 = vld [vmem:[#allocation2 + $0x1a8] sm:$0xff] }
 0x2c4   : > { %v2078_v9 = vpop.f32.mrf.mxu0  ;;  %4545 = vmatmul.msk.f32.gmra.mxu3 %vm332_vm0, %v5002_v31 }
 0x2c5   : > { %v2192_v51 = vmul.f32 %v6603_v45, %v2157_v32 }
 0x2c6   : > { %v1770_v7 = vpop.f32.mrf.mxu2 }
 0x2c7   : > { %4579 = vmatmul.msk.f32.gmra.mxu0 %vm332_vm0, %v6325_v56  ;;  %v1921_v3 = vpop.f32.mrf.mxu3  ;;  %v2227_v8 = vadd.f32 %v6608_v39, %v2192_v51  ;;  %v1856_v5 = vadd.f32 %v1770_v7, %v6307_v34  ;;  %v6667_v38 = vpop.f32.mrf.mxu1 }
 0x2c9   : > { %v2259_v36 = vmax.f32 %v2227_v8, 0.0  ;;  %v2007_v59 = vadd.f32 %v1921_v3, %v1856_v5  ;;  %v5005_v8 = vld [vmem:[#allocation2 + $0x1af] sm:$0xff] }
 0x2ca   : > { %v2361_v49 = vld [vmem:[#allocation3 + $0x50] sm:$0xff] }
 0x2cb   : > { %2292 = vst.msk [vmem:[#allocation3 + $0x68] sm:$0xff] %vm332_vm0, %v2259_v36  ;;  %v2158_v10 = vadd.f32 %v2072_v33, %v2007_v59  ;;  %4514 = vmatmul.msk.f32.gmra.mxu2 %vm332_vm0, %v5003_v6  ;;  %4593 = vmatmul.msk.f32.gmra.mxu1 %vm332_vm0, %v2361_v49  ;;  %v5006_v5 = vld [vmem:[#allocation2 + $0x1b0] sm:$0xff] }
 0x2cc   : > { %v2081_v44 = vpop.f32.mrf.mxu0  ;;  %4546 = vmatmul.msk.f32.gmra.mxu3 %vm332_vm0, %v5004_v63 }
 0x2cd   : > { %v2193_v56 = vmul.f32 %v6603_v45, %v2158_v10 }
 0x2ce   : > { %v1773_v34 = vpop.f32.mrf.mxu2 }
 0x2cf   : > { %4580 = vmatmul.msk.f32.gmra.mxu0 %vm332_vm0, %v6344_v28  ;;  %v1924_v0 = vpop.f32.mrf.mxu3  ;;  %v2228_v32 = vadd.f32 %v6608_v39, %v2193_v56  ;;  %v1857_v33 = vadd.f32 %v1773_v34, %v6321_v13 }
 0x2d1   : > { %v2260_v54 = vmax.f32 %v2228_v32, 0.0  ;;  %v2008_v31 = vadd.f32 %v1924_v0, %v1857_v33  ;;  %v5007_v0 = vld [vmem:[#allocation2 + $0x1c7] sm:$0xff] }
 0x2d2   : > { %v2362_v51 = vld [vmem:[#allocation3 + $0x68] sm:$0xff] }
 0x2d3   : > { %2293 = vst.msk [vmem:[#allocation3 + $0x70] sm:$0xff] %vm332_vm0, %v2260_v54  ;;  %v2159_v3 = vadd.f32 %v2075_v29, %v2008_v31  ;;  %4515 = vmatmul.msk.f32.gmra.mxu2 %vm332_vm0, %v5005_v8  ;;  %4594 = vmatmul.msk.f32.gmra.mxu1 %vm332_vm0, %v2362_v51  ;;  %v6680_v29 = vpop.f32.mrf.mxu1  ;;  %v5008_v32 = vld [vmem:[#allocation2 + $0x1c8] sm:$0xff] }
 0x2d4   : > { %v2084_v7 = vpop.f32.mrf.mxu0  ;;  %4547 = vmatmul.msk.f32.gmra.mxu3 %vm332_vm0, %v5006_v5 }
 0x2d5   : > { %v2194_v28 = vmul.f32 %v6603_v45, %v2159_v3 }
 0x2d6   : > { %v1776_v13 = vpop.f32.mrf.mxu2 }
 0x2d7   : > { %4581 = vmatmul.msk.f32.gmra.mxu0 %vm332_vm0, %v6363_v2  ;;  %v1927_v36 = vpop.f32.mrf.mxu3  ;;  %v2229_v59 = vadd.f32 %v6608_v39, %v2194_v28  ;;  %v1858_v49 = vadd.f32 %v1776_v13, %v6335_v55  ;;  %v1701_v55 = vadd.f32 %v6471_v42, %v6350_v62  ;;  %v5009_v42 = vld [vmem:[#allocation2 + $0x1cf] sm:$0xff] }
 0x2d8   : > { %v5010_v13 = vld [vmem:[#allocation2 + $0x1d0] sm:$0xff] }
 0x2d9   : > { %v2261_v10 = vmax.f32 %v2229_v59, 0.0  ;;  %v2009_v6 = vadd.f32 %v1927_v36, %v1858_v49 }
 0x2da   : > { %v2363_v63 = vld [vmem:[#allocation3 + $0x70] sm:$0xff] }
 0x2db   : > { %2294 = vst.msk [vmem:[#allocation3 + $0x88] sm:$0xff] %vm332_vm0, %v2261_v10  ;;  %v2160_v34 = vadd.f32 %v2078_v9, %v2009_v6  ;;  %4516 = vmatmul.msk.f32.gmra.mxu2 %vm332_vm0, %v5007_v0  ;;  %4595 = vmatmul.msk.f32.gmra.mxu1 %vm332_vm0, %v2363_v63  ;;  %v6694_v28 = vpop.f32.mrf.mxu1 }
 0x2dc   : > { %v2087_v56 = vpop.f32.mrf.mxu0  ;;  %4548 = vmatmul.msk.f32.gmra.mxu3 %vm332_vm0, %v5008_v32 }
 0x2dd   : > { %v2195_v2 = vmul.f32 %v6603_v45, %v2160_v34 }
 0x2de   : > { %v1779_v33 = vpop.f32.mrf.mxu2 }
 0x2df   : > { %4582 = vmatmul.msk.f32.gmra.mxu0 %vm332_vm0, %v6377_v1  ;;  %v1930_v54 = vpop.f32.mrf.mxu3  ;;  %v2230_v9 = vadd.f32 %v6608_v39, %v2195_v2  ;;  %v1859_v31 = vadd.f32 %v1779_v33, %v1701_v55  ;;  %v1702_v1 = vadd.f32 %v6481_v30, %v6369_v24  ;;  %v5011_v55 = vld [vmem:[#allocation2 + $0x1e7] sm:$0xff] }
 0x2e0   : > { %v5012_v24 = vld [vmem:[#allocation2 + $0x1e8] sm:$0xff] }
 0x2e1   : > { %v2262_v51 = vmax.f32 %v2230_v9, 0.0  ;;  %v2010_v3 = vadd.f32 %v1930_v54, %v1859_v31 }
 0x2e2   : > { %v2364_v8 = vld [vmem:[#allocation3 + $0x88] sm:$0xff] }
 0x2e3   : > { %2295 = vst.msk [vmem:[#allocation3 + $0x90] sm:$0xff] %vm332_vm0, %v2262_v51  ;;  %v2161_v62 = vadd.f32 %v2081_v44, %v2010_v3  ;;  %4517 = vmatmul.msk.f32.gmra.mxu2 %vm332_vm0, %v5009_v42  ;;  %4596 = vmatmul.msk.f32.gmra.mxu1 %vm332_vm0, %v2364_v8  ;;  %v6714_v30 = vpop.f32.mrf.mxu1 }
 0x2e4   : > { %v6692_v5 = vpop.f32.mrf.mxu0  ;;  %4549 = vmatmul.msk.f32.gmra.mxu3 %vm332_vm0, %v5010_v13  ;;  %v3094_v13 = vld [vmem:[#allocation9 + $0x30] sm:$0xff] }
 0x2e5   : > { %v2196_v36 = vmul.f32 %v6603_v45, %v2161_v62  ;;  %v5014_v62 = vld [vmem:[#allocation2 + $0x1f0] sm:$0xff]  ;;  %3121 = vmatpush.msrb.mxu0 %v3094_v13 }
 0x2e6   : > { %v1782_v59 = vpop.f32.mrf.mxu2 }
 0x2e7   : > { %4583 = vmatmul.msk.f32.gmra.mxu0 %vm332_vm0, %v6391_v11  ;;  %v1933_v49 = vpop.f32.mrf.mxu3  ;;  %v2231_v44 = vadd.f32 %v6608_v39, %v2196_v36  ;;  %v1860_v10 = vadd.f32 %v1782_v59, %v1702_v1  ;;  %v1703_v11 = vadd.f32 %v6490_v16, %v6383_v57  ;;  %v5013_v16 = vld [vmem:[#allocation2 + $0x1ef] sm:$0xff] }
 0x2e9   : > { %v2263_v6 = vmax.f32 %v2231_v44, 0.0  ;;  %v2011_v63 = vadd.f32 %v1933_v49, %v1860_v10 }
 0x2ea   : > { %v2365_v34 = vld [vmem:[#allocation3 + $0x90] sm:$0xff] }
 0x2eb   : > { %2296 = vst.msk [vmem:[#allocation3 + $0xa8] sm:$0xff] %vm332_vm0, %v2263_v6  ;;  %v2162_v32 = vadd.f32 %v2084_v7, %v2011_v63  ;;  %4518 = vmatmul.msk.f32.gmra.mxu2 %vm332_vm0, %v5011_v55  ;;  %4597 = vmatmul.msk.f32.gmra.mxu1 %vm332_vm0, %v2365_v34  ;;  %v598_v6 = vld [vmem:[#allocation2 + $0x229] sm:$0xff] }
 0x2ec   : > { %v6706_v0 = vpop.f32.mrf.mxu0  ;;  %4550 = vmatmul.msk.f32.gmra.mxu3 %vm332_vm0, %v5012_v24 }
 0x2ed   : > { %v2197_v2 = vmul.f32 %v6603_v45, %v2162_v32  ;;  %v1705_v32 = vadd.f32 %v6515_v46, %v6415_v26  ;;  %v1706_v46 = vadd.f32 %v6526_v27, %v6431_v58  ;;  %v3096_v27 = vld [vmem:[#allocation9 + $0x40] sm:$0xff] }
 0x2ee   : > { %v1785_v33 = vpop.f32.mrf.mxu2  ;;  %3272 = vmatpush.msrb.mxu1 %v3096_v27 }
 0x2ef   : > { %4584 = vmatmul.msk.f32.gmra.mxu0 %vm332_vm0, %v6407_v50  ;;  %v1936_v7 = vpop.f32.mrf.mxu3  ;;  %v2232_v54 = vadd.f32 %v6608_v39, %v2197_v2  ;;  %v1861_v9 = vadd.f32 %v1785_v33, %v1703_v11  ;;  %v1704_v50 = vadd.f32 %v6503_v47, %v6399_v18  ;;  %v2428_v18 = vld [vmem:[#allocation9] sm:$0xff] }
 0x2f0   : > { %v2432_v47 = vld [vmem:[#allocation9 + $0x20] sm:$0xff]  ;;  %2754 = vmatpush.msrb.mxu2 %v2428_v18 }
 0x2f1   : > { %v2264_v31 = vmax.f32 %v2232_v54, 0.0  ;;  %v2012_v51 = vadd.f32 %v1936_v7, %v1861_v9  ;;  %2963 = vmatpush.msrb.mxu3 %v2432_v47  ;;  %v599_v9 = vld [vmem:[#allocation2 + $0x231] sm:$0xff] }
 0x2f2   : > { %v2366_v3 = vld [vmem:[#allocation3 + $0xa8] sm:$0xff] }
 0x2f3   : > { %2297 = vst.msk [vmem:[#allocation3 + $0xb0] sm:$0xff] %vm332_vm0, %v2264_v31  ;;  %v2163_v57 = vadd.f32 %v2087_v56, %v2012_v51  ;;  %4519 = vmatmul.msk.f32.gmra.mxu2 %vm332_vm0, %v5013_v16  ;;  %4598 = vmatmul.msk.f32.gmra.mxu1 %vm332_vm0, %v2366_v3  ;;  %v6731_v56 = vpop.f32.mrf.mxu1  ;;  %v526_v16 = vld [vmem:[#allocation2 + $0x227] sm:$0xff] }
 0x2f4   : > { %v6720_v8 = vpop.f32.mrf.mxu0  ;;  %4551 = vmatmul.msk.f32.gmra.mxu3 %vm332_vm0, %v5014_v62  ;;  %v562_v62 = vld [vmem:[#allocation2 + $0x228] sm:$0xff] }
 0x2f5   : > { %v2198_v42 = vmul.f32 %v6603_v45, %v2163_v57 }
 0x2f6   : > { %v1788_v1 = vpop.f32.mrf.mxu2 }
 0x2f7   : > { %4585 = vmatmul.msk.f32.gmra.mxu0 %vm332_vm0, %v6425_v20  ;;  %v1939_v36 = vpop.f32.mrf.mxu3  ;;  %v2233_v59 = vadd.f32 %v6608_v39, %v2198_v42  ;;  %v1862_v49 = vadd.f32 %v1788_v1, %v1704_v50  ;;  %v6773_v1 = vld [vmem:[#allocation3 + $0x27] sm:$0xff] }
 0x2f9   : > { %v2265_v44 = vmax.f32 %v2233_v59, 0.0  ;;  %v2013_v10 = vadd.f32 %v1939_v36, %v1862_v49  ;;  %v1707_v36 = vadd.f32 %v6535_v23, %v6445_v21  ;;  %v6786_v23 = vld [vmem:[#allocation3 + $0x2f] sm:$0xff] }
 0x2fa   : > { %v2367_v63 = vld [vmem:[#allocation3 + $0xb0] sm:$0xff] }
 0x2fb   : > { %2298 = vst.msk [vmem:[#allocation3 + $0xc8] sm:$0xff] %vm332_vm0, %v2265_v44  ;;  %v2164_v20 = vadd.f32 %v6692_v5, %v2013_v10  ;;  %4520 = vmatmul.msk.f32.gmra.mxu2 %vm332_vm0, %v6423_v48  ;;  %4599 = vmatmul.msk.f32.gmra.mxu1 %vm332_vm0, %v2367_v63  ;;  %v6748_v48 = vpop.f32.mrf.mxu1  ;;  %v563_v63 = vld [vmem:[#allocation2 + $0x230] sm:$0xff] }
 0x2fc   : > { %v6734_v34 = vpop.f32.mrf.mxu0  ;;  %4552 = vmatmul.msk.f32.gmra.mxu3 %vm332_vm0, %v6393_v60 }
 0x2fd   : > { %v2199_v55 = vmul.f32 %v6603_v45, %v2164_v20 }
 0x2fe   : > { %v1791_v24 = vpop.f32.mrf.mxu2 }
 0x2ff   : > { %4586 = vmatmul.msk.f32.gmra.mxu0 %vm332_vm0, %v598_v6  ;;  %v1942_v11 = vpop.f32.mrf.mxu3  ;;  %v2234_v5 = vadd.f32 %v6608_v39, %v2199_v55  ;;  %v1863_v2 = vadd.f32 %v1791_v24, %v1705_v32  ;;  %v527_v6 = vld [vmem:[#allocation2 + $0x22f] sm:$0xff]  ;;  %v1708_v55 = vadd.f32 %v6550_v61, %v6453_v4  ;;  %v6801_v61 = vld [vmem:[#allocation3 + $0x47] sm:$0xff] }
 0x301   : > { %v2266_v33 = vmax.f32 %v2234_v5, 0.0  ;;  %v2014_v60 = vadd.f32 %v1942_v11, %v1863_v2 }
 0x302   : > { %v2368_v7 = vld [vmem:[#allocation3 + $0xc8] sm:$0xff] }
 0x303   : > { %2299 = vst.msk [vmem:[#allocation3 + $0xd0] sm:$0xff] %vm332_vm0, %v2266_v33  ;;  %v2165_v26 = vadd.f32 %v6706_v0, %v2014_v60  ;;  %4521 = vmatmul.msk.f32.gmra.mxu2 %vm332_vm0, %v6439_v19  ;;  %4600 = vmatmul.msk.f32.gmra.mxu1 %vm332_vm0, %v2368_v7  ;;  %v6766_v13 = vpop.f32.mrf.mxu1  ;;  %v2320_v60 = vld [vmem:[#allocation3 + $0x7] sm:$0xff] }
 0x304   : > { %v6750_v54 = vpop.f32.mrf.mxu0  ;;  %4553 = vmatmul.msk.f32.gmra.mxu3 %vm332_vm0, %v6409_v43  ;;  %v2392_v7 = vld [vmem:[#allocation3 + $0x9] sm:$0xff] }
 0x305   : > { %v2200_v31 = vmul.f32 %v6603_v45, %v2165_v26 }
 0x306   : > { %v1794_v51 = vpop.f32.mrf.mxu2 }
 0x307   : > { %4587 = vmatmul.msk.f32.gmra.mxu0 %vm332_vm0, %v599_v9  ;;  %v1945_v3 = vpop.f32.mrf.mxu3  ;;  %v2235_v57 = vadd.f32 %v6608_v39, %v2200_v31  ;;  %v1864_v0 = vadd.f32 %v1794_v51, %v1706_v46  ;;  %v1709_v51 = vadd.f32 %v6561_v22, %v6460_v12  ;;  %v6819_v22 = vld [vmem:[#allocation3 + $0x4f] sm:$0xff] }
 0x309   : > { %v2267_v19 = vmax.f32 %v2235_v57, 0.0  ;;  %v2015_v50 = vadd.f32 %v1945_v3, %v1864_v0 }
 0x30a   : > { %v2369_v42 = vld [vmem:[#allocation3 + $0xd0] sm:$0xff] }
 0x30b   : > { %2300 = vst.msk [vmem:[#allocation3 + $0xe8] sm:$0xff] %vm332_vm0, %v2267_v19  ;;  %v2166_v58 = vadd.f32 %v6720_v8, %v2015_v50  ;;  %4522 = vmatmul.msk.f32.gmra.mxu2 %vm332_vm0, %v526_v16  ;;  %4601 = vmatmul.msk.f32.gmra.mxu1 %vm332_vm0, %v2369_v42  ;;  %v6790_v24 = vpop.f32.mrf.mxu1  ;;  %v2321_v19 = vld [vmem:[#allocation3 + $0xf] sm:$0xff] }
 0x30c   : > { %v6764_v43 = vpop.f32.mrf.mxu0  ;;  %4554 = vmatmul.msk.f32.gmra.mxu3 %vm332_vm0, %v562_v62  ;;  %v2393_v50 = vld [vmem:[#allocation3 + $0x11] sm:$0xff] }
 0x30d   : > { %v2201_v59 = vmul.f32 %v6603_v45, %v2166_v58 }
 0x30e   : > { %v1797_v49 = vpop.f32.mrf.mxu2 }
 0x30f   : > { %4684 = vmatmul.msk.f32.vlgmr.msrb.gmra.mxu0 %vm332_vm0, %v6773_v1  ;;  %v1948_v8 = vpop.f32.mrf.mxu3  ;;  %v2236_v44 = vadd.f32 %v6608_v39, %v2201_v59  ;;  %v1865_v10 = vadd.f32 %v1797_v49, %v1707_v36  ;;  %v1710_v59 = vadd.f32 %v6572_v41, %v6467_v37  ;;  %v6840_v41 = vld [vmem:[#allocation3 + $0x67] sm:$0xff] }
 0x311   : > { %v2268_v18 = vmax.f32 %v2236_v44, 0.0  ;;  %v2016_v47 = vadd.f32 %v1948_v8, %v1865_v10 }
 0x312   : > { %v2370_v20 = vld [vmem:[#allocation3 + $0xe8] sm:$0xff] }
 0x313   : > { %2301 = vst.msk [vmem:[#allocation3 + $0xf0] sm:$0xff] %vm332_vm0, %v2268_v18  ;;  %v2167_v21 = vadd.f32 %v6734_v34, %v2016_v47  ;;  %4523 = vmatmul.msk.f32.gmra.mxu2 %vm332_vm0, %v527_v6  ;;  %4602 = vmatmul.msk.f32.gmra.mxu1 %vm332_vm0, %v2370_v20  ;;  %v6806_v57 = vpop.f32.mrf.mxu1  ;;  %v6831_v20 = vld [vmem:[#allocation3 + $0x29] sm:$0xff] }
 0x314   : > { %v2108_v32 = vpop.f32.mrf.mxu0  ;;  %4555 = vmatmul.msk.f32.gmra.mxu3 %vm332_vm0, %v563_v63 }
 0x315   : > { %v2202_v11 = vmul.f32 %v6603_v45, %v2167_v21 }
 0x316   : > { %v1800_v5 = vpop.f32.mrf.mxu2 }
 0x317   : > { %4685 = vmatmul.msk.f32.gmra.mxu0 %vm332_vm0, %v6786_v23  ;;  %v1951_v34 = vpop.f32.mrf.mxu3  ;;  %v2237_v2 = vadd.f32 %v6608_v39, %v2202_v11  ;;  %v1866_v33 = vadd.f32 %v1800_v5, %v1708_v55  ;;  %v1711_v55 = vadd.f32 %v6582_v52, %v6476_v35  ;;  %v6861_v52 = vld [vmem:[#allocation3 + $0x6f] sm:$0xff] }
 0x319   : > { %v2269_v9 = vmax.f32 %v2237_v2, 0.0  ;;  %v2017_v26 = vadd.f32 %v1951_v34, %v1866_v33 }
 0x31a   : > { %v2371_v46 = vld [vmem:[#allocation3 + $0xf0] sm:$0xff] }
 0x31b   : > { %2302 = vst.msk [vmem:[#allocation3 + $0x108] sm:$0xff] %vm332_vm0, %v2269_v9  ;;  %v2168_v4 = vadd.f32 %v6750_v54, %v2017_v26  ;;  %4620 = vmatmul.msk.f32.vlgmr.msrb.gmra.mxu2 %vm332_vm0, %v2320_v60  ;;  %4603 = vmatmul.msk.f32.gmra.mxu1 %vm332_vm0, %v2371_v46  ;;  %v6827_v6 = vpop.f32.mrf.mxu1  ;;  %v6852_v9 = vld [vmem:[#allocation3 + $0x31] sm:$0xff] }
 0x31c   : > { %v2111_v31 = vpop.f32.mrf.mxu0  ;;  %4652 = vmatmul.msk.f32.vlgmr.msrb.gmra.mxu3 %vm332_vm0, %v2392_v7  ;;  %v8424_v46 = vld [vmem:[#allocation49_spill] sm:$0xff] }
 0x31d   : > { %v2203_v3 = vmul.f32 %v6603_v45, %v2168_v4  ;;  %v1712_v4 = vadd.f32 %v6595_v15, %v8424_v46 }
 0x31e   : > { %v1803_v0 = vpop.f32.mrf.mxu2 }
 0x31f   : > { %4686 = vmatmul.msk.f32.gmra.mxu0 %vm332_vm0, %v6801_v61  ;;  %v1954_v54 = vpop.f32.mrf.mxu3  ;;  %v2238_v16 = vadd.f32 %v6608_v39, %v2203_v3  ;;  %v1867_v62 = vadd.f32 %v1803_v0, %v1709_v51 }
 0x321   : > { %v2270_v42 = vmax.f32 %v2238_v16, 0.0  ;;  %v2018_v58 = vadd.f32 %v1954_v54, %v1867_v62 }
 0x322   : > { %v6811_v27 = vld [vmem:[#allocation3 + $0x108] sm:$0xff] }
 0x323   : > { %2303 = vst.msk [vmem:[#allocation3 + $0x110] sm:$0xff] %vm332_vm0, %v2270_v42  ;;  %v2169_v12 = vadd.f32 %v6764_v43, %v2018_v58  ;;  %4621 = vmatmul.msk.f32.gmra.mxu2 %vm332_vm0, %v2321_v19  ;;  %4604 = vmatmul.msk.f32.gmra.mxu1 %vm332_vm0, %v6811_v27  ;;  %v6882_v58 = vld [vmem:[#allocation3 + $0x87] sm:$0xff] }
 0x324   : > { %v2114_v36 = vpop.f32.mrf.mxu0  ;;  %4653 = vmatmul.msk.f32.gmra.mxu3 %vm332_vm0, %v2393_v50  ;;  %v6873_v50 = vld [vmem:[#allocation3 + $0x49] sm:$0xff] }
 0x325   : > { %v2204_v49 = vmul.f32 %v6603_v45, %v2169_v12  ;;  %v8425_v12 = vld [vmem:[#allocation48_spill] sm:$0xff] }
 0x326   : > { %v1806_v8 = vpop.f32.mrf.mxu2 }
 0x327   : > { %4687 = vmatmul.msk.f32.gmra.mxu0 %vm332_vm0, %v6819_v22  ;;  %v1957_v44 = vpop.f32.mrf.mxu3  ;;  %v2239_v43 = vadd.f32 %v6608_v39, %v2204_v49  ;;  %v1868_v10 = vadd.f32 %v1806_v8, %v1710_v59  ;;  %v1713_v59 = vadd.f32 %v6615_v14, %v8425_v12 }
 0x329   : > { %v2271_v63 = vmax.f32 %v2239_v43, 0.0  ;;  %v2019_v18 = vadd.f32 %v1957_v44, %v1868_v10 }
 0x32a   : > { %v6829_v47 = vld [vmem:[#allocation3 + $0x110] sm:$0xff] }
 0x32b   : > { %2304 = vst.msk [vmem:[#allocation3 + $0x128] sm:$0xff] %vm332_vm0, %v2271_v63  ;;  %v2170_v37 = vadd.f32 %v2108_v32, %v2019_v18  ;;  %4622 = vmatmul.msk.f32.gmra.mxu2 %vm332_vm0, %v6773_v1  ;;  %4605 = vmatmul.msk.f32.gmra.mxu1 %vm332_vm0, %v6829_v47 }
 0x32c   : > { %v2117_v21 = vpop.f32.mrf.mxu0  ;;  %4654 = vmatmul.msk.f32.gmra.mxu3 %vm332_vm0, %v6831_v20 }
 0x32d   : > { %v2205_v11 = vmul.f32 %v6603_v45, %v2170_v37  ;;  %v6894_v37 = vld [vmem:[#allocation3 + $0x51] sm:$0xff] }
 0x32e   : > { %v1809_v32 = vpop.f32.mrf.mxu2 }
 0x32f   : > { %4688 = vmatmul.msk.f32.gmra.mxu0 %vm332_vm0, %v6840_v41  ;;  %v1960_v5 = vpop.f32.mrf.mxu3  ;;  %v2240_v1 = vadd.f32 %v6608_v39, %v2205_v11  ;;  %v1869_v34 = vadd.f32 %v1809_v32, %v1711_v55  ;;  %v6903_v11 = vld [vmem:[#allocation3 + $0x8f] sm:$0xff] }
 0x330   : > { %v6848_v60 = vpop.f32.mrf.mxu1  ;;  %v8426_v32 = vld [vmem:[#allocation52_spill] sm:$0xff] }
 0x331   : > { %v2272_v2 = vmax.f32 %v2240_v1, 0.0  ;;  %v2020_v33 = vadd.f32 %v1960_v5, %v1869_v34  ;;  %v1714_v5 = vadd.f32 %v6627_v25, %v8426_v32 }
 0x332   : > { %v6850_v7 = vld [vmem:[#allocation3 + $0x128] sm:$0xff] }
 0x333   : > { %2305 = vst.msk [vmem:[#allocation3 + $0x130] sm:$0xff] %vm332_vm0, %v2272_v2  ;;  %v2171_v35 = vadd.f32 %v2111_v31, %v2020_v33  ;;  %4623 = vmatmul.msk.f32.gmra.mxu2 %vm332_vm0, %v6786_v23  ;;  %4606 = vmatmul.msk.f32.gmra.mxu1 %vm332_vm0, %v6850_v7 }
 0x334   : > { %v2120_v26 = vpop.f32.mrf.mxu0  ;;  %4655 = vmatmul.msk.f32.gmra.mxu3 %vm332_vm0, %v6852_v9 }
 0x335   : > { %v2206_v51 = vmul.f32 %v6603_v45, %v2171_v35 }
 0x336   : > { %v1812_v31 = vpop.f32.mrf.mxu2 }
 0x337   : > { %4689 = vmatmul.msk.f32.gmra.mxu0 %vm332_vm0, %v6861_v52  ;;  %v1963_v3 = vpop.f32.mrf.mxu3  ;;  %v2241_v23 = vadd.f32 %v6608_v39, %v2206_v51  ;;  %v1870_v0 = vadd.f32 %v1812_v31, %v1712_v4  ;;  %v6915_v51 = vld [vmem:[#allocation3 + $0x69] sm:$0xff] }
 0x338   : > { %v6869_v62 = vpop.f32.mrf.mxu1 }
 0x339   : > { %v2273_v54 = vmax.f32 %v2241_v23, 0.0  ;;  %v2021_v16 = vadd.f32 %v1963_v3, %v1870_v0  ;;  %v6924_v3 = vld [vmem:[#allocation3 + $0xa7] sm:$0xff] }
 0x33a   : > { %v6871_v19 = vld [vmem:[#allocation3 + $0x130] sm:$0xff]  ;;  %v8427_v23 = vld [vmem:[#allocation50_spill] sm:$0xff] }
 0x33b   : > { %2306 = vst.msk [vmem:[#allocation3 + $0x148] sm:$0xff] %vm332_vm0, %v2273_v54  ;;  %v2172_v15 = vadd.f32 %v2114_v36, %v2021_v16  ;;  %4624 = vmatmul.msk.f32.gmra.mxu2 %vm332_vm0, %v6801_v61  ;;  %4607 = vmatmul.msk.f32.gmra.mxu1 %vm332_vm0, %v6871_v19  ;;  %v1715_v0 = vadd.f32 %v6638_v17, %v8427_v23  ;;  %v6966_v23 = vld [vmem:[#allocation3 + $0xc7] sm:$0xff] }
 0x33c   : > { %v2123_v42 = vpop.f32.mrf.mxu0  ;;  %4656 = vmatmul.msk.f32.gmra.mxu3 %vm332_vm0, %v6873_v50  ;;  %8429 = vst [vmem:[#allocation64_spill] sm:$0xff] %v6966_v23 }
 0x33d   : > { %v2207_v49 = vmul.f32 %v6603_v45, %v2172_v15 }
 0x33e   : > { %v1815_v36 = vpop.f32.mrf.mxu2 }
 0x33f   : > { %4690 = vmatmul.msk.f32.gmra.mxu0 %vm332_vm0, %v6882_v58  ;;  %v1966_v8 = vpop.f32.mrf.mxu3  ;;  %v2242_v61 = vadd.f32 %v6608_v39, %v2207_v49  ;;  %v1871_v44 = vadd.f32 %v1815_v36, %v1713_v59 }
 0x340   : > { %v6890_v63 = vpop.f32.mrf.mxu1 }
 0x341   : > { %v2274_v43 = vmax.f32 %v2242_v61, 0.0  ;;  %v2022_v10 = vadd.f32 %v1966_v8, %v1871_v44  ;;  %v6936_v61 = vld [vmem:[#allocation3 + $0x71] sm:$0xff] }
 0x342   : > { %v6892_v18 = vld [vmem:[#allocation3 + $0x148] sm:$0xff] }
 0x343   : > { %2307 = vst.msk [vmem:[#allocation3 + $0x150] sm:$0xff] %vm332_vm0, %v2274_v43  ;;  %v2173_v14 = vadd.f32 %v2117_v21, %v2022_v10  ;;  %4625 = vmatmul.msk.f32.gmra.mxu2 %vm332_vm0, %v6819_v22  ;;  %4608 = vmatmul.msk.f32.gmra.mxu1 %vm332_vm0, %v6892_v18  ;;  %v6945_v43 = vld [vmem:[#allocation3 + $0xaf] sm:$0xff] }
 0x344   : > { %v2126_v55 = vpop.f32.mrf.mxu0  ;;  %4657 = vmatmul.msk.f32.gmra.mxu3 %vm332_vm0, %v6894_v37  ;;  %v8428_v10 = vld [vmem:[#allocation55_spill] sm:$0xff] }
 0x345   : > { %v2208_v1 = vmul.f32 %v6603_v45, %v2173_v14  ;;  %v1716_v14 = vadd.f32 %v6653_v53, %v8428_v10 }
 0x346   : > { %v1818_v21 = vpop.f32.mrf.mxu2 }
 0x347   : > { %4691 = vmatmul.msk.f32.gmra.mxu0 %vm332_vm0, %v6903_v11  ;;  %v1969_v34 = vpop.f32.mrf.mxu3  ;;  %v2243_v22 = vadd.f32 %v6608_v39, %v2208_v1  ;;  %v1872_v2 = vadd.f32 %v1818_v21, %v1714_v5 }
 0x348   : > { %v6911_v46 = vpop.f32.mrf.mxu1 }
 0x349   : > { %v2275_v33 = vmax.f32 %v2243_v22, 0.0  ;;  %v2023_v35 = vadd.f32 %v1969_v34, %v1872_v2 }
 0x34a   : > { %v6913_v4 = vld [vmem:[#allocation3 + $0x150] sm:$0xff] }
 0x34b   : > { %2308 = vst.msk [vmem:[#allocation3 + $0x168] sm:$0xff] %vm332_vm0, %v2275_v33  ;;  %v2174_v25 = vadd.f32 %v2120_v26, %v2023_v35  ;;  %4626 = vmatmul.msk.f32.gmra.mxu2 %vm332_vm0, %v6840_v41  ;;  %4609 = vmatmul.msk.f32.gmra.mxu1 %vm332_vm0, %v6913_v4  ;;  %v6957_v35 = vld [vmem:[#allocation3 + $0x89] sm:$0xff] }
 0x34c   : > { %v2129_v31 = vpop.f32.mrf.mxu0  ;;  %4658 = vmatmul.msk.f32.gmra.mxu3 %vm332_vm0, %v6915_v51 }
 0x34d   : > { %v2209_v54 = vmul.f32 %v6603_v45, %v2174_v25 }
 0x34e   : > { %v1821_v26 = vpop.f32.mrf.mxu2 }
 0x34f   : > { %4692 = vmatmul.msk.f32.gmra.mxu0 %vm332_vm0, %v6924_v3  ;;  %v1972_v16 = vpop.f32.mrf.mxu3  ;;  %v2244_v15 = vadd.f32 %v6608_v39, %v2209_v54  ;;  %v1873_v12 = vadd.f32 %v1821_v26, %v1715_v0  ;;  %v8430_v0 = vld [vmem:[#allocation53_spill] sm:$0xff] }
 0x350   : > { %v6932_v36 = vpop.f32.mrf.mxu1  ;;  %v1717_v54 = vadd.f32 %v6667_v38, %v8430_v0 }
 0x351   : > { %v2276_v59 = vmax.f32 %v2244_v15, 0.0  ;;  %v2024_v49 = vadd.f32 %v1972_v16, %v1873_v12 }
 0x352   : > { %v6934_v8 = vld [vmem:[#allocation3 + $0x168] sm:$0xff] }
 0x353   : > { %2309 = vst.msk [vmem:[#allocation3 + $0x170] sm:$0xff] %vm332_vm0, %v2276_v59  ;;  %v2175_v17 = vadd.f32 %v2123_v42, %v2024_v49  ;;  %4627 = vmatmul.msk.f32.gmra.mxu2 %vm332_vm0, %v6861_v52  ;;  %4610 = vmatmul.msk.f32.gmra.mxu1 %vm332_vm0, %v6934_v8 }
 0x354   : > { %v2132_v44 = vpop.f32.mrf.mxu0  ;;  %4659 = vmatmul.msk.f32.gmra.mxu3 %vm332_vm0, %v6936_v61 }
 0x355   : > { %v2210_v32 = vmul.f32 %v6603_v45, %v2175_v17 }
 0x356   : > { %v1824_v42 = vpop.f32.mrf.mxu2 }
 0x357   : > { %4693 = vmatmul.msk.f32.gmra.mxu0 %vm332_vm0, %v6945_v43  ;;  %v1975_v5 = vpop.f32.mrf.mxu3  ;;  %v2245_v1 = vadd.f32 %v6608_v39, %v2210_v32  ;;  %v1874_v21 = vadd.f32 %v1824_v42, %v1716_v14  ;;  %v6978_v14 = vld [vmem:[#allocation3 + $0x91] sm:$0xff] }
 0x358   : > { %v6953_v2 = vpop.f32.mrf.mxu1  ;;  %v6987_v42 = vld [vmem:[#allocation3 + $0xcf] sm:$0xff] }
 0x359   : > { %v2277_v34 = vmax.f32 %v2245_v1, 0.0  ;;  %v2025_v22 = vadd.f32 %v1975_v5, %v1874_v21  ;;  %8431 = vst [vmem:[#allocation59_spill] sm:$0xff] %v6987_v42  ;;  %v8432_v5 = vld [vmem:[#allocation56_spill] sm:$0xff] }
 0x35a   : > { %v6955_v33 = vld [vmem:[#allocation3 + $0x170] sm:$0xff]  ;;  %v1718_v1 = vadd.f32 %v6680_v29, %v8432_v5 }
 0x35b   : > { %2310 = vst.msk [vmem:[#allocation3 + $0x188] sm:$0xff] %vm332_vm0, %v2277_v34  ;;  %v2176_v53 = vadd.f32 %v2126_v55, %v2025_v22  ;;  %4628 = vmatmul.msk.f32.gmra.mxu2 %vm332_vm0, %v6882_v58  ;;  %4611 = vmatmul.msk.f32.gmra.mxu1 %vm332_vm0, %v6955_v33 }
 0x35c   : > { %v2135_v25 = vpop.f32.mrf.mxu0  ;;  %4660 = vmatmul.msk.f32.gmra.mxu3 %vm332_vm0, %v6957_v35 }
 0x35d   : > { %v2211_v26 = vmul.f32 %v6603_v45, %v2176_v53 }
 0x35e   : > { %v1827_v55 = vpop.f32.mrf.mxu2 }
 0x35f   : > { %4694 = vmatmul.msk.f32.gmra.mxu0 %vm332_vm0, %v6966_v23  ;;  %v1978_v16 = vpop.f32.mrf.mxu3  ;;  %v2246_v15 = vadd.f32 %v6608_v39, %v2211_v26  ;;  %v1875_v12 = vadd.f32 %v1827_v55, %v1717_v54 }
 0x360   : > { %v6974_v17 = vpop.f32.mrf.mxu1 }
 0x361   : > { %v2278_v59 = vmax.f32 %v2246_v15, 0.0  ;;  %v2026_v49 = vadd.f32 %v1978_v16, %v1875_v12  ;;  %v6999_v16 = vld [vmem:[#allocation3 + $0xa9] sm:$0xff] }
 0x362   : > { %v6976_v10 = vld [vmem:[#allocation3 + $0x188] sm:$0xff] }
 0x363   : > { %2311 = vst.msk [vmem:[#allocation3 + $0x190] sm:$0xff] %vm332_vm0, %v2278_v59  ;;  %v2177_v38 = vadd.f32 %v2129_v31, %v2026_v49  ;;  %4629 = vmatmul.msk.f32.gmra.mxu2 %vm332_vm0, %v6903_v11  ;;  %4612 = vmatmul.msk.f32.gmra.mxu1 %vm332_vm0, %v6976_v10  ;;  %v7008_v12 = vld [vmem:[#allocation3 + $0xe7] sm:$0xff]  ;;  %v8435_v59 = vld [vmem:[#allocation80_spill] sm:$0xff] }
 0x364   : > { %v2138_v32 = vpop.f32.mrf.mxu0  ;;  %4661 = vmatmul.msk.f32.gmra.mxu3 %vm332_vm0, %v6978_v14  ;;  %8434 = vst [vmem:[#allocation61_spill] sm:$0xff] %v7008_v12  ;;  %v1719_v49 = vadd.f32 %v6694_v28, %v8435_v59  ;;  %v8439_v59 = vld [vmem:[#allocation58_spill] sm:$0xff] }
 0x365   : > { %v2212_v21 = vmul.f32 %v6603_v45, %v2177_v38 }
 0x366   : > { %v1830_v31 = vpop.f32.mrf.mxu2 }
 0x367   : > { %4695 = vmatmul.msk.f32.gmra.mxu0 %vm332_vm0, %v6987_v42  ;;  %v1981_v34 = vpop.f32.mrf.mxu3  ;;  %v2247_v22 = vadd.f32 %v6608_v39, %v2212_v21  ;;  %v1876_v53 = vadd.f32 %v1830_v31, %v1718_v1 }
 0x368   : > { %v6995_v26 = vpop.f32.mrf.mxu1 }
 0x369   : > { %v2279_v0 = vmax.f32 %v2247_v22, 0.0  ;;  %v2027_v54 = vadd.f32 %v1981_v34, %v1876_v53 }
 0x36a   : > { %v6997_v55 = vld [vmem:[#allocation3 + $0x190] sm:$0xff] }
 0x36b   : > { %8433 = vst [vmem:[#allocation66_spill] sm:$0xff] %v6997_v55  ;;  %v2178_v29 = vadd.f32 %v2132_v44, %v2027_v54  ;;  %4630 = vmatmul.msk.f32.gmra.mxu2 %vm332_vm0, %v6924_v3  ;;  %4613 = vmatmul.msk.f32.gmra.mxu1 %vm332_vm0, %v6997_v55 }
 0x36c   : > { %v2141_v15 = vpop.f32.mrf.mxu0  ;;  %2312 = vst.msk [vmem:[#allocation3 + $0x1a8] sm:$0xff] %vm332_vm0, %v2279_v0  ;;  %4662 = vmatmul.msk.f32.gmra.mxu3 %vm332_vm0, %v6999_v16  ;;  %v7020_v0 = vld [vmem:[#allocation3 + $0xb1] sm:$0xff] }
 0x36d   : > { %v2213_v38 = vmul.f32 %v6603_v45, %v2178_v29  ;;  %8437 = vst [vmem:[#allocation63_spill] sm:$0xff] %v7020_v0  ;;  %v7031_v29 = vld [vmem:[#allocation3 + $0xef] sm:$0xff] }
 0x36e   : > { %v1833_v44 = vpop.f32.mrf.mxu2  ;;  %8438 = vst [vmem:[#allocation70_spill] sm:$0xff] %v7031_v29 }
 0x36f   : > { %4696 = vmatmul.msk.f32.gmra.mxu0 %vm332_vm0, %v7008_v12  ;;  %v1984_v5 = vpop.f32.mrf.mxu3  ;;  %v2248_v1 = vadd.f32 %v6608_v39, %v2213_v38  ;;  %v1877_v21 = vadd.f32 %v1833_v44, %v1719_v49  ;;  %v1720_v49 = vadd.f32 %v6714_v30, %v8439_v59  ;;  %v8443_v59 = vld [vmem:[#allocation60_spill] sm:$0xff] }
 0x370   : > { %v7016_v22 = vpop.f32.mrf.mxu1 }
 0x371   : > { %v2280_v31 = vmax.f32 %v2248_v1, 0.0  ;;  %v2028_v34 = vadd.f32 %v1984_v5, %v1877_v21 }
 0x373   : > { %v7018_v53 = vld [vmem:[#allocation3 + $0x1a8] sm:$0xff]  ;;  %2313 = vst.msk [vmem:[#allocation3 + $0x1b0] sm:$0xff] %vm332_vm0, %v2280_v31  ;;  %v2179_v28 = vadd.f32 %v2135_v25, %v2028_v34  ;;  %4631 = vmatmul.msk.f32.gmra.mxu2 %vm332_vm0, %v6945_v43 }
 0x374   : > { %8436 = vst [vmem:[#allocation68_spill] sm:$0xff] %v7018_v53  ;;  %v7022_v54 = vpop.f32.mrf.mxu0  ;;  %4663 = vmatmul.msk.f32.gmra.mxu3 %vm332_vm0, %v7020_v0  ;;  %4614 = vmatmul.msk.f32.gmra.mxu1 %vm332_vm0, %v7018_v53  ;;  %v7043_v0 = vld [vmem:[#allocation3 + $0xc9] sm:$0xff] }
 0x375   : > { %v2214_v38 = vmul.f32 %v6603_v45, %v2179_v28  ;;  %8441 = vst [vmem:[#allocation72_spill] sm:$0xff] %v7043_v0  ;;  %v7054_v28 = vld [vmem:[#allocation3 + $0x107] sm:$0xff] }
 0x376   : > { %v1836_v25 = vpop.f32.mrf.mxu2  ;;  %8442 = vst [vmem:[#allocation67_spill] sm:$0xff] %v7054_v28 }
 0x377   : > { %4697 = vmatmul.msk.f32.gmra.mxu0 %vm332_vm0, %v7031_v29  ;;  %v1987_v44 = vpop.f32.mrf.mxu3  ;;  %v2249_v5 = vadd.f32 %v6608_v39, %v2214_v38  ;;  %v1878_v1 = vadd.f32 %v1836_v25, %v1720_v49  ;;  %v1721_v49 = vadd.f32 %v6731_v56, %v8443_v59  ;;  %v3555_v56 = vld [vmem:[#allocation9 + $0x68] sm:$0xff]  ;;  %v7077_v59 = vld [vmem:[#allocation3 + $0x10f] sm:$0xff] }
 0x378   : > { %v7039_v34 = vpop.f32.mrf.mxu1  ;;  %8446 = vst [vmem:[#allocation43_spill] sm:$0xff] %v7077_v59  ;;  %3580 = vmatpush.msra.mxu3 %v3555_v56 }
 0x379   : > { %v2281_v21 = vmax.f32 %v2249_v5, 0.0  ;;  %v2029_v31 = vadd.f32 %v1987_v44, %v1878_v1 }
 0x37a   : > { %v7041_v53 = vld [vmem:[#allocation3 + $0x1b0] sm:$0xff] }
 0x37b   : > { %8440 = vst [vmem:[#allocation65_spill] sm:$0xff] %v7041_v53  ;;  %v2180_v30 = vadd.f32 %v2138_v32, %v2029_v31  ;;  %4632 = vmatmul.msk.f32.gmra.mxu2 %vm332_vm0, %v6966_v23 }
 0x37c   : > { %v7045_v55 = vpop.f32.mrf.mxu0  ;;  %2314 = vst.msk [vmem:[#allocation3 + $0x1c8] sm:$0xff] %vm332_vm0, %v2281_v21  ;;  %4664 = vmatmul.msk.f32.gmra.mxu3 %vm332_vm0, %v7043_v0  ;;  %4615 = vmatmul.msk.f32.gmra.mxu1 %vm332_vm0, %v7041_v53  ;;  %v7066_v0 = vld [vmem:[#allocation3 + $0xd1] sm:$0xff] }
 0x37d   : > { %v2215_v38 = vmul.f32 %v6603_v45, %v2180_v30  ;;  %8445 = vst [vmem:[#allocation69_spill] sm:$0xff] %v7066_v0  ;;  %v3557_v30 = vld [vmem:[#allocation9 + $0x78] sm:$0xff] }
 0x37e   : > { %v1839_v32 = vpop.f32.mrf.mxu2  ;;  %3731 = vmatpush.msra.mxu0 %v3557_v30  ;;  %v7103_v30 = vld [vmem:[#allocation3 + $0x127] sm:$0xff] }
 0x37f   : > { %4698 = vmatmul.msk.f32.gmra.mxu0 %vm332_vm0, %v7054_v28  ;;  %v1990_v25 = vpop.f32.mrf.mxu3  ;;  %v2250_v44 = vadd.f32 %v6608_v39, %v2215_v38  ;;  %v1879_v5 = vadd.f32 %v1839_v32, %v1721_v49  ;;  %v3099_v39 = vld [vmem:[#allocation9 + $0x58] sm:$0xff]  ;;  %v3559_v49 = vld [vmem:[#allocation9 + $0x88] sm:$0xff]  ;;  %v1722_v38 = vadd.f32 %v6748_v48, %v6576_v40  ;;  %8449 = vst [vmem:[#allocation77_spill] sm:$0xff] %v7103_v30 }
 0x380   : > { %v7062_v31 = vpop.f32.mrf.mxu1  ;;  %3422 = vmatpush.msra.mxu2 %v3099_v39  ;;  %3882 = vmatpush.msra.mxu1 %v3559_v49  ;;  %v8450_v49 = vld [vmem:[#allocation62_spill] sm:$0xff] }
 0x381   : > { %v2282_v1 = vmax.f32 %v2250_v44, 0.0  ;;  %v2030_v21 = vadd.f32 %v1990_v25, %v1879_v5  ;;  %v5016_v5 = vld [vmem:[%s8158_s3] ss:$0 sm:$0xff] }
 0x383   : > { %v7064_v53 = vld [vmem:[#allocation3 + $0x1c8] sm:$0xff]  ;;  %2315 = vst.msk [vmem:[#allocation3 + $0x1d0] sm:$0xff] %vm332_vm0, %v2282_v1  ;;  %v2181_v45 = vadd.f32 %v2141_v15, %v2030_v21  ;;  %4633 = vmatmul.msk.f32.gmra.mxu2 %vm332_vm0, %v6987_v42  ;;  %v5015_v15 = vld [vmem:[%s8157_s2] ss:$0 sm:$0xff] }
 0x384   : > { %8444 = vst [vmem:[#allocation74_spill] sm:$0xff] %v7064_v53  ;;  %v7068_v23 = vpop.f32.mrf.mxu0  ;;  %4665 = vmatmul.msk.f32.gmra.mxu3 %vm332_vm0, %v7066_v0  ;;  %4616 = vmatmul.msk.f32.gmra.mxu1 %vm332_vm0, %v7064_v53 }
 0x385   : > { %v2216_v32 = vmul.f32 %v5015_v15, %v2181_v45  ;;  %v7093_v45 = vld [vmem:[#allocation3 + $0xe9] sm:$0xff] }
 0x386   : > { %v1842_v25 = vpop.f32.mrf.mxu2  ;;  %8448 = vst [vmem:[#allocation46_spill] sm:$0xff] %v7093_v45 }
 0x387   : > { %4699 = vmatmul.msk.f32.gmra.mxu0 %vm332_vm0, %v7077_v59  ;;  %v1993_v44 = vpop.f32.mrf.mxu3  ;;  %v2251_v1 = vadd.f32 %v5016_v5, %v2216_v32  ;;  %v1880_v21 = vadd.f32 %v1842_v25, %v1722_v38  ;;  %v1723_v38 = vadd.f32 %v6766_v13, %v8450_v49  ;;  %v8454_v49 = vld [vmem:[#allocation57_spill] sm:$0xff] }
 0x388   : > { %v7089_v39 = vpop.f32.mrf.mxu1 }
 0x389   : > { %v2283_v40 = vmax.f32 %v2251_v1, 0.0  ;;  %v2031_v48 = vadd.f32 %v1993_v44, %v1880_v21 }
 0x38a   : > { %v7091_v53 = vld [vmem:[#allocation3 + $0x1d0] sm:$0xff] }
 0x38b   : > { %8447 = vst [vmem:[#allocation71_spill] sm:$0xff] %v7091_v53  ;;  %v2182_v56 = vadd.f32 %v7022_v54, %v2031_v48  ;;  %4634 = vmatmul.msk.f32.gmra.mxu2 %vm332_vm0, %v7008_v12 }
 0x38c   : > { %v3123_v0 = vpop.f32.mrf.mxu0  ;;  %2316 = vst.msk [vmem:[#allocation3 + $0x1e8] sm:$0xff] %vm332_vm0, %v2283_v40  ;;  %4666 = vmatmul.msk.f32.gmra.mxu3 %vm332_vm0, %v7093_v45  ;;  %4617 = vmatmul.msk.f32.gmra.mxu1 %vm332_vm0, %v7091_v53  ;;  %v7113_v53 = vld [vmem:[#allocation3 + $0xf1] sm:$0xff] }
 0x38d   : > { %v2217_v32 = vmul.f32 %v5015_v15, %v2182_v56  ;;  %8452 = vst [vmem:[#allocation79_spill] sm:$0xff] %v7113_v53  ;;  %v7123_v56 = vld [vmem:[#allocation3 + $0x12f] sm:$0xff] }
 0x38e   : > { %v1845_v25 = vpop.f32.mrf.mxu2  ;;  %8453 = vst [vmem:[#allocation75_spill] sm:$0xff] %v7123_v56 }
 0x38f   : > { %4700 = vmatmul.msk.f32.gmra.mxu0 %vm332_vm0, %v7103_v30  ;;  %v1996_v54 = vpop.f32.mrf.mxu3  ;;  %v2252_v44 = vadd.f32 %v5016_v5, %v2217_v32  ;;  %v1881_v1 = vadd.f32 %v1845_v25, %v1723_v38  ;;  %v1724_v38 = vadd.f32 %v6790_v24, %v8454_v49 }
 0x390   : > { %v7109_v48 = vpop.f32.mrf.mxu1 }
 0x391   : > { %v2284_v21 = vmax.f32 %v2252_v44, 0.0  ;;  %v2032_v40 = vadd.f32 %v1996_v54, %v1881_v1 }
 0x393   : > { %v7111_v45 = vld [vmem:[#allocation3 + $0x1e8] sm:$0xff]  ;;  %2317 = vst.msk [vmem:[#allocation3 + $0x1f0] sm:$0xff] %vm332_vm0, %v2284_v21  ;;  %v2183_v13 = vadd.f32 %v7045_v55, %v2032_v40  ;;  %4635 = vmatmul.msk.f32.gmra.mxu2 %vm332_vm0, %v7031_v29 }
 0x394   : > { %8451 = vst [vmem:[#allocation73_spill] sm:$0xff] %v7111_v45  ;;  %v3126_v12 = vpop.f32.mrf.mxu0  ;;  %4667 = vmatmul.msk.f32.gmra.mxu3 %vm332_vm0, %v7113_v53  ;;  %4618 = vmatmul.msk.f32.gmra.mxu1 %vm332_vm0, %v7111_v45  ;;  %v7133_v45 = vld [vmem:[#allocation3 + $0x109] sm:$0xff] }
 0x395   : > { %v2218_v32 = vmul.f32 %v5015_v15, %v2183_v13  ;;  %8456 = vst [vmem:[#allocation82_spill] sm:$0xff] %v7133_v45  ;;  %v7143_v13 = vld [vmem:[#allocation3 + $0x147] sm:$0xff] }
 0x396   : > { %v1848_v25 = vpop.f32.mrf.mxu2  ;;  %8457 = vst [vmem:[#allocation76_spill] sm:$0xff] %v7143_v13 }
 0x397   : > { %4701 = vmatmul.msk.f32.gmra.mxu0 %vm332_vm0, %v7123_v56  ;;  %v1999_v55 = vpop.f32.mrf.mxu3  ;;  %v2253_v54 = vadd.f32 %v5016_v5, %v2218_v32  ;;  %v1882_v44 = vadd.f32 %v1848_v25, %v1724_v38 }
 0x398   : > { %v7129_v40 = vpop.f32.mrf.mxu1 }
 0x399   : > { %v2285_v1 = vmax.f32 %v2253_v54, 0.0  ;;  %v2033_v21 = vadd.f32 %v1999_v55, %v1882_v44 }
 0x39a   : > { %v7131_v53 = vld [vmem:[#allocation3 + $0x1f0] sm:$0xff] }
 0x39b   : > { %8455 = vst [vmem:[#allocation51_spill] sm:$0xff] %v7131_v53  ;;  %v2184_v24 = vadd.f32 %v7068_v23, %v2033_v21  ;;  %4636 = vmatmul.msk.f32.gmra.mxu2 %vm332_vm0, %v7054_v28 }
 0x39c   : > { %v3129_v29 = vpop.f32.mrf.mxu0  ;;  %2318 = vst.msk [vmem:[#allocation3 + $0x208] sm:$0xff] %vm332_vm0, %v2285_v1  ;;  %4668 = vmatmul.msk.f32.gmra.mxu3 %vm332_vm0, %v7133_v45  ;;  %4619 = vmatmul.msk.f32.gmra.mxu1 %vm332_vm0, %v7131_v53  ;;  %v7150_v1 = vld [vmem:[#allocation3 + $0x111] sm:$0xff] }
 0x39d   : > { %v2219_v49 = vmul.f32 %v5015_v15, %v2184_v24  ;;  %8458 = vst [vmem:[#allocation54_spill] sm:$0xff] %v7150_v1 }
 0x39e   : > { %v2756_v38 = vpop.f32.mrf.mxu2 }
 0x39f   : > { %4702 = vmatmul.msk.f32.gmra.mxu0 %vm332_vm0, %v7143_v13  ;;  %v2965_v32 = vpop.f32.mrf.mxu3  ;;  %v2254_v25 = vadd.f32 %v5016_v5, %v2219_v49  ;;  %v2757_v23 = vadd.f32 %v2756_v38, %v6806_v57  ;;  %v5017_v5 = vld [vmem:[#allocation3 + $0x28] sm:$0xff] }
 0x3a0   : > { %v7148_v44 = vpop.f32.mrf.mxu1  ;;  %v7160_v57 = vld [vmem:[#allocation3 + $0x14f] sm:$0xff] }
 0x3a1   : > { %v2286_v55 = vmax.f32 %v2254_v25, 0.0  ;;  %v3061_v54 = vadd.f32 %v2965_v32, %v2757_v23  ;;  %8460 = vst [vmem:[#allocation78_spill] sm:$0xff] %v7160_v57  ;;  %v7167_v23 = vld [vmem:[#allocation3 + $0x129] sm:$0xff] }
 0x3a2   : > { %8461 = vst [vmem:[#allocation81_spill] sm:$0xff] %v7167_v23 }
 0x3a3   : > { %2319 = vst.msk [vmem:[#allocation3 + $0x210] sm:$0xff] %vm332_vm0, %v2286_v55  ;;  %4637 = vmatmul.msk.f32.gmra.mxu2 %vm332_vm0, %v7077_v59  ;;  %v7157_v15 = vadd.f32 %v3123_v0, %v3061_v54  ;;  %v5018_v54 = vld [vmem:[#allocation3 + $0x30] sm:$0xff] }
 0x3a4   : > { %v3132_v21 = vpop.f32.mrf.mxu0  ;;  %4669 = vmatmul.msk.f32.gmra.mxu3 %vm332_vm0, %v7150_v1  ;;  %4716 = vmatmul.msk.f32.vlgmr.msrb.gmra.mxu1 %vm332_vm0, %v5017_v5  ;;  %v7176_v5 = vld [vmem:[#allocation3 + $0x167] sm:$0xff]  ;;  %v7183_v1 = vld [vmem:[#allocation3 + $0x131] sm:$0xff] }
 0x3a5   : > { %8459 = vst [vmem:[#allocation84_spill] sm:$0xff] %v7157_v15 }
 0x3a6   : > { %v2759_v24 = vpop.f32.mrf.mxu2  ;;  %8463 = vst [vmem:[#allocation85_spill] sm:$0xff] %v7176_v5 }
 0x3a7   : > { %4703 = vmatmul.msk.f32.gmra.mxu0 %vm332_vm0, %v7160_v57  ;;  %v2968_v49 = vpop.f32.mrf.mxu3  ;;  %v2760_v38 = vadd.f32 %v2759_v24, %v6827_v6  ;;  %8464 = vst [vmem:[#allocation86_spill] sm:$0xff] %v7183_v1 }
 0x3a8   : > { %v7165_v25 = vpop.f32.mrf.mxu1 }
 0x3a9   : > { %v3062_v32 = vadd.f32 %v2968_v49, %v2760_v38 }
 0x3ab   : > { %4638 = vmatmul.msk.f32.gmra.mxu2 %vm332_vm0, %v7103_v30  ;;  %v7173_v0 = vadd.f32 %v3126_v12, %v3062_v32  ;;  %v7191_v32 = vld [vmem:[#allocation3 + $0x48] sm:$0xff] }
 0x3ac   : > { %v3135_v55 = vpop.f32.mrf.mxu0  ;;  %4670 = vmatmul.msk.f32.gmra.mxu3 %vm332_vm0, %v7167_v23  ;;  %4717 = vmatmul.msk.f32.gmra.mxu1 %vm332_vm0, %v5018_v54 }
 0x3ad   : > { %8462 = vst [vmem:[#allocation83_spill] sm:$0xff] %v7173_v0 }
 0x3ae   : > { %v2762_v6 = vpop.f32.mrf.mxu2 }
 0x3af   : > { %4704 = vmatmul.msk.f32.gmra.mxu0 %vm332_vm0, %v7176_v5  ;;  %v2971_v24 = vpop.f32.mrf.mxu3  ;;  %v2763_v49 = vadd.f32 %v2762_v6, %v6848_v60  ;;  %v7195_v60 = vld [vmem:[#allocation3 + $0x16f] sm:$0xff] }
 0x3b0   : > { %v7181_v15 = vpop.f32.mrf.mxu1  ;;  %8466 = vst [vmem:[#allocation48_spill] sm:$0xff] %v7195_v60 }
 0x3b1   : > { %v3063_v38 = vadd.f32 %v2971_v24, %v2763_v49 }
 0x3b3   : > { %4639 = vmatmul.msk.f32.gmra.mxu2 %vm332_vm0, %v7123_v56  ;;  %v7189_v12 = vadd.f32 %v3129_v29, %v3063_v38 }
 0x3b4   : > { %v3138_v23 = vpop.f32.mrf.mxu0  ;;  %4671 = vmatmul.msk.f32.gmra.mxu3 %vm332_vm0, %v7183_v1  ;;  %4718 = vmatmul.msk.f32.gmra.mxu1 %vm332_vm0, %v7191_v32  ;;  %v7202_v1 = vld [vmem:[#allocation3 + $0x149] sm:$0xff] }
 0x3b5   : > { %8465 = vst [vmem:[#allocation49_spill] sm:$0xff] %v7189_v12  ;;  %v7210_v12 = vld [vmem:[#allocation3 + $0x50] sm:$0xff] }
 0x3b6   : > { %v2765_v54 = vpop.f32.mrf.mxu2  ;;  %8467 = vst [vmem:[#allocation52_spill] sm:$0xff] %v7202_v1 }
 0x3b7   : > { %4705 = vmatmul.msk.f32.gmra.mxu0 %vm332_vm0, %v7195_v60  ;;  %v2974_v6 = vpop.f32.mrf.mxu3  ;;  %v2766_v24 = vadd.f32 %v2765_v54, %v6869_v62  ;;  %v7214_v62 = vld [vmem:[#allocation3 + $0x187] sm:$0xff] }
 0x3b8   : > { %v7200_v0 = vpop.f32.mrf.mxu1  ;;  %8469 = vst [vmem:[#allocation55_spill] sm:$0xff] %v7214_v62 }
 0x3b9   : > { %v3064_v49 = vadd.f32 %v2974_v6, %v2766_v24 }
 0x3bb   : > { %4640 = vmatmul.msk.f32.gmra.mxu2 %vm332_vm0, %v7143_v13  ;;  %v7208_v38 = vadd.f32 %v3132_v21, %v3064_v49 }
 0x3bc   : > { %v3141_v29 = vpop.f32.mrf.mxu0  ;;  %4672 = vmatmul.msk.f32.gmra.mxu3 %vm332_vm0, %v7202_v1  ;;  %4719 = vmatmul.msk.f32.gmra.mxu1 %vm332_vm0, %v7210_v12  ;;  %v7221_v1 = vld [vmem:[#allocation3 + $0x151] sm:$0xff] }
 0x3bd   : > { %8468 = vst [vmem:[#allocation50_spill] sm:$0xff] %v7208_v38  ;;  %v7229_v38 = vld [vmem:[#allocation3 + $0x68] sm:$0xff] }
 0x3be   : > { %v2768_v54 = vpop.f32.mrf.mxu2  ;;  %8470 = vst [vmem:[#allocation53_spill] sm:$0xff] %v7221_v1 }
 0x3bf   : > { %4706 = vmatmul.msk.f32.gmra.mxu0 %vm332_vm0, %v7214_v62  ;;  %v2977_v6 = vpop.f32.mrf.mxu3  ;;  %v2769_v24 = vadd.f32 %v2768_v54, %v6890_v63  ;;  %v7233_v63 = vld [vmem:[#allocation3 + $0x18f] sm:$0xff] }
 0x3c0   : > { %v7219_v56 = vpop.f32.mrf.mxu1  ;;  %8472 = vst [vmem:[#allocation80_spill] sm:$0xff] %v7233_v63 }
 0x3c1   : > { %v3065_v13 = vadd.f32 %v2977_v6, %v2769_v24 }
 0x3c3   : > { %4641 = vmatmul.msk.f32.gmra.mxu2 %vm332_vm0, %v7160_v57  ;;  %v7227_v49 = vadd.f32 %v3135_v55, %v3065_v13 }
 0x3c4   : > { %v3144_v21 = vpop.f32.mrf.mxu0  ;;  %4673 = vmatmul.msk.f32.gmra.mxu3 %vm332_vm0, %v7221_v1  ;;  %4720 = vmatmul.msk.f32.gmra.mxu1 %vm332_vm0, %v7229_v38  ;;  %v7240_v1 = vld [vmem:[#allocation3 + $0x169] sm:$0xff] }
 0x3c5   : > { %8471 = vst [vmem:[#allocation56_spill] sm:$0xff] %v7227_v49  ;;  %v7248_v49 = vld [vmem:[#allocation3 + $0x70] sm:$0xff] }
 0x3c6   : > { %v2771_v54 = vpop.f32.mrf.mxu2  ;;  %8473 = vst [vmem:[#allocation58_spill] sm:$0xff] %v7240_v1 }
 0x3c7   : > { %4707 = vmatmul.msk.f32.gmra.mxu0 %vm332_vm0, %v7233_v63  ;;  %v2980_v6 = vpop.f32.mrf.mxu3  ;;  %v2772_v24 = vadd.f32 %v2771_v54, %v6911_v46  ;;  %v7252_v46 = vld [vmem:[#allocation3 + $0x1a7] sm:$0xff] }
 0x3c8   : > { %v7238_v53 = vpop.f32.mrf.mxu1  ;;  %8475 = vst [vmem:[#allocation62_spill] sm:$0xff] %v7252_v46 }
 0x3c9   : > { %v3066_v57 = vadd.f32 %v2980_v6, %v2772_v24 }
 0x3cb   : > { %4642 = vmatmul.msk.f32.gmra.mxu2 %vm332_vm0, %v7176_v5  ;;  %v7246_v55 = vadd.f32 %v3138_v23, %v3066_v57 }
 0x3cc   : > { %v3147_v13 = vpop.f32.mrf.mxu0  ;;  %4674 = vmatmul.msk.f32.gmra.mxu3 %vm332_vm0, %v7240_v1  ;;  %4721 = vmatmul.msk.f32.gmra.mxu1 %vm332_vm0, %v7248_v49  ;;  %v7259_v1 = vld [vmem:[#allocation3 + $0x171] sm:$0xff] }
 0x3cd   : > { %8474 = vst [vmem:[#allocation60_spill] sm:$0xff] %v7246_v55  ;;  %v7267_v55 = vld [vmem:[#allocation3 + $0x88] sm:$0xff] }
 0x3ce   : > { %v2774_v54 = vpop.f32.mrf.mxu2  ;;  %8476 = vst [vmem:[#allocation57_spill] sm:$0xff] %v7259_v1 }
 0x3cf   : > { %4708 = vmatmul.msk.f32.gmra.mxu0 %vm332_vm0, %v7252_v46  ;;  %v2983_v6 = vpop.f32.mrf.mxu3  ;;  %v2775_v24 = vadd.f32 %v2774_v54, %v6932_v36  ;;  %v7271_v36 = vld [vmem:[#allocation3 + $0x1af] sm:$0xff] }
 0x3d0   : > { %v7257_v30 = vpop.f32.mrf.mxu1  ;;  %8478 = vst [vmem:[#allocation88_spill] sm:$0xff] %v7271_v36 }
 0x3d1   : > { %v3067_v5 = vadd.f32 %v2983_v6, %v2775_v24 }
 0x3d3   : > { %4643 = vmatmul.msk.f32.gmra.mxu2 %vm332_vm0, %v7195_v60  ;;  %v7265_v23 = vadd.f32 %v3141_v29, %v3067_v5 }
 0x3d4   : > { %v3150_v57 = vpop.f32.mrf.mxu0  ;;  %4675 = vmatmul.msk.f32.gmra.mxu3 %vm332_vm0, %v7259_v1  ;;  %4722 = vmatmul.msk.f32.gmra.mxu1 %vm332_vm0, %v7267_v55  ;;  %v7278_v1 = vld [vmem:[#allocation3 + $0x189] sm:$0xff] }
 0x3d5   : > { %8477 = vst [vmem:[#allocation87_spill] sm:$0xff] %v7265_v23  ;;  %v7286_v23 = vld [vmem:[#allocation3 + $0x90] sm:$0xff] }
 0x3d6   : > { %v2777_v54 = vpop.f32.mrf.mxu2  ;;  %8479 = vst [vmem:[#allocation89_spill] sm:$0xff] %v7278_v1 }
 0x3d7   : > { %4709 = vmatmul.msk.f32.gmra.mxu0 %vm332_vm0, %v7271_v36  ;;  %v2986_v6 = vpop.f32.mrf.mxu3  ;;  %v2778_v24 = vadd.f32 %v2777_v54, %v6953_v2  ;;  %v7290_v2 = vld [vmem:[#allocation3 + $0x1c7] sm:$0xff] }
 0x3d8   : > { %v7276_v45 = vpop.f32.mrf.mxu1 }
 0x3d9   : > { %v3068_v60 = vadd.f32 %v2986_v6, %v2778_v24 }
 0x3db   : > { %4644 = vmatmul.msk.f32.gmra.mxu2 %vm332_vm0, %v7214_v62  ;;  %v7284_v29 = vadd.f32 %v3144_v21, %v3068_v60 }
 0x3dc   : > { %v3153_v5 = vpop.f32.mrf.mxu0  ;;  %4676 = vmatmul.msk.f32.gmra.mxu3 %vm332_vm0, %v7278_v1  ;;  %4723 = vmatmul.msk.f32.gmra.mxu1 %vm332_vm0, %v7286_v23  ;;  %v7297_v1 = vld [vmem:[#allocation3 + $0x191] sm:$0xff] }
 0x3dd   : > { %8480 = vst [vmem:[#allocation90_spill] sm:$0xff] %v7284_v29  ;;  %v7305_v29 = vld [vmem:[#allocation3 + $0xa8] sm:$0xff] }
 0x3de   : > { %v2780_v54 = vpop.f32.mrf.mxu2  ;;  %8482 = vst [vmem:[#allocation92_spill] sm:$0xff] %v7297_v1 }
 0x3df   : > { %4710 = vmatmul.msk.f32.gmra.mxu0 %vm332_vm0, %v7290_v2  ;;  %v2989_v6 = vpop.f32.mrf.mxu3  ;;  %v2781_v24 = vadd.f32 %v2780_v54, %v6974_v17  ;;  %v7309_v17 = vld [vmem:[#allocation3 + $0x1cf] sm:$0xff] }
 0x3e0   : > { %v7295_v59 = vpop.f32.mrf.mxu1  ;;  %8484 = vst [vmem:[#allocation94_spill] sm:$0xff] %v7309_v17 }
 0x3e1   : > { %v3069_v62 = vadd.f32 %v2989_v6, %v2781_v24  ;;  %8481 = vst [vmem:[#allocation91_spill] sm:$0xff] %v7295_v59 }
 0x3e3   : > { %4645 = vmatmul.msk.f32.gmra.mxu2 %vm332_vm0, %v7233_v63  ;;  %v7303_v21 = vadd.f32 %v3147_v13, %v3069_v62 }
 0x3e4   : > { %v3156_v60 = vpop.f32.mrf.mxu0  ;;  %4677 = vmatmul.msk.f32.gmra.mxu3 %vm332_vm0, %v7297_v1  ;;  %4724 = vmatmul.msk.f32.gmra.mxu1 %vm332_vm0, %v7305_v29  ;;  %v7316_v1 = vld [vmem:[#allocation3 + $0x1a9] sm:$0xff] }
 0x3e5   : > { %8483 = vst [vmem:[#allocation93_spill] sm:$0xff] %v7303_v21  ;;  %v7324_v21 = vld [vmem:[#allocation3 + $0xb0] sm:$0xff] }
 0x3e6   : > { %v2783_v54 = vpop.f32.mrf.mxu2  ;;  %8486 = vst [vmem:[#allocation96_spill] sm:$0xff] %v7316_v1 }
 0x3e7   : > { %4711 = vmatmul.msk.f32.gmra.mxu0 %vm332_vm0, %v7309_v17  ;;  %v2992_v6 = vpop.f32.mrf.mxu3  ;;  %v2784_v24 = vadd.f32 %v2783_v54, %v6995_v26  ;;  %v7328_v26 = vld [vmem:[#allocation3 + $0x1e7] sm:$0xff] }
 0x3e8   : > { %v7314_v28 = vpop.f32.mrf.mxu1  ;;  %8488 = vst [vmem:[#allocation98_spill] sm:$0xff] %v7328_v26 }
 0x3e9   : > { %v3070_v63 = vadd.f32 %v2992_v6, %v2784_v24  ;;  %8485 = vst [vmem:[#allocation95_spill] sm:$0xff] %v7314_v28 }
 0x3eb   : > { %4646 = vmatmul.msk.f32.gmra.mxu2 %vm332_vm0, %v7252_v46  ;;  %v7322_v13 = vadd.f32 %v3150_v57, %v3070_v63 }
 0x3ec   : > { %v3159_v62 = vpop.f32.mrf.mxu0  ;;  %4678 = vmatmul.msk.f32.gmra.mxu3 %vm332_vm0, %v7316_v1  ;;  %4725 = vmatmul.msk.f32.gmra.mxu1 %vm332_vm0, %v7324_v21  ;;  %v7335_v1 = vld [vmem:[#allocation3 + $0x1b1] sm:$0xff] }
 0x3ed   : > { %8487 = vst [vmem:[#allocation97_spill] sm:$0xff] %v7322_v13  ;;  %v7343_v13 = vld [vmem:[#allocation3 + $0xc8] sm:$0xff] }
 0x3ee   : > { %v2786_v54 = vpop.f32.mrf.mxu2  ;;  %8490 = vst [vmem:[#allocation100_spill] sm:$0xff] %v7335_v1 }
 0x3ef   : > { %4712 = vmatmul.msk.f32.gmra.mxu0 %vm332_vm0, %v7328_v26  ;;  %v2995_v6 = vpop.f32.mrf.mxu3  ;;  %v2787_v24 = vadd.f32 %v2786_v54, %v7016_v22  ;;  %v7347_v22 = vld [vmem:[#allocation3 + $0x1ef] sm:$0xff]  ;;  %v3556_v54 = vld [vmem:[#allocation9 + $0x70] sm:$0xff] }
 0x3f0   : > { %3732 = vmatpush.msra.mxu0 %v3556_v54  ;;  %v7362_v54 = vld [vmem:[#allocation3 + $0xd0] sm:$0xff] }
 0x3f1   : > { %v3071_v46 = vadd.f32 %v2995_v6, %v2787_v24  ;;  %v7333_v28 = vpop.f32.mrf.mxu1 }
 0x3f2   : > { %8489 = vst [vmem:[#allocation99_spill] sm:$0xff] %v7333_v28 }
 0x3f3   : > { %4647 = vmatmul.msk.f32.gmra.mxu2 %vm332_vm0, %v7271_v36  ;;  %v7341_v57 = vadd.f32 %v3153_v5, %v3071_v46  ;;  %v3098_v46 = vld [vmem:[#allocation9 + $0x50] sm:$0xff]  ;;  %v3554_v5 = vld [vmem:[#allocation9 + $0x60] sm:$0xff] }
 0x3f4   : > { %v3162_v63 = vpop.f32.mrf.mxu0  ;;  %4679 = vmatmul.msk.f32.gmra.mxu3 %vm332_vm0, %v7335_v1  ;;  %4726 = vmatmul.msk.f32.gmra.mxu1 %vm332_vm0, %v7343_v13 }
 0x3f5   : > { %8491 = vst [vmem:[#allocation101_spill] sm:$0xff] %v7341_v57  ;;  %v7354_v57 = vld [vmem:[#allocation3 + $0x1c9] sm:$0xff]  ;;  %3423 = vmatpush.msra.mxu2 %v3098_v46  ;;  %3581 = vmatpush.msra.mxu3 %v3554_v5 }
 0x3f6   : > { %v2789_v6 = vpop.f32.mrf.mxu2  ;;  %8492 = vst [vmem:[#allocation102_spill] sm:$0xff] %v7354_v57 }
 0x3f7   : > { %4713 = vmatmul.msk.f32.gmra.mxu0 %vm332_vm0, %v7347_v22  ;;  %v2998_v24 = vpop.f32.mrf.mxu3  ;;  %v2790_v36 = vadd.f32 %v2789_v6, %v7039_v34  ;;  %v7366_v34 = vld [vmem:[#allocation3 + $0x207] sm:$0xff] }
 0x3f8   : > { %8494 = vst [vmem:[#allocation104_spill] sm:$0xff] %v7366_v34 }
 0x3f9   : > { %v3072_v28 = vadd.f32 %v2998_v24, %v2790_v36  ;;  %v7352_v1 = vpop.f32.mrf.mxu1 }
 0x3fb   : > { %4648 = vmatmul.msk.f32.gmra.mxu2 %vm332_vm0, %v7290_v2  ;;  %v7360_v59 = vadd.f32 %v3156_v60, %v3072_v28 }
 0x3fc   : > { %v3165_v42 = vpop.f32.mrf.mxu0  ;;  %4680 = vmatmul.msk.f32.gmra.mxu3 %vm332_vm0, %v7354_v57  ;;  %4727 = vmatmul.msk.f32.gmra.mxu1 %vm332_vm0, %v7362_v54  ;;  %v7373_v57 = vld [vmem:[#allocation3 + $0x1d1] sm:$0xff] }
 0x3fd   : > { %8493 = vst [vmem:[#allocation103_spill] sm:$0xff] %v7360_v59  ;;  %v7381_v59 = vld [vmem:[#allocation3 + $0xe8] sm:$0xff] }
 0x3fe   : > { %v2792_v36 = vpop.f32.mrf.mxu2  ;;  %8495 = vst [vmem:[#allocation105_spill] sm:$0xff] %v7373_v57 }
 0x3ff   : > { %4714 = vmatmul.msk.f32.gmra.mxu0 %vm332_vm0, %v7366_v34  ;;  %v3001_v6 = vpop.f32.mrf.mxu3  ;;  %v2793_v24 = vadd.f32 %v2792_v36, %v7062_v31  ;;  %v7385_v31 = vld [vmem:[#allocation3 + $0x20f] sm:$0xff] }
 0x400   : > { %8497 = vst [vmem:[#allocation107_spill] sm:$0xff] %v7385_v31  ;;  %v3558_v36 = vld [vmem:[#allocation9 + $0x80] sm:$0xff] }
 0x401   : > { %v3073_v46 = vadd.f32 %v3001_v6, %v2793_v24  ;;  %v7371_v5 = vpop.f32.mrf.mxu1  ;;  %3883 = vmatpush.msra.mxu1 %v3558_v36 }
 0x403   : > { %4649 = vmatmul.msk.f32.gmra.mxu2 %vm332_vm0, %v7309_v17  ;;  %v7379_v60 = vadd.f32 %v3159_v62, %v3073_v46  ;;  %v7392_v62 = vld [vmem:[#allocation3 + $0x1e9] sm:$0xff] }
 0x404   : > { %v3168_v28 = vpop.f32.mrf.mxu0  ;;  %4681 = vmatmul.msk.f32.gmra.mxu3 %vm332_vm0, %v7373_v57  ;;  %4728 = vmatmul.msk.f32.gmra.mxu1 %vm332_vm0, %v7381_v59  ;;  %8498 = vst [vmem:[#allocation108_spill] sm:$0xff] %v7392_v62 }
 0x405   : > { %8496 = vst [vmem:[#allocation106_spill] sm:$0xff] %v7379_v60 }
 0x406   : > { %v2795_v6 = vpop.f32.mrf.mxu2 }
 0x407   : > { %4715 = vmatmul.msk.f32.gmra.mxu0 %vm332_vm0, %v7385_v31  ;;  %v3004_v24 = vpop.f32.mrf.mxu3  ;;  %v2796_v34 = vadd.f32 %v2795_v6, %v7089_v39  ;;  %v7400_v31 = vld [vmem:[#allocation3 + $0xf0] sm:$0xff] }
 0x409   : > { %v3074_v17 = vadd.f32 %v3004_v24, %v2796_v34  ;;  %v7390_v57 = vpop.f32.mrf.mxu1 }
 0x40b   : > { %4650 = vmatmul.msk.f32.gmra.mxu2 %vm332_vm0, %v7328_v26  ;;  %v7398_v60 = vadd.f32 %v3162_v63, %v3074_v17  ;;  %v7409_v26 = vld [vmem:[#allocation3 + $0x1f1] sm:$0xff] }
 0x40c   : > { %v3171_v46 = vpop.f32.mrf.mxu0  ;;  %4682 = vmatmul.msk.f32.gmra.mxu3 %vm332_vm0, %v7392_v62  ;;  %4729 = vmatmul.msk.f32.gmra.mxu1 %vm332_vm0, %v7400_v31 }
 0x40d   : > { %8499 = vst [vmem:[#allocation109_spill] sm:$0xff] %v7398_v60  ;;  %v5031_v60 = vld [vmem:[#allocation3 + $0x47] sm:$0xff] }
 0x40e   : > { %v2798_v39 = vpop.f32.mrf.mxu2 }
 0x40f   : > { %4812 = vmatmul.msk.f32.vlgmr.msra.gmra.mxu0 %vm332_vm0, %v7191_v32  ;;  %v3007_v34 = vpop.f32.mrf.mxu3  ;;  %v2799_v36 = vadd.f32 %v2798_v39, %v7109_v48 }
 0x411   : > { %v3075_v6 = vadd.f32 %v3007_v34, %v2799_v36  ;;  %v7407_v24 = vpop.f32.mrf.mxu1 }
 0x413   : > { %4651 = vmatmul.msk.f32.gmra.mxu2 %vm332_vm0, %v7347_v22  ;;  %v7415_v17 = vadd.f32 %v3165_v42, %v3075_v6 }
 0x414   : > { %v3174_v62 = vpop.f32.mrf.mxu0  ;;  %4683 = vmatmul.msk.f32.gmra.mxu3 %vm332_vm0, %v7409_v26  ;;  %4730 = vmatmul.msk.f32.gmra.mxu1 %vm332_vm0, %v6811_v27 }
 0x416   : > { %v2801_v48 = vpop.f32.mrf.mxu2 }
 0x417   : > { %4813 = vmatmul.msk.f32.gmra.mxu0 %vm332_vm0, %v7210_v12  ;;  %v3010_v32 = vpop.f32.mrf.mxu3  ;;  %v2802_v63 = vadd.f32 %v2801_v48, %v7129_v40 }
 0x419   : > { %v3076_v39 = vadd.f32 %v3010_v32, %v2802_v63  ;;  %v7422_v34 = vpop.f32.mrf.mxu1 }
 0x41b   : > { %4748 = vmatmul.msk.f32.vlgmr.msra.gmra.mxu2 %vm332_vm0, %v6831_v20  ;;  %v7427_v42 = vadd.f32 %v3168_v28, %v3076_v39  ;;  %v5032_v20 = vld [vmem:[#allocation3 + $0x4f] sm:$0xff] }
 0x41c   : > { %v3177_v36 = vpop.f32.mrf.mxu0  ;;  %4780 = vmatmul.msk.f32.vlgmr.msra.gmra.mxu3 %vm332_vm0, %v5031_v60  ;;  %4731 = vmatmul.msk.f32.gmra.mxu1 %vm332_vm0, %v6829_v47 }
 0x41e   : > { %v2804_v27 = vpop.f32.mrf.mxu2 }
 0x41f   : > { %4814 = vmatmul.msk.f32.gmra.mxu0 %vm332_vm0, %v7229_v38  ;;  %v3013_v40 = vpop.f32.mrf.mxu3  ;;  %v2805_v12 = vadd.f32 %v2804_v27, %v7148_v44 }
 0x421   : > { %v3077_v6 = vadd.f32 %v3013_v40, %v2805_v12  ;;  %v7434_v48 = vpop.f32.mrf.mxu1 }
 0x423   : > { %4749 = vmatmul.msk.f32.gmra.mxu2 %vm332_vm0, %v6852_v9  ;;  %v7439_v28 = vadd.f32 %v3171_v46, %v3077_v6 }
 0x424   : > { %v3180_v32 = vpop.f32.mrf.mxu0  ;;  %4781 = vmatmul.msk.f32.gmra.mxu3 %vm332_vm0, %v5032_v20  ;;  %4732 = vmatmul.msk.f32.gmra.mxu1 %vm332_vm0, %v6850_v7 }
 0x426   : > { %v2807_v47 = vpop.f32.mrf.mxu2 }
 0x427   : > { %4815 = vmatmul.msk.f32.gmra.mxu0 %vm332_vm0, %v7248_v49  ;;  %v3016_v44 = vpop.f32.mrf.mxu3  ;;  %v2808_v38 = vadd.f32 %v2807_v47, %v7165_v25 }
 0x429   : > { %v3078_v60 = vadd.f32 %v3016_v44, %v2808_v38  ;;  %v7446_v63 = vpop.f32.mrf.mxu1 }
 0x42b   : > { %4750 = vmatmul.msk.f32.gmra.mxu2 %vm332_vm0, %v6873_v50  ;;  %v7452_v9 = vadd.f32 %v3174_v62, %v3078_v60 }
 0x42c   : > { %v3183_v39 = vpop.f32.mrf.mxu0  ;;  %4782 = vmatmul.msk.f32.gmra.mxu3 %vm332_vm0, %v6840_v41  ;;  %4733 = vmatmul.msk.f32.gmra.mxu1 %vm332_vm0, %v6871_v19 }
 0x42e   : > { %v2810_v7 = vpop.f32.mrf.mxu2 }
 0x42f   : > { %4816 = vmatmul.msk.f32.gmra.mxu0 %vm332_vm0, %v7267_v55  ;;  %v3019_v25 = vpop.f32.mrf.mxu3  ;;  %v2811_v49 = vadd.f32 %v2810_v7, %v7181_v15 }
 0x431   : > { %v3079_v46 = vadd.f32 %v3019_v25, %v2811_v49  ;;  %v7459_v27 = vpop.f32.mrf.mxu1 }
 0x433   : > { %4751 = vmatmul.msk.f32.gmra.mxu2 %vm332_vm0, %v6894_v37  ;;  %v7465_v41 = vadd.f32 %v3177_v36, %v3079_v46 }
 0x434   : > { %v3186_v40 = vpop.f32.mrf.mxu0  ;;  %4783 = vmatmul.msk.f32.gmra.mxu3 %vm332_vm0, %v6861_v52  ;;  %4734 = vmatmul.msk.f32.gmra.mxu1 %vm332_vm0, %v6892_v18 }
 0x436   : > { %v2813_v19 = vpop.f32.mrf.mxu2 }
 0x437   : > { %4817 = vmatmul.msk.f32.gmra.mxu0 %vm332_vm0, %v7286_v23  ;;  %v3022_v50 = vpop.f32.mrf.mxu3  ;;  %v2814_v15 = vadd.f32 %v2813_v19, %v7200_v0 }
 0x439   : > { %v3080_v55 = vadd.f32 %v3022_v50, %v2814_v15  ;;  %v7472_v62 = vpop.f32.mrf.mxu1  ;;  %v8505_v50 = vld [vmem:[#allocation68_spill] sm:$0xff] }
 0x43b   : > { %4752 = vmatmul.msk.f32.gmra.mxu2 %vm332_vm0, %v6915_v51  ;;  %v7478_v52 = vadd.f32 %v3180_v32, %v3080_v55  ;;  %v8506_v55 = vld [vmem:[#allocation95_spill] sm:$0xff] }
 0x43c   : > { %v3189_v12 = vpop.f32.mrf.mxu0  ;;  %4784 = vmatmul.msk.f32.gmra.mxu3 %vm332_vm0, %v6882_v58  ;;  %4735 = vmatmul.msk.f32.gmra.mxu1 %vm332_vm0, %v6913_v4 }
 0x43e   : > { %v2816_v18 = vpop.f32.mrf.mxu2 }
 0x43f   : > { %4818 = vmatmul.msk.f32.gmra.mxu0 %vm332_vm0, %v7305_v29  ;;  %v3025_v37 = vpop.f32.mrf.mxu3  ;;  %v2817_v0 = vadd.f32 %v2816_v18, %v7219_v56 }
 0x441   : > { %v3081_v23 = vadd.f32 %v3025_v37, %v2817_v0  ;;  %v7485_v36 = vpop.f32.mrf.mxu1  ;;  %v8507_v0 = vld [vmem:[#allocation72_spill] sm:$0xff] }
 0x443   : > { %4753 = vmatmul.msk.f32.gmra.mxu2 %vm332_vm0, %v6936_v61  ;;  %v7491_v58 = vadd.f32 %v3183_v39, %v3081_v23  ;;  %v8502_v39 = vld [vmem:[#allocation91_spill] sm:$0xff]  ;;  %v8508_v23 = vld [vmem:[#allocation61_spill] sm:$0xff] }
 0x444   : > { %v3192_v6 = vpop.f32.mrf.mxu0  ;;  %4785 = vmatmul.msk.f32.gmra.mxu3 %vm332_vm0, %v6903_v11  ;;  %4736 = vmatmul.msk.f32.gmra.mxu1 %vm332_vm0, %v6934_v8 }
 0x446   : > { %v2819_v4 = vpop.f32.mrf.mxu2 }
 0x447   : > { %4819 = vmatmul.msk.f32.gmra.mxu0 %vm332_vm0, %v7324_v21  ;;  %v3028_v51 = vpop.f32.mrf.mxu3  ;;  %v2820_v56 = vadd.f32 %v2819_v4, %v7238_v53 }
 0x449   : > { %v3082_v29 = vadd.f32 %v3028_v51, %v2820_v56  ;;  %v7498_v32 = vpop.f32.mrf.mxu1  ;;  %v8510_v51 = vld [vmem:[#allocation65_spill] sm:$0xff] }
 0x44b   : > { %4754 = vmatmul.msk.f32.gmra.mxu2 %vm332_vm0, %v6957_v35  ;;  %v7504_v11 = vadd.f32 %v3186_v40, %v3082_v29  ;;  %v8504_v40 = vld [vmem:[#allocation59_spill] sm:$0xff] }
 0x44c   : > { %v3195_v20 = vpop.f32.mrf.mxu0  ;;  %4786 = vmatmul.msk.f32.gmra.mxu3 %vm332_vm0, %v6924_v3  ;;  %4737 = vmatmul.msk.f32.gmra.mxu1 %vm332_vm0, %v6955_v33 }
 0x44e   : > { %v2822_v8 = vpop.f32.mrf.mxu2 }
 0x44f   : > { %4820 = vmatmul.msk.f32.gmra.mxu0 %vm332_vm0, %v7343_v13  ;;  %v3031_v61 = vpop.f32.mrf.mxu3  ;;  %v2823_v53 = vadd.f32 %v2822_v8, %v7257_v30 }
 0x451   : > { %v3083_v21 = vadd.f32 %v3031_v61, %v2823_v53  ;;  %v7511_v47 = vpop.f32.mrf.mxu1 }
 0x453   : > { %4755 = vmatmul.msk.f32.gmra.mxu2 %vm332_vm0, %v6978_v14  ;;  %v7517_v3 = vadd.f32 %v3189_v12, %v3083_v21  ;;  %v8512_v21 = vld [vmem:[#allocation69_spill] sm:$0xff] }
 0x454   : > { %v3198_v44 = vpop.f32.mrf.mxu0  ;;  %4787 = vmatmul.msk.f32.gmra.mxu3 %vm332_vm0, %v6945_v43  ;;  %4738 = vmatmul.msk.f32.gmra.mxu1 %vm332_vm0, %v6976_v10  ;;  %v8500_v43 = vld [vmem:[#allocation64_spill] sm:$0xff]  ;;  %v8501_v10 = vld [vmem:[#allocation66_spill] sm:$0xff] }
 0x456   : > { %v2825_v33 = vpop.f32.mrf.mxu2 }
 0x457   : > { %4821 = vmatmul.msk.f32.gmra.mxu0 %vm332_vm0, %v7362_v54  ;;  %v3034_v35 = vpop.f32.mrf.mxu3  ;;  %v2826_v30 = vadd.f32 %v2825_v33, %v7276_v45  ;;  %v8513_v33 = vld [vmem:[#allocation70_spill] sm:$0xff] }
 0x459   : > { %v3084_v13 = vadd.f32 %v3034_v35, %v2826_v30  ;;  %v7524_v38 = vpop.f32.mrf.mxu1  ;;  %v8515_v35 = vld [vmem:[#allocation74_spill] sm:$0xff] }
 0x45b   : > { %4756 = vmatmul.msk.f32.gmra.mxu2 %vm332_vm0, %v6999_v16  ;;  %v7530_v14 = vadd.f32 %v3192_v6, %v3084_v13  ;;  %v8503_v16 = vld [vmem:[#allocation63_spill] sm:$0xff]  ;;  %v5034_v13 = vld [vmem:[#allocation3 + $0x110] sm:$0xff] }
 0x45c   : > { %v3201_v60 = vpop.f32.mrf.mxu0  ;;  %4788 = vmatmul.msk.f32.gmra.mxu3 %vm332_vm0, %v8500_v43  ;;  %4739 = vmatmul.msk.f32.gmra.mxu1 %vm332_vm0, %v8501_v10 }
 0x45e   : > { %v2828_v54 = vpop.f32.mrf.mxu2 }
 0x45f   : > { %4822 = vmatmul.msk.f32.gmra.mxu0 %vm332_vm0, %v7381_v59  ;;  %v3037_v45 = vpop.f32.mrf.mxu3  ;;  %v2829_v7 = vadd.f32 %v2828_v54, %v8502_v39 }
 0x461   : > { %v3085_v25 = vadd.f32 %v3037_v45, %v2829_v7  ;;  %v7537_v49 = vpop.f32.mrf.mxu1  ;;  %v8516_v7 = vld [vmem:[#allocation46_spill] sm:$0xff] }
 0x463   : > { %4757 = vmatmul.msk.f32.gmra.mxu2 %vm332_vm0, %v8503_v16  ;;  %v7543_v19 = vadd.f32 %v3195_v20, %v3085_v25  ;;  %v8511_v20 = vld [vmem:[#allocation99_spill] sm:$0xff] }
 0x464   : > { %v3204_v46 = vpop.f32.mrf.mxu0  ;;  %4789 = vmatmul.msk.f32.gmra.mxu3 %vm332_vm0, %v8504_v40  ;;  %4740 = vmatmul.msk.f32.gmra.mxu1 %vm332_vm0, %v8505_v50  ;;  %v8517_v25 = vld [vmem:[#allocation67_spill] sm:$0xff] }
 0x465   : > { %v8519_v16 = vld [vmem:[#allocation71_spill] sm:$0xff] }
 0x466   : > { %v2831_v59 = vpop.f32.mrf.mxu2  ;;  %v5035_v40 = vld [vmem:[#allocation3 + $0x128] sm:$0xff] }
 0x467   : > { %4823 = vmatmul.msk.f32.gmra.mxu0 %vm332_vm0, %v7400_v31  ;;  %v3040_v15 = vpop.f32.mrf.mxu3  ;;  %v2832_v12 = vadd.f32 %v2831_v59, %v8506_v55  ;;  %v5033_v31 = vld [vmem:[#allocation3 + $0x108] sm:$0xff] }
 0x469   : > { %v3086_v18 = vadd.f32 %v3040_v15, %v2832_v12  ;;  %v7550_v37 = vpop.f32.mrf.mxu1 }
 0x46b   : > { %4758 = vmatmul.msk.f32.gmra.mxu2 %vm332_vm0, %v8507_v0  ;;  %v7556_v4 = vadd.f32 %v3198_v44, %v3086_v18  ;;  %v8520_v18 = vld [vmem:[#allocation79_spill] sm:$0xff] }
 0x46c   : > { %4790 = vmatmul.msk.f32.gmra.mxu3 %vm332_vm0, %v8508_v23  ;;  %v3207_v6 = vpop.f32.mrf.mxu0  ;;  %4741 = vmatmul.msk.f32.gmra.mxu1 %vm332_vm0, %v8510_v51  ;;  %v8521_v0 = vld [vmem:[#allocation43_spill] sm:$0xff]  ;;  %v8523_v23 = vld [vmem:[#allocation73_spill] sm:$0xff]  ;;  %v5036_v51 = vld [vmem:[#allocation3 + $0x130] sm:$0xff] }
 0x46d   : > { %8509 = vst [vmem:[#allocation64_spill] sm:$0xff] %v7556_v4 }
 0x46e   : > { %v2834_v56 = vpop.f32.mrf.mxu2 }
 0x46f   : > { %4824 = vmatmul.msk.f32.gmra.mxu0 %vm332_vm0, %v5033_v31  ;;  %v3043_v29 = vpop.f32.mrf.mxu3  ;;  %v2835_v8 = vadd.f32 %v2834_v56, %v8511_v20 }
 0x471   : > { %v3087_v61 = vadd.f32 %v3043_v29, %v2835_v8  ;;  %v7562_v53 = vpop.f32.mrf.mxu1 }
 0x473   : > { %4759 = vmatmul.msk.f32.gmra.mxu2 %vm332_vm0, %v8512_v21  ;;  %v7568_v44 = vadd.f32 %v3201_v60, %v3087_v61  ;;  %v8524_v61 = vld [vmem:[#allocation82_spill] sm:$0xff]  ;;  %v8525_v21 = vld [vmem:[#allocation77_spill] sm:$0xff] }
 0x474   : > { %4791 = vmatmul.msk.f32.gmra.mxu3 %vm332_vm0, %v8513_v33  ;;  %4742 = vmatmul.msk.f32.gmra.mxu1 %vm332_vm0, %v8515_v35  ;;  %v3210_v30 = vpop.f32.mrf.mxu0  ;;  %v8527_v33 = vld [vmem:[#allocation51_spill] sm:$0xff] }
 0x475   : > { %8514 = vst [vmem:[#allocation66_spill] sm:$0xff] %v7568_v44  ;;  %v5037_v35 = vld [vmem:[#allocation3 + $0x148] sm:$0xff]  ;;  %v8556_v44 = vld [vmem:[#allocation96_spill] sm:$0xff] }
 0x476   : > { %v2837_v43 = vpop.f32.mrf.mxu2 }
 0x477   : > { %4825 = vmatmul.msk.f32.gmra.mxu0 %vm332_vm0, %v5034_v13  ;;  %v3046_v10 = vpop.f32.mrf.mxu3  ;;  %v2838_v54 = vadd.f32 %v2837_v43, %v7352_v1 }
 0x479   : > { %v3088_v45 = vadd.f32 %v3046_v10, %v2838_v54  ;;  %v7574_v39 = vpop.f32.mrf.mxu1 }
 0x47b   : > { %4760 = vmatmul.msk.f32.gmra.mxu2 %vm332_vm0, %v8516_v7  ;;  %v7580_v60 = vadd.f32 %v3204_v46, %v3088_v45  ;;  %v7612_v45 = vld [vmem:[#allocation3 + $0x208] sm:$0xff]  ;;  %v8528_v7 = vld [vmem:[#allocation54_spill] sm:$0xff] }
 0x47c   : > { %4792 = vmatmul.msk.f32.gmra.mxu3 %vm332_vm0, %v8517_v25  ;;  %4743 = vmatmul.msk.f32.gmra.mxu1 %vm332_vm0, %v8519_v16  ;;  %v3213_v15 = vpop.f32.mrf.mxu0 }
 0x47d   : > { %8518 = vst [vmem:[#allocation91_spill] sm:$0xff] %v7580_v60 }
 0x47e   : > { %v2840_v50 = vpop.f32.mrf.mxu2 }
 0x47f   : > { %4826 = vmatmul.msk.f32.gmra.mxu0 %vm332_vm0, %v5035_v40  ;;  %v3049_v59 = vpop.f32.mrf.mxu3  ;;  %v2841_v1 = vadd.f32 %v2840_v50, %v7371_v5  ;;  %v5038_v40 = vld [vmem:[#allocation3 + $0x150] sm:$0xff] }
 0x481   : > { %v3089_v55 = vadd.f32 %v3049_v59, %v2841_v1  ;;  %v7586_v12 = vpop.f32.mrf.mxu1 }
 0x483   : > { %4761 = vmatmul.msk.f32.gmra.mxu2 %vm332_vm0, %v8520_v18  ;;  %v7592_v46 = vadd.f32 %v3207_v6, %v3089_v55  ;;  %v7626_v18 = vld [vmem:[#allocation3 + $0x210] sm:$0xff] }
 0x484   : > { %4793 = vmatmul.msk.f32.gmra.mxu3 %vm332_vm0, %v8521_v0  ;;  %4744 = vmatmul.msk.f32.gmra.mxu1 %vm332_vm0, %v8523_v23  ;;  %v3216_v8 = vpop.f32.mrf.mxu0  ;;  %v8531_v0 = vld [vmem:[#allocation81_spill] sm:$0xff] }
 0x485   : > { %8522 = vst [vmem:[#allocation63_spill] sm:$0xff] %v7592_v46  ;;  %v8553_v46 = vld [vmem:[#allocation92_spill] sm:$0xff] }
 0x486   : > { %v2843_v31 = vpop.f32.mrf.mxu2 }
 0x487   : > { %4827 = vmatmul.msk.f32.gmra.mxu0 %vm332_vm0, %v5036_v51  ;;  %v3052_v5 = vpop.f32.mrf.mxu3  ;;  %v2844_v56 = vadd.f32 %v2843_v31, %v7390_v57  ;;  %v8534_v51 = vld [vmem:[#allocation84_spill] sm:$0xff] }
 0x488   : > { %v3370_v31 = vadd.f32 %v7434_v48, %v8534_v51  ;;  %v8537_v48 = vld [vmem:[#allocation83_spill] sm:$0xff]  ;;  %v8538_v51 = vld [vmem:[#allocation52_spill] sm:$0xff] }
 0x489   : > { %v3090_v29 = vadd.f32 %v3052_v5, %v2844_v56  ;;  %v7598_v20 = vpop.f32.mrf.mxu1  ;;  %v5039_v5 = vld [vmem:[#allocation3 + $0x168] sm:$0xff] }
 0x48b   : > { %4762 = vmatmul.msk.f32.gmra.mxu2 %vm332_vm0, %v8524_v61  ;;  %v7604_v6 = vadd.f32 %v3210_v30, %v3090_v29  ;;  %v8529_v30 = vld [vmem:[#allocation75_spill] sm:$0xff] }
 0x48c   : > { %4794 = vmatmul.msk.f32.gmra.mxu3 %vm332_vm0, %v8525_v21  ;;  %4745 = vmatmul.msk.f32.gmra.mxu1 %vm332_vm0, %v8527_v33  ;;  %v3734_v25 = vpop.f32.mrf.mxu0 }
 0x48d   : > { %8526 = vst [vmem:[#allocation59_spill] sm:$0xff] %v7604_v6 }
 0x48e   : > { %v2846_v13 = vpop.f32.mrf.mxu2 }
 0x48f   : > { %4828 = vmatmul.msk.f32.gmra.mxu0 %vm332_vm0, %v5037_v35  ;;  %v3055_v57 = vpop.f32.mrf.mxu3  ;;  %v2847_v43 = vadd.f32 %v2846_v13, %v7407_v24  ;;  %v8535_v13 = vld [vmem:[#allocation86_spill] sm:$0xff] }
 0x491   : > { %v3091_v10 = vadd.f32 %v3055_v57, %v2847_v43  ;;  %v7610_v54 = vpop.f32.mrf.mxu1  ;;  %v5040_v43 = vld [vmem:[#allocation3 + $0x49] sm:$0xff] }
 0x493   : > { %4763 = vmatmul.msk.f32.gmra.mxu2 %vm332_vm0, %v8528_v7  ;;  %v7618_v16 = vadd.f32 %v3213_v15, %v3091_v10  ;;  %v8532_v15 = vld [vmem:[#allocation76_spill] sm:$0xff]  ;;  %v3371_v10 = vadd.f32 %v7446_v63, %v8537_v48  ;;  %v8540_v63 = vld [vmem:[#allocation49_spill] sm:$0xff] }
 0x494   : > { %4795 = vmatmul.msk.f32.gmra.mxu3 %vm332_vm0, %v8529_v30  ;;  %4746 = vmatmul.msk.f32.gmra.mxu1 %vm332_vm0, %v7612_v45  ;;  %v5041_v30 = vld [vmem:[#allocation3 + $0x170] sm:$0xff] }
 0x495   : > { %8530 = vst [vmem:[#allocation68_spill] sm:$0xff] %v7618_v16  ;;  %v8550_v16 = vld [vmem:[#allocation89_spill] sm:$0xff] }
 0x496   : > { %v2849_v24 = vpop.f32.mrf.mxu2 }
 0x497   : > { %4829 = vmatmul.msk.f32.gmra.mxu0 %vm332_vm0, %v5038_v40  ;;  %v3058_v50 = vpop.f32.mrf.mxu3  ;;  %v2850_v59 = vadd.f32 %v2849_v24, %v7422_v34  ;;  %v3737_v34 = vpop.f32.mrf.mxu0 }
 0x499   : > { %v3092_v1 = vadd.f32 %v3058_v50, %v2850_v59  ;;  %v7624_v55 = vpop.f32.mrf.mxu1 }
 0x49b   : > { %4764 = vmatmul.msk.f32.gmra.mxu2 %vm332_vm0, %v8531_v0  ;;  %v7632_v23 = vadd.f32 %v3216_v8, %v3092_v1  ;;  %v8536_v8 = vld [vmem:[#allocation78_spill] sm:$0xff] }
 0x49c   : > { %4796 = vmatmul.msk.f32.gmra.mxu3 %vm332_vm0, %v8532_v15  ;;  %4747 = vmatmul.msk.f32.gmra.mxu1 %vm332_vm0, %v7626_v18 }
 0x49d   : > { %8533 = vst [vmem:[#allocation95_spill] sm:$0xff] %v7632_v23 }
 0x49e   : > { %v3425_v56 = vpop.f32.mrf.mxu2 }
 0x49f   : > { %4830 = vmatmul.msk.f32.gmra.mxu0 %vm332_vm0, %v5039_v5  ;;  %v3583_v29 = vpop.f32.mrf.mxu3  ;;  %v3521_v61 = vadd.f32 %v3425_v56, %v3370_v31  ;;  %v3740_v50 = vpop.f32.mrf.mxu0  ;;  %v5042_v5 = vld [vmem:[#allocation3 + $0x51] sm:$0xff]  ;;  %v3372_v56 = vadd.f32 %v7459_v27, %v8540_v63  ;;  %v8543_v27 = vld [vmem:[#allocation50_spill] sm:$0xff] }
 0x4a1   : > { %v3679_v21 = vadd.f32 %v3583_v29, %v3521_v61  ;;  %v7639_v35 = vpop.f32.mrf.mxu1  ;;  %v5043_v29 = vld [vmem:[#allocation3 + $0x188] sm:$0xff] }
 0x4a3   : > { %4765 = vmatmul.msk.f32.gmra.mxu2 %vm332_vm0, %v8535_v13  ;;  %v7645_v57 = vadd.f32 %v3734_v25, %v3679_v21  ;;  %v8539_v25 = vld [vmem:[#allocation85_spill] sm:$0xff] }
 0x4a4   : > { %4797 = vmatmul.msk.f32.gmra.mxu3 %vm332_vm0, %v8536_v8  ;;  %4844 = vmatmul.msk.f32.vlgmr.msra.gmra.mxu1 %vm332_vm0, %v5040_v43 }
 0x4a6   : > { %v3428_v40 = vpop.f32.mrf.mxu2 }
 0x4a7   : > { %4831 = vmatmul.msk.f32.gmra.mxu0 %vm332_vm0, %v5041_v30  ;;  %v3586_v24 = vpop.f32.mrf.mxu3  ;;  %v3522_v59 = vadd.f32 %v3428_v40, %v3371_v10  ;;  %v3743_v43 = vpop.f32.mrf.mxu0  ;;  %v8541_v30 = vld [vmem:[#allocation53_spill] sm:$0xff] }
 0x4a9   : > { %v3680_v1 = vadd.f32 %v3586_v24, %v3522_v59  ;;  %v7651_v15 = vpop.f32.mrf.mxu1  ;;  %v5044_v24 = vld [vmem:[#allocation3 + $0x69] sm:$0xff]  ;;  %v3373_v59 = vadd.f32 %v7472_v62, %v8543_v27 }
 0x4aa   : > { %v8546_v62 = vld [vmem:[#allocation56_spill] sm:$0xff] }
 0x4ab   : > { %4766 = vmatmul.msk.f32.gmra.mxu2 %vm332_vm0, %v8538_v51  ;;  %v7657_v31 = vadd.f32 %v3737_v34, %v3680_v1  ;;  %v8542_v34 = vld [vmem:[#allocation48_spill] sm:$0xff] }
 0x4ac   : > { %4798 = vmatmul.msk.f32.gmra.mxu3 %vm332_vm0, %v8539_v25  ;;  %4845 = vmatmul.msk.f32.gmra.mxu1 %vm332_vm0, %v5042_v5  ;;  %v5045_v1 = vld [vmem:[#allocation3 + $0x190] sm:$0xff] }
 0x4ae   : > { %v3431_v61 = vpop.f32.mrf.mxu2 }
 0x4af   : > { %4832 = vmatmul.msk.f32.gmra.mxu0 %vm332_vm0, %v5043_v29  ;;  %v3589_v21 = vpop.f32.mrf.mxu3  ;;  %v3523_v8 = vadd.f32 %v3431_v61, %v3372_v56  ;;  %v3746_v61 = vpop.f32.mrf.mxu0 }
 0x4b1   : > { %v3681_v48 = vadd.f32 %v3589_v21, %v3523_v8  ;;  %v7663_v10 = vpop.f32.mrf.mxu1  ;;  %v8544_v21 = vld [vmem:[#allocation58_spill] sm:$0xff] }
 0x4b3   : > { %4767 = vmatmul.msk.f32.gmra.mxu2 %vm332_vm0, %v8541_v30  ;;  %v7669_v40 = vadd.f32 %v3740_v50, %v3681_v48  ;;  %v8545_v50 = vld [vmem:[#allocation55_spill] sm:$0xff]  ;;  %v5046_v48 = vld [vmem:[#allocation3 + $0x71] sm:$0xff] }
 0x4b4   : > { %4799 = vmatmul.msk.f32.gmra.mxu3 %vm332_vm0, %v8542_v34  ;;  %4846 = vmatmul.msk.f32.gmra.mxu1 %vm332_vm0, %v5044_v24  ;;  %v3374_v34 = vadd.f32 %v7485_v36, %v8546_v62  ;;  %v5047_v24 = vld [vmem:[#allocation3 + $0x1a8] sm:$0xff]  ;;  %v8549_v36 = vld [vmem:[#allocation60_spill] sm:$0xff] }
 0x4b6   : > { %v3434_v25 = vpop.f32.mrf.mxu2 }
 0x4b7   : > { %4833 = vmatmul.msk.f32.gmra.mxu0 %vm332_vm0, %v5045_v1  ;;  %v3592_v5 = vpop.f32.mrf.mxu3  ;;  %v3524_v63 = vadd.f32 %v3434_v25, %v3373_v59  ;;  %v3749_v62 = vpop.f32.mrf.mxu0 }
 0x4b9   : > { %v3682_v56 = vadd.f32 %v3592_v5, %v3524_v63  ;;  %v7675_v29 = vpop.f32.mrf.mxu1  ;;  %v8547_v63 = vld [vmem:[#allocation57_spill] sm:$0xff] }
 0x4bb   : > { %4768 = vmatmul.msk.f32.gmra.mxu2 %vm332_vm0, %v8544_v21  ;;  %v7681_v8 = vadd.f32 %v3743_v43, %v3682_v56  ;;  %v8548_v43 = vld [vmem:[#allocation80_spill] sm:$0xff] }
 0x4bc   : > { %4800 = vmatmul.msk.f32.gmra.mxu3 %vm332_vm0, %v8545_v50  ;;  %4847 = vmatmul.msk.f32.gmra.mxu1 %vm332_vm0, %v5046_v48  ;;  %v5048_v50 = vld [vmem:[#allocation3 + $0x89] sm:$0xff]  ;;  %v3375_v48 = vadd.f32 %v7498_v32, %v8549_v36 }
 0x4bd   : > { %v8552_v32 = vld [vmem:[#allocation87_spill] sm:$0xff] }
 0x4be   : > { %v3437_v27 = vpop.f32.mrf.mxu2  ;;  %v5051_v36 = vld [vmem:[#allocation3 + $0x1c8] sm:$0xff] }
 0x4bf   : > { %4834 = vmatmul.msk.f32.gmra.mxu0 %vm332_vm0, %v5047_v24  ;;  %v3595_v59 = vpop.f32.mrf.mxu3  ;;  %v3525_v1 = vadd.f32 %v3437_v27, %v3374_v34  ;;  %v5049_v24 = vld [vmem:[#allocation3 + $0x1b0] sm:$0xff] }
 0x4c1   : > { %v3683_v25 = vadd.f32 %v3595_v59, %v3525_v1  ;;  %v7687_v5 = vpop.f32.mrf.mxu1 }
 0x4c3   : > { %4769 = vmatmul.msk.f32.gmra.mxu2 %vm332_vm0, %v8547_v63  ;;  %v7693_v56 = vadd.f32 %v3746_v61, %v3683_v25  ;;  %v8551_v61 = vld [vmem:[#allocation62_spill] sm:$0xff] }
 0x4c4   : > { %4801 = vmatmul.msk.f32.gmra.mxu3 %vm332_vm0, %v8548_v43  ;;  %4848 = vmatmul.msk.f32.gmra.mxu1 %vm332_vm0, %v5048_v50  ;;  %v5050_v43 = vld [vmem:[#allocation3 + $0x91] sm:$0xff]  ;;  %v3376_v50 = vadd.f32 %v7511_v47, %v8552_v32  ;;  %v8555_v47 = vld [vmem:[#allocation90_spill] sm:$0xff] }
 0x4c5   : > { %v5053_v32 = vld [vmem:[#allocation3 + $0x1d0] sm:$0xff] }
 0x4c6   : > { %v3440_v34 = vpop.f32.mrf.mxu2 }
 0x4c7   : > { %4835 = vmatmul.msk.f32.gmra.mxu0 %vm332_vm0, %v5049_v24  ;;  %v3598_v27 = vpop.f32.mrf.mxu3  ;;  %v3526_v59 = vadd.f32 %v3440_v34, %v3375_v48 }
 0x4c9   : > { %v3684_v1 = vadd.f32 %v3598_v27, %v3526_v59  ;;  %v7699_v23 = vpop.f32.mrf.mxu1  ;;  %v3752_v27 = vpop.f32.mrf.mxu0 }
 0x4cb   : > { %4770 = vmatmul.msk.f32.gmra.mxu2 %vm332_vm0, %v8550_v16  ;;  %v7705_v25 = vadd.f32 %v3749_v62, %v3684_v1  ;;  %v8554_v62 = vld [vmem:[#allocation88_spill] sm:$0xff] }
 0x4cc   : > { %4802 = vmatmul.msk.f32.gmra.mxu3 %vm332_vm0, %v8551_v61  ;;  %4849 = vmatmul.msk.f32.gmra.mxu1 %vm332_vm0, %v5050_v43  ;;  %v5052_v61 = vld [vmem:[#allocation3 + $0xa9] sm:$0xff]  ;;  %v3377_v43 = vadd.f32 %v7524_v38, %v8555_v47  ;;  %v8559_v47 = vld [vmem:[#allocation94_spill] sm:$0xff] }
 0x4cd   : > { %v5055_v38 = vld [vmem:[#allocation3 + $0x1e8] sm:$0xff] }
 0x4ce   : > { %v3443_v48 = vpop.f32.mrf.mxu2 }
 0x4cf   : > { %4836 = vmatmul.msk.f32.gmra.mxu0 %vm332_vm0, %v5051_v36  ;;  %v3601_v24 = vpop.f32.mrf.mxu3  ;;  %v3527_v34 = vadd.f32 %v3443_v48, %v3376_v50 }
 0x4d1   : > { %v3685_v59 = vadd.f32 %v3601_v24, %v3527_v34  ;;  %v7711_v6 = vpop.f32.mrf.mxu1  ;;  %v3755_v60 = vpop.f32.mrf.mxu0 }
 0x4d3   : > { %4771 = vmatmul.msk.f32.gmra.mxu2 %vm332_vm0, %v8553_v46  ;;  %v7717_v1 = vadd.f32 %v3752_v27, %v3685_v59  ;;  %v5054_v59 = vld [vmem:[#allocation3 + $0xb1] sm:$0xff] }
 0x4d4   : > { %4803 = vmatmul.msk.f32.gmra.mxu3 %vm332_vm0, %v8554_v62  ;;  %4850 = vmatmul.msk.f32.gmra.mxu1 %vm332_vm0, %v5052_v61  ;;  %v8558_v61 = vld [vmem:[#allocation100_spill] sm:$0xff] }
 0x4d6   : > { %v3446_v50 = vpop.f32.mrf.mxu2 }
 0x4d7   : > { %4837 = vmatmul.msk.f32.gmra.mxu0 %vm332_vm0, %v5053_v32  ;;  %v3528_v36 = vadd.f32 %v3446_v50, %v3377_v43  ;;  %v3604_v48 = vpop.f32.mrf.mxu3  ;;  %v5056_v43 = vld [vmem:[#allocation3 + $0xc9] sm:$0xff]  ;;  %v8562_v32 = vld [vmem:[#allocation98_spill] sm:$0xff]  ;;  %v5057_v50 = vld [vmem:[#allocation3 + $0xd1] sm:$0xff] }
 0x4d9   : > { %v3686_v24 = vadd.f32 %v3604_v48, %v3528_v36  ;;  %v7723_v34 = vpop.f32.mrf.mxu1  ;;  %v8564_v48 = vld [vmem:[#allocation105_spill] sm:$0xff] }
 0x4db   : > { %4772 = vmatmul.msk.f32.gmra.mxu2 %vm332_vm0, %v8556_v44  ;;  %v7729_v27 = vadd.f32 %v3755_v60, %v3686_v24  ;;  %v8561_v60 = vld [vmem:[#allocation102_spill] sm:$0xff] }
 0x4dc   : > { %4804 = vmatmul.msk.f32.gmra.mxu3 %vm332_vm0, %v7290_v2  ;;  %4851 = vmatmul.msk.f32.gmra.mxu1 %vm332_vm0, %v5054_v59  ;;  %v2390_v59 = vld [vmem:[#allocation3 + $0x228] sm:$0xff] }
 0x4df   : > { %4838 = vmatmul.msk.f32.gmra.mxu0 %vm332_vm0, %v5055_v38  ;;  %v8566_v38 = vld [vmem:[#allocation108_spill] sm:$0xff] }
 0x4e1   : > { %v7733_v62 = vpop.f32.mrf.mxu1 }
 0x4e2   : > { %8557 = vst [vmem:[#allocation72_spill] sm:$0xff] %v7733_v62 }
 0x4e3   : > { %4773 = vmatmul.msk.f32.gmra.mxu2 %vm332_vm0, %v8558_v61 }
 0x4e4   : > { %4805 = vmatmul.msk.f32.gmra.mxu3 %vm332_vm0, %v8559_v47  ;;  %4852 = vmatmul.msk.f32.gmra.mxu1 %vm332_vm0, %v5056_v43  ;;  %v5059_v47 = vld [vmem:[#allocation3 + $0xf1] sm:$0xff] }
 0x4e5   : > { %v2391_v43 = vld [vmem:[#allocation3 + $0x230] sm:$0xff] }
 0x4e7   : > { %4839 = vmatmul.msk.f32.gmra.mxu0 %vm332_vm0, %v8527_v33  ;;  %v5058_v33 = vld [vmem:[#allocation3 + $0xe9] sm:$0xff] }
 0x4e9   : > { %v7742_v2 = vpop.f32.mrf.mxu1 }
 0x4ea   : > { %8560 = vst [vmem:[#allocation61_spill] sm:$0xff] %v7742_v2 }
 0x4eb   : > { %4774 = vmatmul.msk.f32.gmra.mxu2 %vm332_vm0, %v8561_v60 }
 0x4ec   : > { %4806 = vmatmul.msk.f32.gmra.mxu3 %vm332_vm0, %v8562_v32  ;;  %4853 = vmatmul.msk.f32.gmra.mxu1 %vm332_vm0, %v5057_v50  ;;  %v5060_v32 = vld [vmem:[#allocation3 + $0x109] sm:$0xff] }
 0x4ed   : > { %v2354_v50 = vld [vmem:[#allocation3 + $0x227] sm:$0xff] }
 0x4ef   : > { %4840 = vmatmul.msk.f32.gmra.mxu0 %vm332_vm0, %v7612_v45  ;;  %v8567_v45 = vld [vmem:[#allocation104_spill] sm:$0xff] }
 0x4f1   : > { %v7751_v36 = vpop.f32.mrf.mxu1 }
 0x4f2   : > { %8563 = vst [vmem:[#allocation65_spill] sm:$0xff] %v7751_v36 }
 0x4f3   : > { %4775 = vmatmul.msk.f32.gmra.mxu2 %vm332_vm0, %v8564_v48 }
 0x4f4   : > { %4807 = vmatmul.msk.f32.gmra.mxu3 %vm332_vm0, %v7347_v22  ;;  %4854 = vmatmul.msk.f32.gmra.mxu1 %vm332_vm0, %v5058_v33 }
 0x4f7   : > { %4841 = vmatmul.msk.f32.gmra.mxu0 %vm332_vm0, %v7626_v18  ;;  %v8569_v18 = vld [vmem:[#allocation107_spill] sm:$0xff] }
 0x4f9   : > { %v7760_v24 = vpop.f32.mrf.mxu1 }
 0x4fa   : > { %8565 = vst [vmem:[#allocation99_spill] sm:$0xff] %v7760_v24 }
 0x4fb   : > { %4776 = vmatmul.msk.f32.gmra.mxu2 %vm332_vm0, %v8566_v38 }
 0x4fc   : > { %4808 = vmatmul.msk.f32.gmra.mxu3 %vm332_vm0, %v8567_v45  ;;  %4855 = vmatmul.msk.f32.gmra.mxu1 %vm332_vm0, %v5059_v47  ;;  %v7778_v45 = vld [vmem:[#allocation3 + $0x209] sm:$0xff] }
 0x4ff   : > { %4842 = vmatmul.msk.f32.gmra.mxu0 %vm332_vm0, %v2390_v59  ;;  %v2355_v59 = vld [vmem:[#allocation3 + $0x22f] sm:$0xff] }
 0x501   : > { %v7768_v22 = vpop.f32.mrf.mxu1 }
 0x502   : > { %8568 = vst [vmem:[#allocation69_spill] sm:$0xff] %v7768_v22 }
 0x503   : > { %4777 = vmatmul.msk.f32.gmra.mxu2 %vm332_vm0, %v7409_v26 }
 0x504   : > { %4809 = vmatmul.msk.f32.gmra.mxu3 %vm332_vm0, %v8569_v18  ;;  %4856 = vmatmul.msk.f32.gmra.mxu1 %vm332_vm0, %v5060_v32  ;;  %v7787_v18 = vld [vmem:[#allocation3 + $0x211] sm:$0xff] }
 0x507   : > { %4843 = vmatmul.msk.f32.gmra.mxu0 %vm332_vm0, %v2391_v43 }
 0x509   : > { %v7776_v33 = vpop.f32.mrf.mxu1 }
 0x50a   : > { %8570 = vst [vmem:[#allocation70_spill] sm:$0xff] %v7776_v33 }
 0x50b   : > { %4778 = vmatmul.msk.f32.gmra.mxu2 %vm332_vm0, %v7778_v45 }
 0x50c   : > { %4810 = vmatmul.msk.f32.gmra.mxu3 %vm332_vm0, %v2354_v50  ;;  %4857 = vmatmul.msk.f32.gmra.mxu1 %vm332_vm0, %v8528_v7  ;;  %v7801_v7 = vld [vmem:[%s8160_s5] ss:$0 sm:$0xff] }
 0x511   : > { %v7785_v47 = vpop.f32.mrf.mxu1 }
 0x512   : > { %8571 = vst [vmem:[#allocation74_spill] sm:$0xff] %v7785_v47  ;;  %v8573_v47 = vld [vmem:[#allocation16_spill] sm:$0xff] }
 0x513   : > { %4779 = vmatmul.msk.f32.gmra.mxu2 %vm332_vm0, %v7787_v18 }
 0x514   : > { %4811 = vmatmul.msk.f32.gmra.mxu3 %vm332_vm0, %v2355_v59  ;;  %4858 = vmatmul.msk.f32.gmra.mxu1 %vm332_vm0, %v8531_v0  ;;  %v7807_v59 = vld [vmem:[%s8161_s6] ss:$0 sm:$0xff] }
 0x519   : > { %v7794_v43 = vpop.f32.mrf.mxu1 }
 0x51a   : > { %8572 = vst [vmem:[#allocation46_spill] sm:$0xff] %v7794_v43  ;;  %v7813_v43 = vpop.f32.mrf.mxu2 }
 0x51c   : > { %4859 = vmatmul.msk.f32.gmra.mxu1 %vm332_vm0, %v8535_v13 }
 0x521   : > { %v3885_v32 = vpop.f32.mrf.mxu1 }
 0x522   : > { %v3981_v50 = vadd.f32 %v3885_v32, %v7645_v57 }
 0x524   : > { %v4016_v0 = vmul.f32 %v7801_v7, %v3981_v50  ;;  %4860 = vmatmul.msk.f32.gmra.mxu1 %vm332_vm0, %v8538_v51  ;;  %v3607_v51 = vpop.f32.mrf.mxu3 }
 0x526   : > { %v4051_v13 = vadd.f32 %v7807_v59, %v4016_v0 }
 0x528   : > { %v4083_v33 = vadd.f32 %v4051_v13, %v8573_v47  ;;  %v7827_v47 = vpop.f32.mrf.mxu0 }
 0x529   : > { %v3888_v22 = vpop.f32.mrf.mxu1 }
 0x52a   : > { %v4115_v24 = vmax.f32 %v4083_v33, 0.0  ;;  %v3982_v57 = vadd.f32 %v3888_v22, %v7657_v31  ;;  %v8574_v33 = vld [vmem:[#allocation18_spill] sm:$0xff]  ;;  %v7830_v31 = vpop.f32.mrf.mxu2 }
 0x52c   : > { %4147 = vst.msk [vmem:[%s7819_s13] sm:$0xff] %vm332_vm0, %v4115_v24  ;;  %v4017_v32 = vmul.f32 %v7801_v7, %v3982_v57  ;;  %4861 = vmatmul.msk.f32.gmra.mxu1 %vm332_vm0, %v8541_v30  ;;  %v7839_v57 = vpop.f32.mrf.mxu3 }
 0x52e   : > { %v4052_v50 = vadd.f32 %v7807_v59, %v4017_v32  ;;  %v8575_v32 = vld [vmem:[#allocation20_spill] sm:$0xff] }
 0x530   : > { %v4084_v0 = vadd.f32 %v4052_v50, %v8574_v33  ;;  %v7842_v2 = vpop.f32.mrf.mxu0 }
 0x531   : > { %v3891_v22 = vpop.f32.mrf.mxu1 }
 0x532   : > { %v4116_v13 = vmax.f32 %v4084_v0, 0.0  ;;  %v3983_v36 = vadd.f32 %v3891_v22, %v7669_v40  ;;  %v7845_v22 = vpop.f32.mrf.mxu2 }
 0x534   : > { %4148 = vst.msk [vmem:[%s7819_s13 + $0x8] sm:$0xff] %vm332_vm0, %v4116_v13  ;;  %v4018_v24 = vmul.f32 %v7801_v7, %v3983_v36  ;;  %4862 = vmatmul.msk.f32.gmra.mxu1 %vm332_vm0, %v8544_v21  ;;  %v8576_v13 = vld [vmem:[#allocation22_spill] sm:$0xff] }
 0x536   : > { %v4053_v30 = vadd.f32 %v7807_v59, %v4018_v24 }
 0x538   : > { %v4085_v50 = vadd.f32 %v4053_v30, %v8575_v32  ;;  %v7854_v30 = vpop.f32.mrf.mxu3 }
 0x539   : > { %v3894_v33 = vpop.f32.mrf.mxu1 }
 0x53a   : > { %v4117_v0 = vmax.f32 %v4085_v50, 0.0  ;;  %v3984_v40 = vadd.f32 %v3894_v33, %v7681_v8  ;;  %v7857_v33 = vpop.f32.mrf.mxu0 }
 0x53c   : > { %4149 = vst.msk [vmem:[%s7819_s13 + $0x10] sm:$0xff] %vm332_vm0, %v4117_v0  ;;  %v4019_v36 = vmul.f32 %v7801_v7, %v3984_v40  ;;  %4863 = vmatmul.msk.f32.gmra.mxu1 %vm332_vm0, %v8547_v63  ;;  %v7864_v63 = vpop.f32.mrf.mxu2 }
 0x53e   : > { %v4054_v21 = vadd.f32 %v7807_v59, %v4019_v36  ;;  %v8577_v36 = vld [vmem:[#allocation24_spill] sm:$0xff] }
 0x540   : > { %v4086_v24 = vadd.f32 %v4054_v21, %v8576_v13 }
 0x541   : > { %v3897_v32 = vpop.f32.mrf.mxu1 }
 0x542   : > { %v4118_v50 = vmax.f32 %v4086_v24, 0.0  ;;  %v3985_v8 = vadd.f32 %v3897_v32, %v7693_v56  ;;  %v7869_v32 = vpop.f32.mrf.mxu3 }
 0x544   : > { %4150 = vst.msk [vmem:[%s7819_s13 + $0x18] sm:$0xff] %vm332_vm0, %v4118_v50  ;;  %v4020_v0 = vmul.f32 %v7801_v7, %v3985_v8  ;;  %4864 = vmatmul.msk.f32.gmra.mxu1 %vm332_vm0, %v8550_v16  ;;  %v7876_v16 = vpop.f32.mrf.mxu0 }
 0x546   : > { %v4055_v40 = vadd.f32 %v7807_v59, %v4020_v0  ;;  %v7879_v0 = vpop.f32.mrf.mxu2 }
 0x548   : > { %v4087_v21 = vadd.f32 %v4055_v40, %v8577_v36  ;;  %v8578_v40 = vld [vmem:[#allocation26_spill] sm:$0xff] }
 0x549   : > { %v3900_v13 = vpop.f32.mrf.mxu1 }
 0x54a   : > { %v4119_v24 = vmax.f32 %v4087_v21, 0.0  ;;  %v3986_v56 = vadd.f32 %v3900_v13, %v7705_v25 }
 0x54c   : > { %4151 = vst.msk [vmem:[%s7819_s13 + $0x20] sm:$0xff] %vm332_vm0, %v4119_v24  ;;  %v4021_v50 = vmul.f32 %v7801_v7, %v3986_v56  ;;  %4865 = vmatmul.msk.f32.gmra.mxu1 %vm332_vm0, %v8553_v46  ;;  %v7888_v46 = vpop.f32.mrf.mxu3  ;;  %v8579_v24 = vld [vmem:[#allocation93_spill] sm:$0xff] }
 0x54d   : > { %v3378_v56 = vadd.f32 %v7537_v49, %v8579_v24 }
 0x54e   : > { %v4056_v8 = vadd.f32 %v7807_v59, %v4021_v50 }
 0x550   : > { %v4088_v36 = vadd.f32 %v4056_v8, %v8578_v40  ;;  %v3529_v8 = vadd.f32 %v7813_v43, %v3378_v56  ;;  %v7894_v40 = vpop.f32.mrf.mxu0  ;;  %v8581_v43 = vld [vmem:[#allocation97_spill] sm:$0xff] }
 0x551   : > { %v3903_v21 = vpop.f32.mrf.mxu1 }
 0x552   : > { %v4120_v4 = vmax.f32 %v4088_v36, 0.0  ;;  %v3987_v25 = vadd.f32 %v3903_v21, %v7717_v1  ;;  %v8580_v36 = vld [vmem:[#allocation28_spill] sm:$0xff]  ;;  %v7897_v21 = vpop.f32.mrf.mxu2 }
 0x554   : > { %4152 = vst.msk [vmem:[%s7819_s13 + $0x28] sm:$0xff] %vm332_vm0, %v4120_v4  ;;  %v4022_v13 = vmul.f32 %v7801_v7, %v3987_v25  ;;  %4866 = vmatmul.msk.f32.gmra.mxu1 %vm332_vm0, %v8556_v44  ;;  %v3687_v44 = vadd.f32 %v3607_v51, %v3529_v8  ;;  %v7908_v56 = vpop.f32.mrf.mxu3 }
 0x556   : > { %v4057_v50 = vadd.f32 %v7807_v59, %v4022_v13  ;;  %v3379_v13 = vadd.f32 %v7550_v37, %v8581_v43  ;;  %v3838_v51 = vadd.f32 %v7827_v47, %v3687_v44  ;;  %v8584_v43 = vld [vmem:[#allocation32_spill] sm:$0xff] }
 0x558   : > { %v4089_v1 = vadd.f32 %v4057_v50, %v8580_v36  ;;  %v3530_v50 = vadd.f32 %v7830_v31, %v3379_v13  ;;  %v8582_v36 = vld [vmem:[#allocation30_spill] sm:$0xff]  ;;  %v8583_v31 = vld [vmem:[#allocation101_spill] sm:$0xff] }
 0x559   : > { %v3906_v4 = vpop.f32.mrf.mxu1  ;;  %v3380_v47 = vadd.f32 %v7562_v53, %v8583_v31 }
 0x55a   : > { %v4121_v25 = vmax.f32 %v4089_v1, 0.0  ;;  %v3988_v62 = vadd.f32 %v3906_v4, %v7729_v27  ;;  %v7913_v1 = vpop.f32.mrf.mxu0  ;;  %v3688_v37 = vadd.f32 %v7839_v57, %v3530_v50 }
 0x55c   : > { %4153 = vst.msk [vmem:[%s7819_s13 + $0x30] sm:$0xff] %vm332_vm0, %v4121_v25  ;;  %v4023_v49 = vmul.f32 %v7801_v7, %v3988_v62  ;;  %4867 = vmatmul.msk.f32.gmra.mxu1 %vm332_vm0, %v8558_v61  ;;  %v7915_v25 = vpop.f32.mrf.mxu2 }
 0x55e   : > { %v4058_v24 = vadd.f32 %v7807_v59, %v4023_v49  ;;  %v3531_v49 = vadd.f32 %v7845_v22, %v3380_v47 }
 0x560   : > { %v4090_v27 = vadd.f32 %v4058_v24, %v8582_v36  ;;  %v3839_v24 = vadd.f32 %v7842_v2, %v3688_v37  ;;  %v7929_v36 = vpop.f32.mrf.mxu3  ;;  %v8586_v37 = vld [vmem:[#allocation34_spill] sm:$0xff] }
 0x561   : > { %v3909_v8 = vpop.f32.mrf.mxu1 }
 0x562   : > { %v4122_v62 = vmax.f32 %v4090_v27, 0.0  ;;  %v3989_v4 = vadd.f32 %v3909_v8, %v3838_v51  ;;  %v3689_v51 = vadd.f32 %v7854_v30, %v3531_v49  ;;  %v8585_v8 = vld [vmem:[#allocation103_spill] sm:$0xff] }
 0x563   : > { %v3381_v2 = vadd.f32 %v7574_v39, %v8585_v8  ;;  %v8587_v39 = vld [vmem:[#allocation106_spill] sm:$0xff] }
 0x564   : > { %4154 = vst.msk [vmem:[%s7819_s13 + $0x38] sm:$0xff] %vm332_vm0, %v4122_v62  ;;  %v4024_v61 = vmul.f32 %v7801_v7, %v3989_v4  ;;  %4868 = vmatmul.msk.f32.gmra.mxu1 %vm332_vm0, %v8561_v60  ;;  %v7932_v60 = vpop.f32.mrf.mxu0  ;;  %v3470_v22 = vpop.f32.mrf.mxu2 }
 0x565   : > { %v3532_v4 = vadd.f32 %v7864_v63, %v3381_v2  ;;  %v3382_v63 = vadd.f32 %v7586_v12, %v8587_v39 }
 0x566   : > { %v4059_v44 = vadd.f32 %v7807_v59, %v4024_v61  ;;  %v3840_v61 = vadd.f32 %v7857_v33, %v3689_v51 }
 0x568   : > { %v4091_v13 = vadd.f32 %v4059_v44, %v8584_v43  ;;  %v3628_v49 = vpop.f32.mrf.mxu3  ;;  %v3690_v43 = vadd.f32 %v7869_v32, %v3532_v4 }
 0x569   : > { %v3912_v57 = vpop.f32.mrf.mxu1 }
 0x56a   : > { %v4123_v50 = vmax.f32 %v4091_v13, 0.0  ;;  %v3990_v27 = vadd.f32 %v3912_v57, %v3839_v24  ;;  %v3533_v57 = vadd.f32 %v7879_v0, %v3382_v63  ;;  %v3841_v32 = vadd.f32 %v7876_v16, %v3690_v43  ;;  %v8591_v63 = vld [vmem:[#allocation40_spill] sm:$0xff] }
 0x56c   : > { %4155 = vst.msk [vmem:[%s7819_s13 + $0x40] sm:$0xff] %vm332_vm0, %v4123_v50  ;;  %v4025_v53 = vmul.f32 %v7801_v7, %v3990_v27  ;;  %4869 = vmatmul.msk.f32.gmra.mxu1 %vm332_vm0, %v8564_v48  ;;  %v7953_v13 = vpop.f32.mrf.mxu0  ;;  %v3473_v24 = vpop.f32.mrf.mxu2  ;;  %v8588_v50 = vld [vmem:[#allocation36_spill] sm:$0xff]  ;;  %v3691_v2 = vadd.f32 %v7888_v46, %v3533_v57 }
 0x56e   : > { %v4060_v62 = vadd.f32 %v7807_v59, %v4025_v53  ;;  %v3842_v46 = vadd.f32 %v7894_v40, %v3691_v2 }
 0x570   : > { %v4092_v30 = vadd.f32 %v4060_v62, %v8586_v37  ;;  %v8589_v62 = vld [vmem:[#allocation109_spill] sm:$0xff] }
 0x571   : > { %v3915_v31 = vpop.f32.mrf.mxu1  ;;  %v3383_v0 = vadd.f32 %v7598_v20, %v8589_v62  ;;  %v3384_v20 = vadd.f32 %v7610_v54, %v7415_v17  ;;  %v3385_v54 = vadd.f32 %v7624_v55, %v7427_v42  ;;  %v2426_v62 = vld [vmem:[#allocation3 + $0x229] sm:$0xff]  ;;  %v3386_v55 = vadd.f32 %v7639_v35, %v7439_v28 }
 0x572   : > { %v4124_v47 = vmax.f32 %v4092_v30, 0.0  ;;  %v3991_v44 = vadd.f32 %v3915_v31, %v3840_v61  ;;  %v8590_v30 = vld [vmem:[#allocation38_spill] sm:$0xff]  ;;  %v3387_v28 = vadd.f32 %v7651_v15, %v7452_v9  ;;  %v3388_v9 = vadd.f32 %v7663_v10, %v7465_v41 }
 0x573   : > { %v3534_v16 = vadd.f32 %v7897_v21, %v3383_v0  ;;  %v3535_v39 = vadd.f32 %v7915_v25, %v3384_v20  ;;  %v8592_v25 = vld [vmem:[#allocation42_spill] sm:$0xff]  ;;  %v3389_v41 = vadd.f32 %v7675_v29, %v7478_v52  ;;  %v3390_v52 = vadd.f32 %v7687_v5, %v7491_v58 }
 0x574   : > { %4156 = vst.msk [vmem:[%s7819_s13 + $0x48] sm:$0xff] %vm332_vm0, %v4124_v47  ;;  %v4026_v48 = vmul.f32 %v7801_v7, %v3991_v44  ;;  %4870 = vmatmul.msk.f32.gmra.mxu1 %vm332_vm0, %v8566_v38  ;;  %v3631_v38 = vpop.f32.mrf.mxu3  ;;  %v3782_v37 = vpop.f32.mrf.mxu0  ;;  %v3391_v58 = vadd.f32 %v7699_v23, %v7504_v11 }
 0x575   : > { %v3476_v31 = vpop.f32.mrf.mxu2 }
 0x576   : > { %v4061_v33 = vadd.f32 %v7807_v59, %v4026_v48  ;;  %v3692_v48 = vadd.f32 %v7908_v56, %v3534_v16 }
 0x578   : > { %v4093_v27 = vadd.f32 %v4061_v33, %v8588_v50  ;;  %v3843_v56 = vadd.f32 %v7913_v1, %v3692_v48  ;;  %v3536_v1 = vadd.f32 %v3470_v22, %v3385_v54  ;;  %v3537_v22 = vadd.f32 %v3473_v24, %v3386_v55 }
 0x579   : > { %v3918_v51 = vpop.f32.mrf.mxu1 }
 0x57a   : > { %v4125_v53 = vmax.f32 %v4093_v27, 0.0  ;;  %v3992_v8 = vadd.f32 %v3918_v51, %v3841_v32  ;;  %v3694_v16 = vadd.f32 %v3628_v49, %v3536_v1  ;;  %v3695_v20 = vadd.f32 %v3631_v38, %v3537_v22 }
 0x57c   : > { %4157 = vst.msk [vmem:[%s7819_s13 + $0x50] sm:$0xff] %vm332_vm0, %v4125_v53  ;;  %v4027_v12 = vmul.f32 %v7801_v7, %v3992_v8  ;;  %4871 = vmatmul.msk.f32.gmra.mxu1 %vm332_vm0, %v7409_v26  ;;  %v3634_v40 = vpop.f32.mrf.mxu3  ;;  %v3785_v50 = vpop.f32.mrf.mxu0  ;;  %v3693_v53 = vadd.f32 %v7929_v36, %v3535_v39  ;;  %v3538_v39 = vadd.f32 %v3476_v31, %v3387_v28 }
 0x57d   : > { %v3479_v51 = vpop.f32.mrf.mxu2 }
 0x57e   : > { %v4062_v4 = vadd.f32 %v7807_v59, %v4027_v12  ;;  %v3844_v2 = vadd.f32 %v7932_v60, %v3693_v53  ;;  %v3539_v54 = vadd.f32 %v3479_v51, %v3388_v9 }
 0x580   : > { %v4094_v61 = vadd.f32 %v4062_v4, %v8590_v30 }
 0x581   : > { %v3921_v47 = vpop.f32.mrf.mxu1 }
 0x582   : > { %v4126_v44 = vmax.f32 %v4094_v61, 0.0  ;;  %v3993_v43 = vadd.f32 %v3921_v47, %v3842_v46  ;;  %v8593_v61 = vld [vmem:[#allocation14_spill] sm:$0xff]  ;;  %v3845_v47 = vadd.f32 %v7953_v13, %v3694_v16 }
 0x584   : > { %4158 = vst.msk [vmem:[%s7819_s13 + $0x58] sm:$0xff] %vm332_vm0, %v4126_v44  ;;  %v4028_v26 = vmul.f32 %v7801_v7, %v3993_v43  ;;  %4872 = vmatmul.msk.f32.gmra.mxu1 %vm332_vm0, %v7778_v45  ;;  %v3637_v12 = vpop.f32.mrf.mxu3  ;;  %v3788_v30 = vpop.f32.mrf.mxu0  ;;  %v2427_v44 = vld [vmem:[#allocation3 + $0x231] sm:$0xff] }
 0x585   : > { %v3482_v42 = vpop.f32.mrf.mxu2 }
 0x586   : > { %v4063_v21 = vadd.f32 %v7807_v59, %v4028_v26 }
 0x588   : > { %v4095_v33 = vadd.f32 %v4063_v21, %v8591_v63  ;;  %v8594_v63 = vld [vmem:[#allocation15_spill] sm:$0xff] }
 0x589   : > { %v3924_v57 = vpop.f32.mrf.mxu1 }
 0x58a   : > { %v4127_v27 = vmax.f32 %v4095_v33, 0.0  ;;  %v3994_v32 = vadd.f32 %v3924_v57, %v3843_v56  ;;  %v3846_v56 = vadd.f32 %v3782_v37, %v3695_v20 }
 0x58c   : > { %4159 = vst.msk [vmem:[%s7819_s13 + $0x60] sm:$0xff] %vm332_vm0, %v4127_v27  ;;  %v4029_v17 = vmul.f32 %v7801_v7, %v3994_v32  ;;  %4873 = vmatmul.msk.f32.gmra.mxu1 %vm332_vm0, %v7787_v18  ;;  %v3640_v26 = vpop.f32.mrf.mxu3  ;;  %v3791_v35 = vpop.f32.mrf.mxu0  ;;  %v3696_v32 = vadd.f32 %v3634_v40, %v3538_v39  ;;  %v3697_v40 = vadd.f32 %v3637_v12, %v3539_v54  ;;  %v8598_v39 = vld [vmem:[#allocation23_spill] sm:$0xff] }
 0x58d   : > { %v3485_v13 = vpop.f32.mrf.mxu2 }
 0x58e   : > { %v4064_v45 = vadd.f32 %v7807_v59, %v4029_v17  ;;  %v3847_v37 = vadd.f32 %v3785_v50, %v3696_v32  ;;  %v3848_v50 = vadd.f32 %v3788_v30, %v3697_v40 }
 0x590   : > { %v4096_v8 = vadd.f32 %v4064_v45, %v8592_v25  ;;  %v8595_v45 = vld [vmem:[#allocation17_spill] sm:$0xff] }
 0x591   : > { %v3927_v36 = vpop.f32.mrf.mxu1 }
 0x592   : > { %v4128_v0 = vmax.f32 %v4096_v8, 0.0  ;;  %v3995_v4 = vadd.f32 %v3927_v36, %v3844_v2 }
 0x594   : > { %4160 = vst.msk [vmem:[%s7819_s13 + $0x68] sm:$0xff] %vm332_vm0, %v4128_v0  ;;  %v4030_v18 = vmul.f32 %v7801_v7, %v3995_v4  ;;  %4874 = vmatmul.msk.f32.gmra.mxu1 %vm332_vm0, %v2426_v62  ;;  %v3643_v17 = vpop.f32.mrf.mxu3  ;;  %v3794_v31 = vpop.f32.mrf.mxu0  ;;  %v3540_v0 = vadd.f32 %v3482_v42, %v3389_v41  ;;  %v8596_v4 = vld [vmem:[#allocation19_spill] sm:$0xff]  ;;  %v3541_v42 = vadd.f32 %v3485_v13, %v3390_v52 }
 0x595   : > { %v3488_v25 = vpop.f32.mrf.mxu2 }
 0x596   : > { %v4065_v60 = vadd.f32 %v7807_v59, %v4030_v18  ;;  %v3542_v13 = vadd.f32 %v3488_v25, %v3391_v58 }
 0x598   : > { %v4097_v46 = vadd.f32 %v4065_v60, %v8593_v61  ;;  %v3698_v61 = vadd.f32 %v3640_v26, %v3540_v0 }
 0x599   : > { %v3930_v49 = vpop.f32.mrf.mxu1 }
 0x59a   : > { %v4129_v43 = vmax.f32 %v4097_v46, 0.0  ;;  %v3996_v48 = vadd.f32 %v3930_v49, %v3845_v47  ;;  %v8597_v47 = vld [vmem:[#allocation21_spill] sm:$0xff]  ;;  %v3849_v30 = vadd.f32 %v3791_v35, %v3698_v61 }
 0x59c   : > { %4161 = vst.msk [vmem:[%s7819_s13 + $0x70] sm:$0xff] %vm332_vm0, %v4129_v43  ;;  %v4031_v21 = vmul.f32 %v7801_v7, %v3996_v48  ;;  %4875 = vmatmul.msk.f32.gmra.mxu1 %vm332_vm0, %v2427_v44  ;;  %v3646_v51 = vpop.f32.mrf.mxu3  ;;  %v3797_v55 = vpop.f32.mrf.mxu0 }
 0x59d   : > { %v3491_v12 = vpop.f32.mrf.mxu2 }
 0x59e   : > { %v4066_v24 = vadd.f32 %v7807_v59, %v4031_v21  ;;  %v3699_v21 = vadd.f32 %v3643_v17, %v3541_v42 }
 0x5a0   : > { %v4098_v33 = vadd.f32 %v4066_v24, %v8594_v63  ;;  %v3850_v63 = vadd.f32 %v3794_v31, %v3699_v21 }
 0x5a1   : > { %v3933_v57 = vpop.f32.mrf.mxu1 }
 0x5a2   : > { %v4130_v27 = vmax.f32 %v4098_v33, 0.0  ;;  %v3997_v38 = vadd.f32 %v3933_v57, %v3846_v56 }
 0x5a4   : > { %4162 = vst.msk [vmem:[%s7819_s13 + $0x78] sm:$0xff] %vm332_vm0, %v4130_v27  ;;  %v4032_v53 = vmul.f32 %v7801_v7, %v3997_v38  ;;  %v3649_v44 = vpop.f32.mrf.mxu3  ;;  %v3800_v26 = vpop.f32.mrf.mxu0  ;;  %v3700_v38 = vadd.f32 %v3646_v51, %v3542_v13 }
 0x5a5   : > { %v3494_v24 = vpop.f32.mrf.mxu2 }
 0x5a6   : > { %v4067_v15 = vadd.f32 %v7807_v59, %v4032_v53  ;;  %v3392_v53 = vadd.f32 %v7711_v6, %v7517_v3  ;;  %v3851_v31 = vadd.f32 %v3797_v55, %v3700_v38  ;;  %v3393_v3 = vadd.f32 %v7723_v34, %v7530_v14  ;;  %v8601_v55 = vld [vmem:[#allocation72_spill] sm:$0xff] }
 0x5a7   : > { %v3394_v14 = vadd.f32 %v8601_v55, %v7543_v19  ;;  %v8604_v19 = vld [vmem:[#allocation61_spill] sm:$0xff] }
 0x5a8   : > { %v4099_v1 = vadd.f32 %v4067_v15, %v8595_v45  ;;  %v3543_v9 = vadd.f32 %v3491_v12, %v3392_v53  ;;  %v8599_v15 = vld [vmem:[#allocation25_spill] sm:$0xff]  ;;  %v3544_v40 = vadd.f32 %v3494_v24, %v3393_v3 }
 0x5a9   : > { %v3936_v8 = vpop.f32.mrf.mxu1  ;;  %v8602_v12 = vld [vmem:[#allocation29_spill] sm:$0xff] }
 0x5aa   : > { %v4131_v2 = vmax.f32 %v4099_v1, 0.0  ;;  %v3998_v36 = vadd.f32 %v3936_v8, %v3847_v37  ;;  %v3701_v25 = vadd.f32 %v3649_v44, %v3543_v9  ;;  %v8613_v55 = vld [vmem:[#allocation69_spill] sm:$0xff] }
 0x5ac   : > { %4163 = vst.msk [vmem:[%s7819_s13 + $0x80] sm:$0xff] %vm332_vm0, %v4131_v2  ;;  %v4033_v62 = vmul.f32 %v7801_v7, %v3998_v36  ;;  %v3652_v27 = vpop.f32.mrf.mxu3  ;;  %v3803_v11 = vpop.f32.mrf.mxu0 }
 0x5ad   : > { %v3497_v17 = vpop.f32.mrf.mxu2 }
 0x5ae   : > { %v4068_v10 = vadd.f32 %v7807_v59, %v4033_v62  ;;  %v8600_v62 = vld [vmem:[#allocation27_spill] sm:$0xff] }
 0x5b0   : > { %v4100_v16 = vadd.f32 %v4068_v10, %v8596_v4  ;;  %v3852_v10 = vadd.f32 %v3800_v26, %v3701_v25  ;;  %v8605_v26 = vld [vmem:[#allocation31_spill] sm:$0xff] }
 0x5b1   : > { %v3939_v18 = vpop.f32.mrf.mxu1  ;;  %v8610_v25 = vld [vmem:[#allocation99_spill] sm:$0xff] }
 0x5b2   : > { %v4132_v60 = vmax.f32 %v4100_v16, 0.0  ;;  %v3999_v22 = vadd.f32 %v3939_v18, %v3848_v50  ;;  %v3702_v50 = vadd.f32 %v3652_v27, %v3544_v40  ;;  %v8607_v27 = vld [vmem:[#allocation65_spill] sm:$0xff]  ;;  %v8611_v40 = vld [vmem:[#allocation35_spill] sm:$0xff] }
 0x5b4   : > { %4164 = vst.msk [vmem:[%s7819_s13 + $0x88] sm:$0xff] %vm332_vm0, %v4132_v60  ;;  %v4034_v46 = vmul.f32 %v7801_v7, %v3999_v22  ;;  %v3655_v2 = vpop.f32.mrf.mxu3  ;;  %v3806_v36 = vpop.f32.mrf.mxu0  ;;  %v3545_v22 = vadd.f32 %v3497_v17, %v3394_v14 }
 0x5b5   : > { %v3500_v51 = vpop.f32.mrf.mxu2 }
 0x5b6   : > { %v4069_v29 = vadd.f32 %v7807_v59, %v4034_v46  ;;  %v3853_v46 = vadd.f32 %v3803_v11, %v3702_v50  ;;  %v8608_v11 = vld [vmem:[#allocation33_spill] sm:$0xff] }
 0x5b8   : > { %v4101_v49 = vadd.f32 %v4069_v29, %v8597_v47 }
 0x5b9   : > { %v3942_v43 = vpop.f32.mrf.mxu1 }
 0x5ba   : > { %v4133_v48 = vmax.f32 %v4101_v49, 0.0  ;;  %v4000_v20 = vadd.f32 %v3942_v43, %v3849_v30  ;;  %v3703_v30 = vadd.f32 %v3655_v2, %v3545_v22  ;;  %v8603_v43 = vld [vmem:[#allocation64_spill] sm:$0xff] }
 0x5bc   : > { %4165 = vst.msk [vmem:[%s7819_s13 + $0x90] sm:$0xff] %vm332_vm0, %v4133_v48  ;;  %v4035_v28 = vmul.f32 %v7801_v7, %v4000_v20  ;;  %v3658_v60 = vpop.f32.mrf.mxu3  ;;  %v3809_v29 = vpop.f32.mrf.mxu0  ;;  %v3395_v48 = vadd.f32 %v8604_v19, %v8603_v43  ;;  %v3854_v24 = vadd.f32 %v3806_v36, %v3703_v30  ;;  %v8616_v43 = vld [vmem:[#allocation70_spill] sm:$0xff] }
 0x5bd   : > { %v3503_v49 = vpop.f32.mrf.mxu2 }
 0x5be   : > { %v4070_v5 = vadd.f32 %v7807_v59, %v4035_v28  ;;  %v3546_v21 = vadd.f32 %v3500_v51, %v3395_v48 }
 0x5c0   : > { %v4102_v35 = vadd.f32 %v4070_v5, %v8598_v39 }
 0x5c1   : > { %v3945_v33 = vpop.f32.mrf.mxu1 }
 0x5c2   : > { %v4134_v56 = vmax.f32 %v4102_v35, 0.0  ;;  %v4001_v57 = vadd.f32 %v3945_v33, %v3850_v63  ;;  %v3704_v63 = vadd.f32 %v3658_v60, %v3546_v21 }
 0x5c4   : > { %4166 = vst.msk [vmem:[%s7819_s13 + $0x98] sm:$0xff] %vm332_vm0, %v4134_v56  ;;  %v4036_v32 = vmul.f32 %v7801_v7, %v4001_v57  ;;  %v3661_v58 = vpop.f32.mrf.mxu3  ;;  %v3812_v35 = vpop.f32.mrf.mxu0  ;;  %v8606_v57 = vld [vmem:[#allocation66_spill] sm:$0xff]  ;;  %v3855_v17 = vadd.f32 %v3809_v29, %v3704_v63 }
 0x5c5   : > { %v3506_v56 = vpop.f32.mrf.mxu2  ;;  %v3396_v38 = vadd.f32 %v8607_v27, %v8606_v57  ;;  %v8619_v57 = vld [vmem:[#allocation74_spill] sm:$0xff] }
 0x5c6   : > { %v4071_v23 = vadd.f32 %v7807_v59, %v4036_v32 }
 0x5c7   : > { %v3547_v53 = vadd.f32 %v3503_v49, %v3396_v38 }
 0x5c8   : > { %v4103_v54 = vadd.f32 %v4071_v23, %v8599_v15 }
 0x5c9   : > { %v3948_v45 = vpop.f32.mrf.mxu1 }
 0x5ca   : > { %v4135_v1 = vmax.f32 %v4103_v54, 0.0  ;;  %v4002_v37 = vadd.f32 %v3948_v45, %v3851_v31  ;;  %v3705_v45 = vadd.f32 %v3661_v58, %v3547_v53 }
 0x5cc   : > { %4167 = vst.msk [vmem:[%s7819_s13 + $0xa0] sm:$0xff] %vm332_vm0, %v4135_v1  ;;  %v4037_v8 = vmul.f32 %v7801_v7, %v4002_v37  ;;  %v3664_v31 = vpop.f32.mrf.mxu3  ;;  %v8609_v37 = vld [vmem:[#allocation91_spill] sm:$0xff]  ;;  %v3815_v2 = vpop.f32.mrf.mxu0 }
 0x5ce   : > { %v4072_v6 = vadd.f32 %v7807_v59, %v4037_v8  ;;  %v3397_v8 = vadd.f32 %v8610_v25, %v8609_v37  ;;  %v8621_v25 = vld [vmem:[#allocation95_spill] sm:$0xff] }
 0x5d0   : > { %v4104_v41 = vadd.f32 %v4072_v6, %v8600_v62  ;;  %v3509_v6 = vpop.f32.mrf.mxu2  ;;  %v3548_v36 = vadd.f32 %v3506_v56, %v3397_v8  ;;  %v8618_v56 = vld [vmem:[#allocation68_spill] sm:$0xff]  ;;  %v8622_v8 = vld [vmem:[#allocation46_spill] sm:$0xff] }
 0x5d1   : > { %v3951_v0 = vpop.f32.mrf.mxu1  ;;  %v3400_v27 = vadd.f32 %v8619_v57, %v8618_v56 }
 0x5d2   : > { %v4136_v4 = vmax.f32 %v4104_v41, 0.0  ;;  %v4003_v16 = vadd.f32 %v3951_v0, %v3852_v10  ;;  %v3856_v41 = vadd.f32 %v3812_v35, %v3705_v45 }
 0x5d4   : > { %4168 = vst.msk [vmem:[%s7819_s13 + $0xa8] sm:$0xff] %vm332_vm0, %v4136_v4  ;;  %v4038_v18 = vmul.f32 %v7801_v7, %v4003_v16  ;;  %v3706_v4 = vadd.f32 %v3664_v31, %v3548_v36  ;;  %v3667_v50 = vpop.f32.mrf.mxu3  ;;  %v3818_v60 = vpop.f32.mrf.mxu0 }
 0x5d6   : > { %v4073_v34 = vadd.f32 %v7807_v59, %v4038_v18  ;;  %v8612_v18 = vld [vmem:[#allocation63_spill] sm:$0xff] }
 0x5d7   : > { %v3398_v14 = vadd.f32 %v8613_v55, %v8612_v18 }
 0x5d8   : > { %v4105_v61 = vadd.f32 %v4073_v34, %v8602_v12  ;;  %v8614_v12 = vld [vmem:[#allocation37_spill] sm:$0xff] }
 0x5d9   : > { %v3954_v52 = vpop.f32.mrf.mxu1  ;;  %v3549_v22 = vadd.f32 %v3509_v6, %v3398_v14  ;;  %v8624_v14 = vld [vmem:[#allocation47_spill] sm:$0xff] }
 0x5da   : > { %v4137_v42 = vmax.f32 %v4105_v61, 0.0  ;;  %v4004_v47 = vadd.f32 %v3954_v52, %v3853_v46  ;;  %v3857_v46 = vadd.f32 %v3815_v2, %v3706_v4  ;;  %v3512_v52 = vpop.f32.mrf.mxu2  ;;  %v3401_v2 = vadd.f32 %v8622_v8, %v8621_v25 }
 0x5db   : > { %v3707_v49 = vadd.f32 %v3667_v50, %v3549_v22 }
 0x5dc   : > { %4169 = vst.msk [vmem:[%s7819_s13 + $0xb0] sm:$0xff] %vm332_vm0, %v4137_v42  ;;  %v4039_v44 = vmul.f32 %v7801_v7, %v4004_v47 }
 0x5de   : > { %v4074_v20 = vadd.f32 %v7807_v59, %v4039_v44  ;;  %v8615_v44 = vld [vmem:[#allocation59_spill] sm:$0xff] }
 0x5df   : > { %v3399_v19 = vadd.f32 %v8616_v43, %v8615_v44 }
 0x5e0   : > { %v4106_v28 = vadd.f32 %v4074_v20, %v8605_v26  ;;  %v3670_v20 = vpop.f32.mrf.mxu3  ;;  %v8617_v26 = vld [vmem:[#allocation39_spill] sm:$0xff] }
 0x5e1   : > { %v3957_v5 = vpop.f32.mrf.mxu1  ;;  %v3550_v21 = vadd.f32 %v3512_v52, %v3399_v19  ;;  %v8625_v52 = vld [vmem:[#allocation45_spill] sm:$0xff] }
 0x5e2   : > { %v4138_v13 = vmax.f32 %v4106_v28, 0.0  ;;  %v4005_v39 = vadd.f32 %v3957_v5, %v3854_v24  ;;  %v3858_v24 = vadd.f32 %v3818_v60, %v3707_v49  ;;  %v3515_v35 = vpop.f32.mrf.mxu2 }
 0x5e3   : > { %v3708_v63 = vadd.f32 %v3670_v20, %v3550_v21  ;;  %v3551_v53 = vadd.f32 %v3515_v35, %v3400_v27 }
 0x5e4   : > { %4170 = vst.msk [vmem:[%s7819_s13 + $0xb8] sm:$0xff] %vm332_vm0, %v4138_v13  ;;  %v4040_v33 = vmul.f32 %v7801_v7, %v4005_v39  ;;  %v3821_v39 = vpop.f32.mrf.mxu0 }
 0x5e6   : > { %v4075_v32 = vadd.f32 %v7807_v59, %v4040_v33 }
 0x5e8   : > { %v4107_v23 = vadd.f32 %v4075_v32, %v8608_v11  ;;  %v3673_v32 = vpop.f32.mrf.mxu3  ;;  %v8620_v11 = vld [vmem:[#allocation41_spill] sm:$0xff] }
 0x5e9   : > { %v3960_v9 = vpop.f32.mrf.mxu1  ;;  %v3709_v45 = vadd.f32 %v3673_v32, %v3551_v53 }
 0x5ea   : > { %v4139_v15 = vmax.f32 %v4107_v23, 0.0  ;;  %v4006_v54 = vadd.f32 %v3960_v9, %v3855_v17  ;;  %v3859_v17 = vadd.f32 %v3821_v39, %v3708_v63  ;;  %v3518_v37 = vpop.f32.mrf.mxu2 }
 0x5eb   : > { %v3552_v36 = vadd.f32 %v3518_v37, %v3401_v2 }
 0x5ec   : > { %4171 = vst.msk [vmem:[%s7819_s13 + $0xc0] sm:$0xff] %vm332_vm0, %v4139_v15  ;;  %v4041_v1 = vmul.f32 %v7801_v7, %v4006_v54  ;;  %v3824_v31 = vpop.f32.mrf.mxu0 }
 0x5ed   : > { %v3860_v6 = vadd.f32 %v3824_v31, %v3709_v45 }
 0x5ee   : > { %v4076_v3 = vadd.f32 %v7807_v59, %v4041_v1 }
 0x5f0   : > { %v4108_v62 = vadd.f32 %v4076_v3, %v8611_v40  ;;  %v8623_v40 = vld [vmem:[#allocation44_spill] sm:$0xff] }
 0x5f1   : > { %v3963_v10 = vpop.f32.mrf.mxu1 }
 0x5f2   : > { %v4140_v51 = vmax.f32 %v4108_v62, 0.0  ;;  %v4007_v0 = vadd.f32 %v3963_v10, %v3856_v41  ;;  %v3676_v41 = vpop.f32.mrf.mxu3 }
 0x5f3   : > { %v3710_v4 = vadd.f32 %v3676_v41, %v3552_v36 }
 0x5f4   : > { %4172 = vst.msk [vmem:[%s7819_s13 + $0xc8] sm:$0xff] %vm332_vm0, %v4140_v51  ;;  %v4042_v16 = vmul.f32 %v7801_v7, %v4007_v0  ;;  %v3827_v50 = vpop.f32.mrf.mxu0 }
 0x5f5   : > { %v3861_v55 = vadd.f32 %v3827_v50, %v3710_v4 }
 0x5f6   : > { %v4077_v34 = vadd.f32 %v7807_v59, %v4042_v16 }
 0x5f8   : > { %v4109_v61 = vadd.f32 %v4077_v34, %v8614_v12 }
 0x5f9   : > { %v3966_v29 = vpop.f32.mrf.mxu1 }
 0x5fa   : > { %v4141_v42 = vmax.f32 %v4109_v61, 0.0  ;;  %v4008_v47 = vadd.f32 %v3966_v29, %v3857_v46 }
 0x5fc   : > { %4173 = vst.msk [vmem:[%s7819_s13 + $0xd0] sm:$0xff] %vm332_vm0, %v4141_v42  ;;  %v4043_v30 = vmul.f32 %v7801_v7, %v4008_v47 }
 0x5fe   : > { %v4078_v48 = vadd.f32 %v7807_v59, %v4043_v30 }
 0x600   : > { %v4110_v28 = vadd.f32 %v4078_v48, %v8617_v26 }
 0x601   : > { %v3969_v58 = vpop.f32.mrf.mxu1 }
 0x602   : > { %v4142_v5 = vmax.f32 %v4110_v28, 0.0  ;;  %v4009_v13 = vadd.f32 %v3969_v58, %v3858_v24 }
 0x604   : > { %4174 = vst.msk [vmem:[%s7819_s13 + $0xd8] sm:$0xff] %vm332_vm0, %v4142_v5  ;;  %v4044_v33 = vmul.f32 %v7801_v7, %v4009_v13 }
 0x606   : > { %v4079_v38 = vadd.f32 %v7807_v59, %v4044_v33 }
 0x608   : > { %v4111_v23 = vadd.f32 %v4079_v38, %v8620_v11 }
 0x609   : > { %v3972_v9 = vpop.f32.mrf.mxu1 }
 0x60a   : > { %v4143_v15 = vmax.f32 %v4111_v23, 0.0  ;;  %v4010_v54 = vadd.f32 %v3972_v9, %v3859_v17 }
 0x60c   : > { %4175 = vst.msk [vmem:[%s7819_s13 + $0xe0] sm:$0xff] %vm332_vm0, %v4143_v15  ;;  %v4045_v1 = vmul.f32 %v7801_v7, %v4010_v54 }
 0x60e   : > { %v4080_v3 = vadd.f32 %v7807_v59, %v4045_v1 }
 0x610   : > { %v4112_v62 = vadd.f32 %v4080_v3, %v8623_v40 }
 0x611   : > { %v3975_v10 = vpop.f32.mrf.mxu1 }
 0x612   : > { %v4144_v51 = vmax.f32 %v4112_v62, 0.0  ;;  %v4011_v0 = vadd.f32 %v3975_v10, %v3860_v6 }
 0x614   : > { %4176 = vst.msk [vmem:[%s7819_s13 + $0xe8] sm:$0xff] %vm332_vm0, %v4144_v51  ;;  %v4046_v16 = vmul.f32 %v7801_v7, %v4011_v0 }
 0x616   : > { %v4081_v18 = vadd.f32 %v7807_v59, %v4046_v16 }
 0x618   : > { %v4113_v34 = vadd.f32 %v4081_v18, %v8624_v14 }
 0x619   : > { %v3978_v60 = vpop.f32.mrf.mxu1 }
 0x61a   : > { %v4145_v22 = vmax.f32 %v4113_v34, 0.0  ;;  %v4012_v12 = vadd.f32 %v3978_v60, %v3861_v55 }
 0x61c   : > { %4177 = vst.msk [vmem:[%s7819_s13 + $0xf0] sm:$0xff] %vm332_vm0, %v4145_v22  ;;  %v4047_v61 = vmul.f32 %v7801_v7, %v4012_v12 }
 0x61e   : > { %v4082_v46 = vadd.f32 %v7807_v59, %v4047_v61 }
 0x620   : > { %v4114_v29 = vadd.f32 %v4082_v46, %v8625_v52 }
 0x622   : > { %v4146_v42 = vmax.f32 %v4114_v29, 0.0 }
 0x624   : > { %4178 = vst.msk [vmem:[%s7819_s13 + $0xf8] sm:$0xff] %vm332_vm0, %v4146_v42 }
 0x625   : > { %5178 = shalt.err (!%p5175_p10)
}
 0x626   : > { %s5228_s14 = smov 128   ;;  %s5229_s13 = smov 8  }
 0x627   : > { %4897 = dma.vmem_to_hbm [thread:$0]  (%p5342_p3), %s4193_s21, 4096, %s4195_s29, %s4180_s28, %s5228_s14, %s5228_s14, %s5229_s13  }
 0x628 PF: > { %s4209_s1 = sand.u32 1, %s5209_s24   ;;  %p8626_p12 = scmp.ge.s32.totalorder %s5221_s27, 2 }
 0x629   : > { %s4210_s30 = scalar_lea.sflag [#allocation6], %s4209_s1 }
 0x62a   : > { %p4911_p13 = pnand %p8626_p12, %p5305_p6 }
 0x62c   : > { %p4912_p0 = pneg %p4911_p13 }
 0x62e   : > { %5204 = dma.done.wait (%p4912_p0), %s4210_s30, 4096  }
 0x62f   : > { %5206 = vsyncadd (%p4912_p0), %s4210_s30, 4294963200  ;;  %p21_p5 = scmp.ge.s32.totalorder %s5332_s22, 4   ;;  %s8627_s24 = smov %s5213_s25 }
 0x630   : > { %s8628_s25 = smov %s5217_s26  ;;  %s8629_s26 = smov %s5348_s10 }
 0x631   : > { %s8630_s27 = smov %s5332_s22  ;;  %23 = sbr.rel (!%p21_p5) target bundleno = 8 (0x8), region = 109 }
 0x636   :  { %4216 = vsyncpa [#allocation5], 1 }
 0x637   :  { %4218 = vsyncpa [#allocation5 + $0x1], 1 }
 0x638   :  { %4219 = vsyncpa [#allocation8], 1 }
 0x639   :  { %4220 = vsyncpa [#allocation6], 1 }
 0x63a   :  { %4222 = vsyncpa [#allocation6 + $0x1], 1 }

</bundles_post_ra>
